<compile_context>
chip_gen: v7x
topology: tpu7x:2x2x1
jax: 0.10.0
libtpu: 0.0.40
codegen_flags: <defaults>
</compile_context>

<pallas_src>
from collections import namedtuple
from functools import partial

import jax
import jax.numpy as jnp
from jax import lax
from jax.experimental import pallas as pl
from jax.experimental.pallas import tpu as pltpu

Sample = namedtuple("Sample", "horizon values chains")

# ---------------------------------------------------------------------------
# Problem sizes (small, consistent with the module's __init__ arguments).
# ---------------------------------------------------------------------------
OBSERVATION_DIM = 8
HORIZON_LENGTH = 8
HISTORY_LENGTH = 8
HORIZON = HORIZON_LENGTH + HISTORY_LENGTH          # 16 timesteps total
HIDDEN = 128                                       # synthetic model hidden dim
STEP_SIZE = 0.05                                   # ODE solver step size
N_STEPS = int(round(1.0 / STEP_SIZE))              # 20 midpoint steps


# ---------------------------------------------------------------------------
# Pallas kernel: full midpoint ODE integration of dx/dt = model(x, t).
# Single invocation (no grid); the 20 RK2 steps run in an unrolled in-kernel
# loop with the state carried in registers and weights hoisted out of the loop.
# ---------------------------------------------------------------------------
def _ode_midpoint_kernel(x0_ref, w1_ref, b1_ref, tw_ref, w2t_ref, b2_ref, x_ref):
    # Load all parameters once; they stay resident in vregs for the whole
    # integration.  Weights arrive pre-cast to bf16 (lane-dense (8,128) slabs).
    w1 = w1_ref[...]                          # (D, HIDDEN)  bf16
    w2t = w2t_ref[...]                        # (D, HIDDEN)  bf16  (= W2^T)
    b1 = b1_ref[...]                          # (1, HIDDEN)  f32
    tw = tw_ref[...]                          # (1, HIDDEN)  f32
    b2 = b2_ref[...]                          # (1, D)       f32

    h = jnp.float32(1.0 / N_STEPS)
    half_h = jnp.float32(0.5 / N_STEPS)
    half_tw = half_h * tw                     # hoisted: (h/2) * tw

    def vector_field(x, b_eff):
        # synthetic model(x, None, t): time-conditioned 2-layer MLP.
        # bf16 on the MXU, f32 accumulation; tanh goes to the EUP slot.
        hid = jnp.tanh(
            jnp.dot(x.astype(jnp.bfloat16), w1,
                    preferred_element_type=jnp.float32)
            + b_eff
        )
        # Second layer contracts over HIDDEN with W2 stored transposed
        # (D, HIDDEN), so the weight tensor stays lane-dense (no transpose).
        out = lax.dot_general(
            hid.astype(jnp.bfloat16), w2t,
            dimension_numbers=(((1,), (1,)), ((), ())),
            preferred_element_type=jnp.float32,
        )
        return out + b2

    def step(i, x):
        t = i.astype(jnp.float32) * h          # t_i = i / N_STEPS
        b_eff0 = b1 + t * tw                   # bias at t_i
        b_eff1 = b_eff0 + half_tw              # bias at t_i + h/2
        k1 = vector_field(x, b_eff0)           # midpoint (RK2) step == ODESolver(
        x_mid = x + half_h * k1                #   method='midpoint',
        k2 = vector_field(x_mid, b_eff1)       #   step_size=1/N_STEPS)
        return x + h * k2

    x = lax.fori_loop(0, N_STEPS, step, x0_ref[...], unroll=True)
    x_ref[...] = x


def ode_integrate(x0, w1, b1, tw, w2t, b2):
    """Integrate dx/dt = model(x, t) from t=0 to t=1 with N_STEPS midpoint steps."""
    H, D = x0.shape
    vmem = lambda: pl.BlockSpec(memory_space=pltpu.MemorySpace.VMEM)
    return pl.pallas_call(
        _ode_midpoint_kernel,
        out_shape=jax.ShapeDtypeStruct((H, D), jnp.float32),
        in_specs=[vmem() for _ in range(6)],
        out_specs=vmem(),
    )(x0, w1, b1, tw, w2t, b2)


# ---------------------------------------------------------------------------
# FlowMatching forward == conditional_sample
# ---------------------------------------------------------------------------
def make_synthetic_model_params(key):
    """Deterministic synthetic parameters for the vector-field model.

    W1 and W2^T are generated in lane-dense (OBSERVATION_DIM, HIDDEN) layout
    and pre-cast to bf16 once here, so the kernel never casts weights.
    """
    k1, k2, k3 = jax.random.split(key, 3)
    w1 = (jax.random.normal(k1, (OBSERVATION_DIM, HIDDEN), jnp.float32) * 0.1
          ).astype(jnp.bfloat16)
    b1 = jnp.zeros((1, HIDDEN), jnp.float32)
    tw = jax.random.normal(k2, (1, HIDDEN), jnp.float32) * 0.1
    w2t = (jax.random.normal(k3, (OBSERVATION_DIM, HIDDEN), jnp.float32) * 0.1
           ).astype(jnp.bfloat16)
    b2 = jnp.zeros((1, OBSERVATION_DIM), jnp.float32)
    return w1, b1, tw, w2t, b2


def apply_conditioning(x, cond):
    """cond: {timestep_index: state (observation_dim,)} -> overwrite rows."""
    for t_idx, state in cond.items():
        x = x.at[t_idx].set(state.astype(x.dtype))
    return x


@partial(jax.jit, static_argnames=("clip_denoised",))
def flow_matching_forward(cond, params, noise_key, clip_denoised=False):
    """Mirrors FlowMatching.conditional_sample (forward)."""
    x_noisy = jax.random.normal(
        noise_key, (HORIZON, OBSERVATION_DIM), dtype=jnp.float32
    )
    # Conditioning is applied to the initial noise only, exactly as in the
    # reference conditional_sample (the solver never re-applies it).
    x_noisy = apply_conditioning(x_noisy, cond)
    sol = ode_integrate(x_noisy, *params)          # x at t = 1
    horizon = sol[HISTORY_LENGTH:]
    if clip_denoised:
        horizon = jnp.clip(horizon, -1.0, 1.0)
    return Sample(horizon=horizon, values=None, chains=None)


if __name__ == "__main__":
    key = jax.random.PRNGKey(0)
    k_params, k_noise, k_cond = jax.random.split(key, 3)

    params = make_synthetic_model_params(k_params)

    # conditions: state pinned at timestep 0 (history conditioning)
    cond = {0: jax.random.normal(k_cond, (OBSERVATION_DIM,), jnp.float32)}

    sample = flow_matching_forward(cond, params, k_noise, clip_denoised=False)
    horizon = jax.block_until_ready(sample.horizon)

    assert horizon.shape == (HORIZON_LENGTH, OBSERVATION_DIM)
    assert horizon.dtype == jnp.float32
    assert bool(jnp.all(jnp.isfinite(horizon)))
    print("KERNEL_OK")
</pallas_src>

<mosaic_0001>
module attributes {stable_mosaic.version = 11 : i64} {
  func.func @_ode_midpoint_kernel(%arg0: memref<16x8xf32, #tpu.memory_space<vmem>>, %arg1: memref<8x128xbf16, #tpu.memory_space<vmem>>, %arg2: memref<1x128xf32, #tpu.memory_space<vmem>>, %arg3: memref<1x128xf32, #tpu.memory_space<vmem>>, %arg4: memref<8x128xbf16, #tpu.memory_space<vmem>>, %arg5: memref<1x8xf32, #tpu.memory_space<vmem>>, %arg6: memref<16x8xf32, #tpu.memory_space<vmem>>) attributes {dimension_semantics = [], scalar_prefetch = 0 : i64, scratch_operands = 0 : i64, tpu.core_type = #tpu.core_type<tc>} {
    %c0 = arith.constant 0 : index
    %c0_0 = arith.constant 0 : index
    %0 = vector.load %arg1[%c0, %c0_0] : memref<8x128xbf16, #tpu.memory_space<vmem>>, vector<8x128xbf16>
    %c0_1 = arith.constant 0 : index
    %c0_2 = arith.constant 0 : index
    %1 = vector.load %arg4[%c0_1, %c0_2] : memref<8x128xbf16, #tpu.memory_space<vmem>>, vector<8x128xbf16>
    %c0_3 = arith.constant 0 : index
    %c0_4 = arith.constant 0 : index
    %2 = vector.load %arg2[%c0_3, %c0_4] : memref<1x128xf32, #tpu.memory_space<vmem>>, vector<1x128xf32>
    %c0_5 = arith.constant 0 : index
    %c0_6 = arith.constant 0 : index
    %3 = vector.load %arg3[%c0_5, %c0_6] : memref<1x128xf32, #tpu.memory_space<vmem>>, vector<1x128xf32>
    %c0_7 = arith.constant 0 : index
    %c0_8 = arith.constant 0 : index
    %4 = vector.load %arg5[%c0_7, %c0_8] : memref<1x8xf32, #tpu.memory_space<vmem>>, vector<1x8xf32>
    %cst = arith.constant 2.500000e-02 : f32
    %5 = vector.broadcast %cst : f32 to vector<1x128xf32>
    %6 = arith.mulf %5, %3 : vector<1x128xf32>
    %c0_9 = arith.constant 0 : index
    %c0_10 = arith.constant 0 : index
    %7 = vector.load %arg0[%c0_9, %c0_10] : memref<16x8xf32, #tpu.memory_space<vmem>>, vector<16x8xf32>
    %cst_11 = arith.constant 5.000000e-02 : f32
    %cst_12 = arith.constant 2.500000e-02 : f32
    %c0_i32 = arith.constant 0 : i32
    %8 = arith.sitofp %c0_i32 : i32 to f32
    %9 = arith.mulf %8, %cst_11 : f32
    %10 = vector.broadcast %9 : f32 to vector<1x128xf32>
    %11 = arith.mulf %10, %3 : vector<1x128xf32>
    %12 = arith.addf %2, %11 : vector<1x128xf32>
    %13 = arith.addf %12, %6 : vector<1x128xf32>
    %14 = arith.truncf %7 : vector<16x8xf32> to vector<16x8xbf16>
    %cst_13 = arith.constant dense<0.000000e+00> : vector<16x128xf32>
    %15 = tpu.matmul %14, %0, %cst_13 {dimension_numbers = #tpu.dot_dimension_numbers<[1], [0], [0], [1], [0, 0, 1, 1], [], []>} : vector<16x8xbf16>, vector<8x128xbf16>, vector<16x128xf32> -> vector<16x128xf32>
    %16 = vector.broadcast %12 : vector<1x128xf32> to vector<16x128xf32>
    %17 = arith.addf %15, %16 : vector<16x128xf32>
    %18 = math.tanh %17 : vector<16x128xf32>
    %19 = arith.truncf %18 : vector<16x128xf32> to vector<16x128xbf16>
    %cst_14 = arith.constant dense<0.000000e+00> : vector<16x8xf32>
    %20 = tpu.matmul %19, %1, %cst_14 {dimension_numbers = #tpu.dot_dimension_numbers<[1], [1], [0], [0], [0, 0, 1, 0], [], []>} : vector<16x128xbf16>, vector<8x128xbf16>, vector<16x8xf32> -> vector<16x8xf32>
    %21 = vector.broadcast %4 : vector<1x8xf32> to vector<16x8xf32>
    %22 = arith.addf %20, %21 : vector<16x8xf32>
    %23 = vector.broadcast %cst_12 : f32 to vector<16x8xf32>
    %24 = arith.mulf %23, %22 : vector<16x8xf32>
    %25 = arith.addf %7, %24 : vector<16x8xf32>
    %26 = arith.truncf %25 : vector<16x8xf32> to vector<16x8xbf16>
    %cst_15 = arith.constant dense<0.000000e+00> : vector<16x128xf32>
    %27 = tpu.matmul %26, %0, %cst_15 {dimension_numbers = #tpu.dot_dimension_numbers<[1], [0], [0], [1], [0, 0, 1, 1], [], []>} : vector<16x8xbf16>, vector<8x128xbf16>, vector<16x128xf32> -> vector<16x128xf32>
    %28 = vector.broadcast %13 : vector<1x128xf32> to vector<16x128xf32>
    %29 = arith.addf %27, %28 : vector<16x128xf32>
    %30 = math.tanh %29 : vector<16x128xf32>
    %31 = arith.truncf %30 : vector<16x128xf32> to vector<16x128xbf16>
    %cst_16 = arith.constant dense<0.000000e+00> : vector<16x8xf32>
    %32 = tpu.matmul %31, %1, %cst_16 {dimension_numbers = #tpu.dot_dimension_numbers<[1], [1], [0], [0], [0, 0, 1, 0], [], []>} : vector<16x128xbf16>, vector<8x128xbf16>, vector<16x8xf32> -> vector<16x8xf32>
    %33 = vector.broadcast %4 : vector<1x8xf32> to vector<16x8xf32>
    %34 = arith.addf %32, %33 : vector<16x8xf32>
    %35 = vector.broadcast %cst_11 : f32 to vector<16x8xf32>
    %36 = arith.mulf %35, %34 : vector<16x8xf32>
    %37 = arith.addf %7, %36 : vector<16x8xf32>
    %c1_i32 = arith.constant 1 : i32
    %38 = arith.sitofp %c1_i32 : i32 to f32
    %39 = arith.mulf %38, %cst_11 : f32
    %40 = vector.broadcast %39 : f32 to vector<1x128xf32>
    %41 = arith.mulf %40, %3 : vector<1x128xf32>
    %42 = arith.addf %2, %41 : vector<1x128xf32>
    %43 = arith.addf %42, %6 : vector<1x128xf32>
    %44 = arith.truncf %37 : vector<16x8xf32> to vector<16x8xbf16>
    %cst_17 = arith.constant dense<0.000000e+00> : vector<16x128xf32>
    %45 = tpu.matmul %44, %0, %cst_17 {dimension_numbers = #tpu.dot_dimension_numbers<[1], [0], [0], [1], [0, 0, 1, 1], [], []>} : vector<16x8xbf16>, vector<8x128xbf16>, vector<16x128xf32> -> vector<16x128xf32>
    %46 = vector.broadcast %42 : vector<1x128xf32> to vector<16x128xf32>
    %47 = arith.addf %45, %46 : vector<16x128xf32>
    %48 = math.tanh %47 : vector<16x128xf32>
    %49 = arith.truncf %48 : vector<16x128xf32> to vector<16x128xbf16>
    %cst_18 = arith.constant dense<0.000000e+00> : vector<16x8xf32>
    %50 = tpu.matmul %49, %1, %cst_18 {dimension_numbers = #tpu.dot_dimension_numbers<[1], [1], [0], [0], [0, 0, 1, 0], [], []>} : vector<16x128xbf16>, vector<8x128xbf16>, vector<16x8xf32> -> vector<16x8xf32>
    %51 = vector.broadcast %4 : vector<1x8xf32> to vector<16x8xf32>
    %52 = arith.addf %50, %51 : vector<16x8xf32>
    %53 = vector.broadcast %cst_12 : f32 to vector<16x8xf32>
    %54 = arith.mulf %53, %52 : vector<16x8xf32>
    %55 = arith.addf %37, %54 : vector<16x8xf32>
    %56 = arith.truncf %55 : vector<16x8xf32> to vector<16x8xbf16>
    %cst_19 = arith.constant dense<0.000000e+00> : vector<16x128xf32>
    %57 = tpu.matmul %56, %0, %cst_19 {dimension_numbers = #tpu.dot_dimension_numbers<[1], [0], [0], [1], [0, 0, 1, 1], [], []>} : vector<16x8xbf16>, vector<8x128xbf16>, vector<16x128xf32> -> vector<16x128xf32>
    %58 = vector.broadcast %43 : vector<1x128xf32> to vector<16x128xf32>
    %59 = arith.addf %57, %58 : vector<16x128xf32>
    %60 = math.tanh %59 : vector<16x128xf32>
    %61 = arith.truncf %60 : vector<16x128xf32> to vector<16x128xbf16>
    %cst_20 = arith.constant dense<0.000000e+00> : vector<16x8xf32>
    %62 = tpu.matmul %61, %1, %cst_20 {dimension_numbers = #tpu.dot_dimension_numbers<[1], [1], [0], [0], [0, 0, 1, 0], [], []>} : vector<16x128xbf16>, vector<8x128xbf16>, vector<16x8xf32> -> vector<16x8xf32>
    %63 = vector.broadcast %4 : vector<1x8xf32> to vector<16x8xf32>
    %64 = arith.addf %62, %63 : vector<16x8xf32>
    %65 = vector.broadcast %cst_11 : f32 to vector<16x8xf32>
    %66 = arith.mulf %65, %64 : vector<16x8xf32>
    %67 = arith.addf %37, %66 : vector<16x8xf32>
    %c2_i32 = arith.constant 2 : i32
    %68 = arith.sitofp %c2_i32 : i32 to f32
    %69 = arith.mulf %68, %cst_11 : f32
    %70 = vector.broadcast %69 : f32 to vector<1x128xf32>
    %71 = arith.mulf %70, %3 : vector<1x128xf32>
    %72 = arith.addf %2, %71 : vector<1x128xf32>
    %73 = arith.addf %72, %6 : vector<1x128xf32>
    %74 = arith.truncf %67 : vector<16x8xf32> to vector<16x8xbf16>
    %cst_21 = arith.constant dense<0.000000e+00> : vector<16x128xf32>
    %75 = tpu.matmul %74, %0, %cst_21 {dimension_numbers = #tpu.dot_dimension_numbers<[1], [0], [0], [1], [0, 0, 1, 1], [], []>} : vector<16x8xbf16>, vector<8x128xbf16>, vector<16x128xf32> -> vector<16x128xf32>
    %76 = vector.broadcast %72 : vector<1x128xf32> to vector<16x128xf32>
    %77 = arith.addf %75, %76 : vector<16x128xf32>
    %78 = math.tanh %77 : vector<16x128xf32>
    %79 = arith.truncf %78 : vector<16x128xf32> to vector<16x128xbf16>
    %cst_22 = arith.constant dense<0.000000e+00> : vector<16x8xf32>
    %80 = tpu.matmul %79, %1, %cst_22 {dimension_numbers = #tpu.dot_dimension_numbers<[1], [1], [0], [0], [0, 0, 1, 0], [], []>} : vector<16x128xbf16>, vector<8x128xbf16>, vector<16x8xf32> -> vector<16x8xf32>
    %81 = vector.broadcast %4 : vector<1x8xf32> to vector<16x8xf32>
    %82 = arith.addf %80, %81 : vector<16x8xf32>
    %83 = vector.broadcast %cst_12 : f32 to vector<16x8xf32>
    %84 = arith.mulf %83, %82 : vector<16x8xf32>
    %85 = arith.addf %67, %84 : vector<16x8xf32>
    %86 = arith.truncf %85 : vector<16x8xf32> to vector<16x8xbf16>
    %cst_23 = arith.constant dense<0.000000e+00> : vector<16x128xf32>
    %87 = tpu.matmul %86, %0, %cst_23 {dimension_numbers = #tpu.dot_dimension_numbers<[1], [0], [0], [1], [0, 0, 1, 1], [], []>} : vector<16x8xbf16>, vector<8x128xbf16>, vector<16x128xf32> -> vector<16x128xf32>
    %88 = vector.broadcast %73 : vector<1x128xf32> to vector<16x128xf32>
    %89 = arith.addf %87, %88 : vector<16x128xf32>
    %90 = math.tanh %89 : vector<16x128xf32>
    %91 = arith.truncf %90 : vector<16x128xf32> to vector<16x128xbf16>
    %cst_24 = arith.constant dense<0.000000e+00> : vector<16x8xf32>
    %92 = tpu.matmul %91, %1, %cst_24 {dimension_numbers = #tpu.dot_dimension_numbers<[1], [1], [0], [0], [0, 0, 1, 0], [], []>} : vector<16x128xbf16>, vector<8x128xbf16>, vector<16x8xf32> -> vector<16x8xf32>
    %93 = vector.broadcast %4 : vector<1x8xf32> to vector<16x8xf32>
    %94 = arith.addf %92, %93 : vector<16x8xf32>
    %95 = vector.broadcast %cst_11 : f32 to vector<16x8xf32>
    %96 = arith.mulf %95, %94 : vector<16x8xf32>
    %97 = arith.addf %67, %96 : vector<16x8xf32>
    %c3_i32 = arith.constant 3 : i32
    %98 = arith.sitofp %c3_i32 : i32 to f32
    %99 = arith.mulf %98, %cst_11 : f32
    %100 = vector.broadcast %99 : f32 to vector<1x128xf32>
    %101 = arith.mulf %100, %3 : vector<1x128xf32>
    %102 = arith.addf %2, %101 : vector<1x128xf32>
    %103 = arith.addf %102, %6 : vector<1x128xf32>
    %104 = arith.truncf %97 : vector<16x8xf32> to vector<16x8xbf16>
    %cst_25 = arith.constant dense<0.000000e+00> : vector<16x128xf32>
    %105 = tpu.matmul %104, %0, %cst_25 {dimension_numbers = #tpu.dot_dimension_numbers<[1], [0], [0], [1], [0, 0, 1, 1], [], []>} : vector<16x8xbf16>, vector<8x128xbf16>, vector<16x128xf32> -> vector<16x128xf32>
    %106 = vector.broadcast %102 : vector<1x128xf32> to vector<16x128xf32>
    %107 = arith.addf %105, %106 : vector<16x128xf32>
    %108 = math.tanh %107 : vector<16x128xf32>
    %109 = arith.truncf %108 : vector<16x128xf32> to vector<16x128xbf16>
    %cst_26 = arith.constant dense<0.000000e+00> : vector<16x8xf32>
    %110 = tpu.matmul %109, %1, %cst_26 {dimension_numbers = #tpu.dot_dimension_numbers<[1], [1], [0], [0], [0, 0, 1, 0], [], []>} : vector<16x128xbf16>, vector<8x128xbf16>, vector<16x8xf32> -> vector<16x8xf32>
    %111 = vector.broadcast %4 : vector<1x8xf32> to vector<16x8xf32>
    %112 = arith.addf %110, %111 : vector<16x8xf32>
    %113 = vector.broadcast %cst_12 : f32 to vector<16x8xf32>
    %114 = arith.mulf %113, %112 : vector<16x8xf32>
    %115 = arith.addf %97, %114 : vector<16x8xf32>
    %116 = arith.truncf %115 : vector<16x8xf32> to vector<16x8xbf16>
    %cst_27 = arith.constant dense<0.000000e+00> : vector<16x128xf32>
    %117 = tpu.matmul %116, %0, %cst_27 {dimension_numbers = #tpu.dot_dimension_numbers<[1], [0], [0], [1], [0, 0, 1, 1], [], []>} : vector<16x8xbf16>, vector<8x128xbf16>, vector<16x128xf32> -> vector<16x128xf32>
    %118 = vector.broadcast %103 : vector<1x128xf32> to vector<16x128xf32>
    %119 = arith.addf %117, %118 : vector<16x128xf32>
    %120 = math.tanh %119 : vector<16x128xf32>
    %121 = arith.truncf %120 : vector<16x128xf32> to vector<16x128xbf16>
    %cst_28 = arith.constant dense<0.000000e+00> : vector<16x8xf32>
    %122 = tpu.matmul %121, %1, %cst_28 {dimension_numbers = #tpu.dot_dimension_numbers<[1], [1], [0], [0], [0, 0, 1, 0], [], []>} : vector<16x128xbf16>, vector<8x128xbf16>, vector<16x8xf32> -> vector<16x8xf32>
    %123 = vector.broadcast %4 : vector<1x8xf32> to vector<16x8xf32>
    %124 = arith.addf %122, %123 : vector<16x8xf32>
    %125 = vector.broadcast %cst_11 : f32 to vector<16x8xf32>
    %126 = arith.mulf %125, %124 : vector<16x8xf32>
    %127 = arith.addf %97, %126 : vector<16x8xf32>
    %c4_i32 = arith.constant 4 : i32
    %128 = arith.sitofp %c4_i32 : i32 to f32
    %129 = arith.mulf %128, %cst_11 : f32
    %130 = vector.broadcast %129 : f32 to vector<1x128xf32>
    %131 = arith.mulf %130, %3 : vector<1x128xf32>
    %132 = arith.addf %2, %131 : vector<1x128xf32>
    %133 = arith.addf %132, %6 : vector<1x128xf32>
    %134 = arith.truncf %127 : vector<16x8xf32> to vector<16x8xbf16>
    %cst_29 = arith.constant dense<0.000000e+00> : vector<16x128xf32>
    %135 = tpu.matmul %134, %0, %cst_29 {dimension_numbers = #tpu.dot_dimension_numbers<[1], [0], [0], [1], [0, 0, 1, 1], [], []>} : vector<16x8xbf16>, vector<8x128xbf16>, vector<16x128xf32> -> vector<16x128xf32>
    %136 = vector.broadcast %132 : vector<1x128xf32> to vector<16x128xf32>
    %137 = arith.addf %135, %136 : vector<16x128xf32>
    %138 = math.tanh %137 : vector<16x128xf32>
    %139 = arith.truncf %138 : vector<16x128xf32> to vector<16x128xbf16>
    %cst_30 = arith.constant dense<0.000000e+00> : vector<16x8xf32>
    %140 = tpu.matmul %139, %1, %cst_30 {dimension_numbers = #tpu.dot_dimension_numbers<[1], [1], [0], [0], [0, 0, 1, 0], [], []>} : vector<16x128xbf16>, vector<8x128xbf16>, vector<16x8xf32> -> vector<16x8xf32>
    %141 = vector.broadcast %4 : vector<1x8xf32> to vector<16x8xf32>
    %142 = arith.addf %140, %141 : vector<16x8xf32>
    %143 = vector.broadcast %cst_12 : f32 to vector<16x8xf32>
    %144 = arith.mulf %143, %142 : vector<16x8xf32>
    %145 = arith.addf %127, %144 : vector<16x8xf32>
    %146 = arith.truncf %145 : vector<16x8xf32> to vector<16x8xbf16>
    %cst_31 = arith.constant dense<0.000000e+00> : vector<16x128xf32>
    %147 = tpu.matmul %146, %0, %cst_31 {dimension_numbers = #tpu.dot_dimension_numbers<[1], [0], [0], [1], [0, 0, 1, 1], [], []>} : vector<16x8xbf16>, vector<8x128xbf16>, vector<16x128xf32> -> vector<16x128xf32>
    %148 = vector.broadcast %133 : vector<1x128xf32> to vector<16x128xf32>
    %149 = arith.addf %147, %148 : vector<16x128xf32>
    %150 = math.tanh %149 : vector<16x128xf32>
    %151 = arith.truncf %150 : vector<16x128xf32> to vector<16x128xbf16>
    %cst_32 = arith.constant dense<0.000000e+00> : vector<16x8xf32>
    %152 = tpu.matmul %151, %1, %cst_32 {dimension_numbers = #tpu.dot_dimension_numbers<[1], [1], [0], [0], [0, 0, 1, 0], [], []>} : vector<16x128xbf16>, vector<8x128xbf16>, vector<16x8xf32> -> vector<16x8xf32>
    %153 = vector.broadcast %4 : vector<1x8xf32> to vector<16x8xf32>
    %154 = arith.addf %152, %153 : vector<16x8xf32>
    %155 = vector.broadcast %cst_11 : f32 to vector<16x8xf32>
    %156 = arith.mulf %155, %154 : vector<16x8xf32>
    %157 = arith.addf %127, %156 : vector<16x8xf32>
    %c5_i32 = arith.constant 5 : i32
    %158 = arith.sitofp %c5_i32 : i32 to f32
    %159 = arith.mulf %158, %cst_11 : f32
    %160 = vector.broadcast %159 : f32 to vector<1x128xf32>
    %161 = arith.mulf %160, %3 : vector<1x128xf32>
    %162 = arith.addf %2, %161 : vector<1x128xf32>
    %163 = arith.addf %162, %6 : vector<1x128xf32>
    %164 = arith.truncf %157 : vector<16x8xf32> to vector<16x8xbf16>
    %cst_33 = arith.constant dense<0.000000e+00> : vector<16x128xf32>
    %165 = tpu.matmul %164, %0, %cst_33 {dimension_numbers = #tpu.dot_dimension_numbers<[1], [0], [0], [1], [0, 0, 1, 1], [], []>} : vector<16x8xbf16>, vector<8x128xbf16>, vector<16x128xf32> -> vector<16x128xf32>
    %166 = vector.broadcast %162 : vector<1x128xf32> to vector<16x128xf32>
    %167 = arith.addf %165, %166 : vector<16x128xf32>
    %168 = math.tanh %167 : vector<16x128xf32>
    %169 = arith.truncf %168 : vector<16x128xf32> to vector<16x128xbf16>
    %cst_34 = arith.constant dense<0.000000e+00> : vector<16x8xf32>
    %170 = tpu.matmul %169, %1, %cst_34 {dimension_numbers = #tpu.dot_dimension_numbers<[1], [1], [0], [0], [0, 0, 1, 0], [], []>} : vector<16x128xbf16>, vector<8x128xbf16>, vector<16x8xf32> -> vector<16x8xf32>
    %171 = vector.broadcast %4 : vector<1x8xf32> to vector<16x8xf32>
    %172 = arith.addf %170, %171 : vector<16x8xf32>
    %173 = vector.broadcast %cst_12 : f32 to vector<16x8xf32>
    %174 = arith.mulf %173, %172 : vector<16x8xf32>
    %175 = arith.addf %157, %174 : vector<16x8xf32>
    %176 = arith.truncf %175 : vector<16x8xf32> to vector<16x8xbf16>
    %cst_35 = arith.constant dense<0.000000e+00> : vector<16x128xf32>
    %177 = tpu.matmul %176, %0, %cst_35 {dimension_numbers = #tpu.dot_dimension_numbers<[1], [0], [0], [1], [0, 0, 1, 1], [], []>} : vector<16x8xbf16>, vector<8x128xbf16>, vector<16x128xf32> -> vector<16x128xf32>
    %178 = vector.broadcast %163 : vector<1x128xf32> to vector<16x128xf32>
    %179 = arith.addf %177, %178 : vector<16x128xf32>
    %180 = math.tanh %179 : vector<16x128xf32>
    %181 = arith.truncf %180 : vector<16x128xf32> to vector<16x128xbf16>
    %cst_36 = arith.constant dense<0.000000e+00> : vector<16x8xf32>
    %182 = tpu.matmul %181, %1, %cst_36 {dimension_numbers = #tpu.dot_dimension_numbers<[1], [1], [0], [0], [0, 0, 1, 0], [], []>} : vector<16x128xbf16>, vector<8x128xbf16>, vector<16x8xf32> -> vector<16x8xf32>
    %183 = vector.broadcast %4 : vector<1x8xf32> to vector<16x8xf32>
    %184 = arith.addf %182, %183 : vector<16x8xf32>
    %185 = vector.broadcast %cst_11 : f32 to vector<16x8xf32>
    %186 = arith.mulf %185, %184 : vector<16x8xf32>
    %187 = arith.addf %157, %186 : vector<16x8xf32>
    %c6_i32 = arith.constant 6 : i32
    %188 = arith.sitofp %c6_i32 : i32 to f32
    %189 = arith.mulf %188, %cst_11 : f32
    %190 = vector.broadcast %189 : f32 to vector<1x128xf32>
    %191 = arith.mulf %190, %3 : vector<1x128xf32>
    %192 = arith.addf %2, %191 : vector<1x128xf32>
    %193 = arith.addf %192, %6 : vector<1x128xf32>
    %194 = arith.truncf %187 : vector<16x8xf32> to vector<16x8xbf16>
    %cst_37 = arith.constant dense<0.000000e+00> : vector<16x128xf32>
    %195 = tpu.matmul %194, %0, %cst_37 {dimension_numbers = #tpu.dot_dimension_numbers<[1], [0], [0], [1], [0, 0, 1, 1], [], []>} : vector<16x8xbf16>, vector<8x128xbf16>, vector<16x128xf32> -> vector<16x128xf32>
    %196 = vector.broadcast %192 : vector<1x128xf32> to vector<16x128xf32>
    %197 = arith.addf %195, %196 : vector<16x128xf32>
    %198 = math.tanh %197 : vector<16x128xf32>
    %199 = arith.truncf %198 : vector<16x128xf32> to vector<16x128xbf16>
    %cst_38 = arith.constant dense<0.000000e+00> : vector<16x8xf32>
    %200 = tpu.matmul %199, %1, %cst_38 {dimension_numbers = #tpu.dot_dimension_numbers<[1], [1], [0], [0], [0, 0, 1, 0], [], []>} : vector<16x128xbf16>, vector<8x128xbf16>, vector<16x8xf32> -> vector<16x8xf32>
    %201 = vector.broadcast %4 : vector<1x8xf32> to vector<16x8xf32>
    %202 = arith.addf %200, %201 : vector<16x8xf32>
    %203 = vector.broadcast %cst_12 : f32 to vector<16x8xf32>
    %204 = arith.mulf %203, %202 : vector<16x8xf32>
    %205 = arith.addf %187, %204 : vector<16x8xf32>
    %206 = arith.truncf %205 : vector<16x8xf32> to vector<16x8xbf16>
    %cst_39 = arith.constant dense<0.000000e+00> : vector<16x128xf32>
    %207 = tpu.matmul %206, %0, %cst_39 {dimension_numbers = #tpu.dot_dimension_numbers<[1], [0], [0], [1], [0, 0, 1, 1], [], []>} : vector<16x8xbf16>, vector<8x128xbf16>, vector<16x128xf32> -> vector<16x128xf32>
    %208 = vector.broadcast %193 : vector<1x128xf32> to vector<16x128xf32>
    %209 = arith.addf %207, %208 : vector<16x128xf32>
    %210 = math.tanh %209 : vector<16x128xf32>
    %211 = arith.truncf %210 : vector<16x128xf32> to vector<16x128xbf16>
    %cst_40 = arith.constant dense<0.000000e+00> : vector<16x8xf32>
    %212 = tpu.matmul %211, %1, %cst_40 {dimension_numbers = #tpu.dot_dimension_numbers<[1], [1], [0], [0], [0, 0, 1, 0], [], []>} : vector<16x128xbf16>, vector<8x128xbf16>, vector<16x8xf32> -> vector<16x8xf32>
    %213 = vector.broadcast %4 : vector<1x8xf32> to vector<16x8xf32>
    %214 = arith.addf %212, %213 : vector<16x8xf32>
    %215 = vector.broadcast %cst_11 : f32 to vector<16x8xf32>
    %216 = arith.mulf %215, %214 : vector<16x8xf32>
    %217 = arith.addf %187, %216 : vector<16x8xf32>
    %c7_i32 = arith.constant 7 : i32
    %218 = arith.sitofp %c7_i32 : i32 to f32
    %219 = arith.mulf %218, %cst_11 : f32
    %220 = vector.broadcast %219 : f32 to vector<1x128xf32>
    %221 = arith.mulf %220, %3 : vector<1x128xf32>
    %222 = arith.addf %2, %221 : vector<1x128xf32>
    %223 = arith.addf %222, %6 : vector<1x128xf32>
    %224 = arith.truncf %217 : vector<16x8xf32> to vector<16x8xbf16>
    %cst_41 = arith.constant dense<0.000000e+00> : vector<16x128xf32>
    %225 = tpu.matmul %224, %0, %cst_41 {dimension_numbers = #tpu.dot_dimension_numbers<[1], [0], [0], [1], [0, 0, 1, 1], [], []>} : vector<16x8xbf16>, vector<8x128xbf16>, vector<16x128xf32> -> vector<16x128xf32>
    %226 = vector.broadcast %222 : vector<1x128xf32> to vector<16x128xf32>
    %227 = arith.addf %225, %226 : vector<16x128xf32>
    %228 = math.tanh %227 : vector<16x128xf32>
    %229 = arith.truncf %228 : vector<16x128xf32> to vector<16x128xbf16>
    %cst_42 = arith.constant dense<0.000000e+00> : vector<16x8xf32>
    %230 = tpu.matmul %229, %1, %cst_42 {dimension_numbers = #tpu.dot_dimension_numbers<[1], [1], [0], [0], [0, 0, 1, 0], [], []>} : vector<16x128xbf16>, vector<8x128xbf16>, vector<16x8xf32> -> vector<16x8xf32>
    %231 = vector.broadcast %4 : vector<1x8xf32> to vector<16x8xf32>
    %232 = arith.addf %230, %231 : vector<16x8xf32>
    %233 = vector.broadcast %cst_12 : f32 to vector<16x8xf32>
    %234 = arith.mulf %233, %232 : vector<16x8xf32>
    %235 = arith.addf %217, %234 : vector<16x8xf32>
    %236 = arith.truncf %235 : vector<16x8xf32> to vector<16x8xbf16>
    %cst_43 = arith.constant dense<0.000000e+00> : vector<16x128xf32>
    %237 = tpu.matmul %236, %0, %cst_43 {dimension_numbers = #tpu.dot_dimension_numbers<[1], [0], [0], [1], [0, 0, 1, 1], [], []>} : vector<16x8xbf16>, vector<8x128xbf16>, vector<16x128xf32> -> vector<16x128xf32>
    %238 = vector.broadcast %223 : vector<1x128xf32> to vector<16x128xf32>
    %239 = arith.addf %237, %238 : vector<16x128xf32>
    %240 = math.tanh %239 : vector<16x128xf32>
    %241 = arith.truncf %240 : vector<16x128xf32> to vector<16x128xbf16>
    %cst_44 = arith.constant dense<0.000000e+00> : vector<16x8xf32>
    %242 = tpu.matmul %241, %1, %cst_44 {dimension_numbers = #tpu.dot_dimension_numbers<[1], [1], [0], [0], [0, 0, 1, 0], [], []>} : vector<16x128xbf16>, vector<8x128xbf16>, vector<16x8xf32> -> vector<16x8xf32>
    %243 = vector.broadcast %4 : vector<1x8xf32> to vector<16x8xf32>
    %244 = arith.addf %242, %243 : vector<16x8xf32>
    %245 = vector.broadcast %cst_11 : f32 to vector<16x8xf32>
    %246 = arith.mulf %245, %244 : vector<16x8xf32>
    %247 = arith.addf %217, %246 : vector<16x8xf32>
    %c8_i32 = arith.constant 8 : i32
    %248 = arith.sitofp %c8_i32 : i32 to f32
    %249 = arith.mulf %248, %cst_11 : f32
    %250 = vector.broadcast %249 : f32 to vector<1x128xf32>
    %251 = arith.mulf %250, %3 : vector<1x128xf32>
    %252 = arith.addf %2, %251 : vector<1x128xf32>
    %253 = arith.addf %252, %6 : vector<1x128xf32>
    %254 = arith.truncf %247 : vector<16x8xf32> to vector<16x8xbf16>
    %cst_45 = arith.constant dense<0.000000e+00> : vector<16x128xf32>
    %255 = tpu.matmul %254, %0, %cst_45 {dimension_numbers = #tpu.dot_dimension_numbers<[1], [0], [0], [1], [0, 0, 1, 1], [], []>} : vector<16x8xbf16>, vector<8x128xbf16>, vector<16x128xf32> -> vector<16x128xf32>
    %256 = vector.broadcast %252 : vector<1x128xf32> to vector<16x128xf32>
    %257 = arith.addf %255, %256 : vector<16x128xf32>
    %258 = math.tanh %257 : vector<16x128xf32>
    %259 = arith.truncf %258 : vector<16x128xf32> to vector<16x128xbf16>
    %cst_46 = arith.constant dense<0.000000e+00> : vector<16x8xf32>
    %260 = tpu.matmul %259, %1, %cst_46 {dimension_numbers = #tpu.dot_dimension_numbers<[1], [1], [0], [0], [0, 0, 1, 0], [], []>} : vector<16x128xbf16>, vector<8x128xbf16>, vector<16x8xf32> -> vector<16x8xf32>
    %261 = vector.broadcast %4 : vector<1x8xf32> to vector<16x8xf32>
    %262 = arith.addf %260, %261 : vector<16x8xf32>
    %263 = vector.broadcast %cst_12 : f32 to vector<16x8xf32>
    %264 = arith.mulf %263, %262 : vector<16x8xf32>
    %265 = arith.addf %247, %264 : vector<16x8xf32>
    %266 = arith.truncf %265 : vector<16x8xf32> to vector<16x8xbf16>
    %cst_47 = arith.constant dense<0.000000e+00> : vector<16x128xf32>
    %267 = tpu.matmul %266, %0, %cst_47 {dimension_numbers = #tpu.dot_dimension_numbers<[1], [0], [0], [1], [0, 0, 1, 1], [], []>} : vector<16x8xbf16>, vector<8x128xbf16>, vector<16x128xf32> -> vector<16x128xf32>
    %268 = vector.broadcast %253 : vector<1x128xf32> to vector<16x128xf32>
    %269 = arith.addf %267, %268 : vector<16x128xf32>
    %270 = math.tanh %269 : vector<16x128xf32>
    %271 = arith.truncf %270 : vector<16x128xf32> to vector<16x128xbf16>
    %cst_48 = arith.constant dense<0.000000e+00> : vector<16x8xf32>
    %272 = tpu.matmul %271, %1, %cst_48 {dimension_numbers = #tpu.dot_dimension_numbers<[1], [1], [0], [0], [0, 0, 1, 0], [], []>} : vector<16x128xbf16>, vector<8x128xbf16>, vector<16x8xf32> -> vector<16x8xf32>
    %273 = vector.broadcast %4 : vector<1x8xf32> to vector<16x8xf32>
    %274 = arith.addf %272, %273 : vector<16x8xf32>
    %275 = vector.broadcast %cst_11 : f32 to vector<16x8xf32>
    %276 = arith.mulf %275, %274 : vector<16x8xf32>
    %277 = arith.addf %247, %276 : vector<16x8xf32>
    %c9_i32 = arith.constant 9 : i32
    %278 = arith.sitofp %c9_i32 : i32 to f32
    %279 = arith.mulf %278, %cst_11 : f32
    %280 = vector.broadcast %279 : f32 to vector<1x128xf32>
    %281 = arith.mulf %280, %3 : vector<1x128xf32>
    %282 = arith.addf %2, %281 : vector<1x128xf32>
    %283 = arith.addf %282, %6 : vector<1x128xf32>
    %284 = arith.truncf %277 : vector<16x8xf32> to vector<16x8xbf16>
    %cst_49 = arith.constant dense<0.000000e+00> : vector<16x128xf32>
    %285 = tpu.matmul %284, %0, %cst_49 {dimension_numbers = #tpu.dot_dimension_numbers<[1], [0], [0], [1], [0, 0, 1, 1], [], []>} : vector<16x8xbf16>, vector<8x128xbf16>, vector<16x128xf32> -> vector<16x128xf32>
    %286 = vector.broadcast %282 : vector<1x128xf32> to vector<16x128xf32>
    %287 = arith.addf %285, %286 : vector<16x128xf32>
    %288 = math.tanh %287 : vector<16x128xf32>
    %289 = arith.truncf %288 : vector<16x128xf32> to vector<16x128xbf16>
    %cst_50 = arith.constant dense<0.000000e+00> : vector<16x8xf32>
    %290 = tpu.matmul %289, %1, %cst_50 {dimension_numbers = #tpu.dot_dimension_numbers<[1], [1], [0], [0], [0, 0, 1, 0], [], []>} : vector<16x128xbf16>, vector<8x128xbf16>, vector<16x8xf32> -> vector<16x8xf32>
    %291 = vector.broadcast %4 : vector<1x8xf32> to vector<16x8xf32>
    %292 = arith.addf %290, %291 : vector<16x8xf32>
    %293 = vector.broadcast %cst_12 : f32 to vector<16x8xf32>
    %294 = arith.mulf %293, %292 : vector<16x8xf32>
    %295 = arith.addf %277, %294 : vector<16x8xf32>
    %296 = arith.truncf %295 : vector<16x8xf32> to vector<16x8xbf16>
    %cst_51 = arith.constant dense<0.000000e+00> : vector<16x128xf32>
    %297 = tpu.matmul %296, %0, %cst_51 {dimension_numbers = #tpu.dot_dimension_numbers<[1], [0], [0], [1], [0, 0, 1, 1], [], []>} : vector<16x8xbf16>, vector<8x128xbf16>, vector<16x128xf32> -> vector<16x128xf32>
    %298 = vector.broadcast %283 : vector<1x128xf32> to vector<16x128xf32>
    %299 = arith.addf %297, %298 : vector<16x128xf32>
    %300 = math.tanh %299 : vector<16x128xf32>
    %301 = arith.truncf %300 : vector<16x128xf32> to vector<16x128xbf16>
    %cst_52 = arith.constant dense<0.000000e+00> : vector<16x8xf32>
    %302 = tpu.matmul %301, %1, %cst_52 {dimension_numbers = #tpu.dot_dimension_numbers<[1], [1], [0], [0], [0, 0, 1, 0], [], []>} : vector<16x128xbf16>, vector<8x128xbf16>, vector<16x8xf32> -> vector<16x8xf32>
    %303 = vector.broadcast %4 : vector<1x8xf32> to vector<16x8xf32>
    %304 = arith.addf %302, %303 : vector<16x8xf32>
    %305 = vector.broadcast %cst_11 : f32 to vector<16x8xf32>
    %306 = arith.mulf %305, %304 : vector<16x8xf32>
    %307 = arith.addf %277, %306 : vector<16x8xf32>
    %c10_i32 = arith.constant 10 : i32
    %308 = arith.sitofp %c10_i32 : i32 to f32
    %309 = arith.mulf %308, %cst_11 : f32
    %310 = vector.broadcast %309 : f32 to vector<1x128xf32>
    %311 = arith.mulf %310, %3 : vector<1x128xf32>
    %312 = arith.addf %2, %311 : vector<1x128xf32>
    %313 = arith.addf %312, %6 : vector<1x128xf32>
    %314 = arith.truncf %307 : vector<16x8xf32> to vector<16x8xbf16>
    %cst_53 = arith.constant dense<0.000000e+00> : vector<16x128xf32>
    %315 = tpu.matmul %314, %0, %cst_53 {dimension_numbers = #tpu.dot_dimension_numbers<[1], [0], [0], [1], [0, 0, 1, 1], [], []>} : vector<16x8xbf16>, vector<8x128xbf16>, vector<16x128xf32> -> vector<16x128xf32>
    %316 = vector.broadcast %312 : vector<1x128xf32> to vector<16x128xf32>
    %317 = arith.addf %315, %316 : vector<16x128xf32>
    %318 = math.tanh %317 : vector<16x128xf32>
    %319 = arith.truncf %318 : vector<16x128xf32> to vector<16x128xbf16>
    %cst_54 = arith.constant dense<0.000000e+00> : vector<16x8xf32>
    %320 = tpu.matmul %319, %1, %cst_54 {dimension_numbers = #tpu.dot_dimension_numbers<[1], [1], [0], [0], [0, 0, 1, 0], [], []>} : vector<16x128xbf16>, vector<8x128xbf16>, vector<16x8xf32> -> vector<16x8xf32>
    %321 = vector.broadcast %4 : vector<1x8xf32> to vector<16x8xf32>
    %322 = arith.addf %320, %321 : vector<16x8xf32>
    %323 = vector.broadcast %cst_12 : f32 to vector<16x8xf32>
    %324 = arith.mulf %323, %322 : vector<16x8xf32>
    %325 = arith.addf %307, %324 : vector<16x8xf32>
    %326 = arith.truncf %325 : vector<16x8xf32> to vector<16x8xbf16>
    %cst_55 = arith.constant dense<0.000000e+00> : vector<16x128xf32>
    %327 = tpu.matmul %326, %0, %cst_55 {dimension_numbers = #tpu.dot_dimension_numbers<[1], [0], [0], [1], [0, 0, 1, 1], [], []>} : vector<16x8xbf16>, vector<8x128xbf16>, vector<16x128xf32> -> vector<16x128xf32>
    %328 = vector.broadcast %313 : vector<1x128xf32> to vector<16x128xf32>
    %329 = arith.addf %327, %328 : vector<16x128xf32>
    %330 = math.tanh %329 : vector<16x128xf32>
    %331 = arith.truncf %330 : vector<16x128xf32> to vector<16x128xbf16>
    %cst_56 = arith.constant dense<0.000000e+00> : vector<16x8xf32>
    %332 = tpu.matmul %331, %1, %cst_56 {dimension_numbers = #tpu.dot_dimension_numbers<[1], [1], [0], [0], [0, 0, 1, 0], [], []>} : vector<16x128xbf16>, vector<8x128xbf16>, vector<16x8xf32> -> vector<16x8xf32>
    %333 = vector.broadcast %4 : vector<1x8xf32> to vector<16x8xf32>
    %334 = arith.addf %332, %333 : vector<16x8xf32>
    %335 = vector.broadcast %cst_11 : f32 to vector<16x8xf32>
    %336 = arith.mulf %335, %334 : vector<16x8xf32>
    %337 = arith.addf %307, %336 : vector<16x8xf32>
    %c11_i32 = arith.constant 11 : i32
    %338 = arith.sitofp %c11_i32 : i32 to f32
    %339 = arith.mulf %338, %cst_11 : f32
    %340 = vector.broadcast %339 : f32 to vector<1x128xf32>
    %341 = arith.mulf %340, %3 : vector<1x128xf32>
    %342 = arith.addf %2, %341 : vector<1x128xf32>
    %343 = arith.addf %342, %6 : vector<1x128xf32>
    %344 = arith.truncf %337 : vector<16x8xf32> to vector<16x8xbf16>
    %cst_57 = arith.constant dense<0.000000e+00> : vector<16x128xf32>
    %345 = tpu.matmul %344, %0, %cst_57 {dimension_numbers = #tpu.dot_dimension_numbers<[1], [0], [0], [1], [0, 0, 1, 1], [], []>} : vector<16x8xbf16>, vector<8x128xbf16>, vector<16x128xf32> -> vector<16x128xf32>
    %346 = vector.broadcast %342 : vector<1x128xf32> to vector<16x128xf32>
    %347 = arith.addf %345, %346 : vector<16x128xf32>
    %348 = math.tanh %347 : vector<16x128xf32>
    %349 = arith.truncf %348 : vector<16x128xf32> to vector<16x128xbf16>
    %cst_58 = arith.constant dense<0.000000e+00> : vector<16x8xf32>
    %350 = tpu.matmul %349, %1, %cst_58 {dimension_numbers = #tpu.dot_dimension_numbers<[1], [1], [0], [0], [0, 0, 1, 0], [], []>} : vector<16x128xbf16>, vector<8x128xbf16>, vector<16x8xf32> -> vector<16x8xf32>
    %351 = vector.broadcast %4 : vector<1x8xf32> to vector<16x8xf32>
    %352 = arith.addf %350, %351 : vector<16x8xf32>
    %353 = vector.broadcast %cst_12 : f32 to vector<16x8xf32>
    %354 = arith.mulf %353, %352 : vector<16x8xf32>
    %355 = arith.addf %337, %354 : vector<16x8xf32>
    %356 = arith.truncf %355 : vector<16x8xf32> to vector<16x8xbf16>
    %cst_59 = arith.constant dense<0.000000e+00> : vector<16x128xf32>
    %357 = tpu.matmul %356, %0, %cst_59 {dimension_numbers = #tpu.dot_dimension_numbers<[1], [0], [0], [1], [0, 0, 1, 1], [], []>} : vector<16x8xbf16>, vector<8x128xbf16>, vector<16x128xf32> -> vector<16x128xf32>
    %358 = vector.broadcast %343 : vector<1x128xf32> to vector<16x128xf32>
    %359 = arith.addf %357, %358 : vector<16x128xf32>
    %360 = math.tanh %359 : vector<16x128xf32>
    %361 = arith.truncf %360 : vector<16x128xf32> to vector<16x128xbf16>
    %cst_60 = arith.constant dense<0.000000e+00> : vector<16x8xf32>
    %362 = tpu.matmul %361, %1, %cst_60 {dimension_numbers = #tpu.dot_dimension_numbers<[1], [1], [0], [0], [0, 0, 1, 0], [], []>} : vector<16x128xbf16>, vector<8x128xbf16>, vector<16x8xf32> -> vector<16x8xf32>
    %363 = vector.broadcast %4 : vector<1x8xf32> to vector<16x8xf32>
    %364 = arith.addf %362, %363 : vector<16x8xf32>
    %365 = vector.broadcast %cst_11 : f32 to vector<16x8xf32>
    %366 = arith.mulf %365, %364 : vector<16x8xf32>
    %367 = arith.addf %337, %366 : vector<16x8xf32>
    %c12_i32 = arith.constant 12 : i32
    %368 = arith.sitofp %c12_i32 : i32 to f32
    %369 = arith.mulf %368, %cst_11 : f32
    %370 = vector.broadcast %369 : f32 to vector<1x128xf32>
    %371 = arith.mulf %370, %3 : vector<1x128xf32>
    %372 = arith.addf %2, %371 : vector<1x128xf32>
    %373 = arith.addf %372, %6 : vector<1x128xf32>
    %374 = arith.truncf %367 : vector<16x8xf32> to vector<16x8xbf16>
    %cst_61 = arith.constant dense<0.000000e+00> : vector<16x128xf32>
    %375 = tpu.matmul %374, %0, %cst_61 {dimension_numbers = #tpu.dot_dimension_numbers<[1], [0], [0], [1], [0, 0, 1, 1], [], []>} : vector<16x8xbf16>, vector<8x128xbf16>, vector<16x128xf32> -> vector<16x128xf32>
    %376 = vector.broadcast %372 : vector<1x128xf32> to vector<16x128xf32>
    %377 = arith.addf %375, %376 : vector<16x128xf32>
    %378 = math.tanh %377 : vector<16x128xf32>
    %379 = arith.truncf %378 : vector<16x128xf32> to vector<16x128xbf16>
    %cst_62 = arith.constant dense<0.000000e+00> : vector<16x8xf32>
    %380 = tpu.matmul %379, %1, %cst_62 {dimension_numbers = #tpu.dot_dimension_numbers<[1], [1], [0], [0], [0, 0, 1, 0], [], []>} : vector<16x128xbf16>, vector<8x128xbf16>, vector<16x8xf32> -> vector<16x8xf32>
    %381 = vector.broadcast %4 : vector<1x8xf32> to vector<16x8xf32>
    %382 = arith.addf %380, %381 : vector<16x8xf32>
    %383 = vector.broadcast %cst_12 : f32 to vector<16x8xf32>
    %384 = arith.mulf %383, %382 : vector<16x8xf32>
    %385 = arith.addf %367, %384 : vector<16x8xf32>
    %386 = arith.truncf %385 : vector<16x8xf32> to vector<16x8xbf16>
    %cst_63 = arith.constant dense<0.000000e+00> : vector<16x128xf32>
    %387 = tpu.matmul %386, %0, %cst_63 {dimension_numbers = #tpu.dot_dimension_numbers<[1], [0], [0], [1], [0, 0, 1, 1], [], []>} : vector<16x8xbf16>, vector<8x128xbf16>, vector<16x128xf32> -> vector<16x128xf32>
    %388 = vector.broadcast %373 : vector<1x128xf32> to vector<16x128xf32>
    %389 = arith.addf %387, %388 : vector<16x128xf32>
    %390 = math.tanh %389 : vector<16x128xf32>
    %391 = arith.truncf %390 : vector<16x128xf32> to vector<16x128xbf16>
    %cst_64 = arith.constant dense<0.000000e+00> : vector<16x8xf32>
    %392 = tpu.matmul %391, %1, %cst_64 {dimension_numbers = #tpu.dot_dimension_numbers<[1], [1], [0], [0], [0, 0, 1, 0], [], []>} : vector<16x128xbf16>, vector<8x128xbf16>, vector<16x8xf32> -> vector<16x8xf32>
    %393 = vector.broadcast %4 : vector<1x8xf32> to vector<16x8xf32>
    %394 = arith.addf %392, %393 : vector<16x8xf32>
    %395 = vector.broadcast %cst_11 : f32 to vector<16x8xf32>
    %396 = arith.mulf %395, %394 : vector<16x8xf32>
    %397 = arith.addf %367, %396 : vector<16x8xf32>
    %c13_i32 = arith.constant 13 : i32
    %398 = arith.sitofp %c13_i32 : i32 to f32
    %399 = arith.mulf %398, %cst_11 : f32
    %400 = vector.broadcast %399 : f32 to vector<1x128xf32>
    %401 = arith.mulf %400, %3 : vector<1x128xf32>
    %402 = arith.addf %2, %401 : vector<1x128xf32>
    %403 = arith.addf %402, %6 : vector<1x128xf32>
    %404 = arith.truncf %397 : vector<16x8xf32> to vector<16x8xbf16>
    %cst_65 = arith.constant dense<0.000000e+00> : vector<16x128xf32>
    %405 = tpu.matmul %404, %0, %cst_65 {dimension_numbers = #tpu.dot_dimension_numbers<[1], [0], [0], [1], [0, 0, 1, 1], [], []>} : vector<16x8xbf16>, vector<8x128xbf16>, vector<16x128xf32> -> vector<16x128xf32>
    %406 = vector.broadcast %402 : vector<1x128xf32> to vector<16x128xf32>
    %407 = arith.addf %405, %406 : vector<16x128xf32>
    %408 = math.tanh %407 : vector<16x128xf32>
    %409 = arith.truncf %408 : vector<16x128xf32> to vector<16x128xbf16>
    %cst_66 = arith.constant dense<0.000000e+00> : vector<16x8xf32>
    %410 = tpu.matmul %409, %1, %cst_66 {dimension_numbers = #tpu.dot_dimension_numbers<[1], [1], [0], [0], [0, 0, 1, 0], [], []>} : vector<16x128xbf16>, vector<8x128xbf16>, vector<16x8xf32> -> vector<16x8xf32>
    %411 = vector.broadcast %4 : vector<1x8xf32> to vector<16x8xf32>
    %412 = arith.addf %410, %411 : vector<16x8xf32>
    %413 = vector.broadcast %cst_12 : f32 to vector<16x8xf32>
    %414 = arith.mulf %413, %412 : vector<16x8xf32>
    %415 = arith.addf %397, %414 : vector<16x8xf32>
    %416 = arith.truncf %415 : vector<16x8xf32> to vector<16x8xbf16>
    %cst_67 = arith.constant dense<0.000000e+00> : vector<16x128xf32>
    %417 = tpu.matmul %416, %0, %cst_67 {dimension_numbers = #tpu.dot_dimension_numbers<[1], [0], [0], [1], [0, 0, 1, 1], [], []>} : vector<16x8xbf16>, vector<8x128xbf16>, vector<16x128xf32> -> vector<16x128xf32>
    %418 = vector.broadcast %403 : vector<1x128xf32> to vector<16x128xf32>
    %419 = arith.addf %417, %418 : vector<16x128xf32>
    %420 = math.tanh %419 : vector<16x128xf32>
    %421 = arith.truncf %420 : vector<16x128xf32> to vector<16x128xbf16>
    %cst_68 = arith.constant dense<0.000000e+00> : vector<16x8xf32>
    %422 = tpu.matmul %421, %1, %cst_68 {dimension_numbers = #tpu.dot_dimension_numbers<[1], [1], [0], [0], [0, 0, 1, 0], [], []>} : vector<16x128xbf16>, vector<8x128xbf16>, vector<16x8xf32> -> vector<16x8xf32>
    %423 = vector.broadcast %4 : vector<1x8xf32> to vector<16x8xf32>
    %424 = arith.addf %422, %423 : vector<16x8xf32>
    %425 = vector.broadcast %cst_11 : f32 to vector<16x8xf32>
    %426 = arith.mulf %425, %424 : vector<16x8xf32>
    %427 = arith.addf %397, %426 : vector<16x8xf32>
    %c14_i32 = arith.constant 14 : i32
    %428 = arith.sitofp %c14_i32 : i32 to f32
    %429 = arith.mulf %428, %cst_11 : f32
    %430 = vector.broadcast %429 : f32 to vector<1x128xf32>
    %431 = arith.mulf %430, %3 : vector<1x128xf32>
    %432 = arith.addf %2, %431 : vector<1x128xf32>
    %433 = arith.addf %432, %6 : vector<1x128xf32>
    %434 = arith.truncf %427 : vector<16x8xf32> to vector<16x8xbf16>
    %cst_69 = arith.constant dense<0.000000e+00> : vector<16x128xf32>
    %435 = tpu.matmul %434, %0, %cst_69 {dimension_numbers = #tpu.dot_dimension_numbers<[1], [0], [0], [1], [0, 0, 1, 1], [], []>} : vector<16x8xbf16>, vector<8x128xbf16>, vector<16x128xf32> -> vector<16x128xf32>
    %436 = vector.broadcast %432 : vector<1x128xf32> to vector<16x128xf32>
    %437 = arith.addf %435, %436 : vector<16x128xf32>
    %438 = math.tanh %437 : vector<16x128xf32>
    %439 = arith.truncf %438 : vector<16x128xf32> to vector<16x128xbf16>
    %cst_70 = arith.constant dense<0.000000e+00> : vector<16x8xf32>
    %440 = tpu.matmul %439, %1, %cst_70 {dimension_numbers = #tpu.dot_dimension_numbers<[1], [1], [0], [0], [0, 0, 1, 0], [], []>} : vector<16x128xbf16>, vector<8x128xbf16>, vector<16x8xf32> -> vector<16x8xf32>
    %441 = vector.broadcast %4 : vector<1x8xf32> to vector<16x8xf32>
    %442 = arith.addf %440, %441 : vector<16x8xf32>
    %443 = vector.broadcast %cst_12 : f32 to vector<16x8xf32>
    %444 = arith.mulf %443, %442 : vector<16x8xf32>
    %445 = arith.addf %427, %444 : vector<16x8xf32>
    %446 = arith.truncf %445 : vector<16x8xf32> to vector<16x8xbf16>
    %cst_71 = arith.constant dense<0.000000e+00> : vector<16x128xf32>
    %447 = tpu.matmul %446, %0, %cst_71 {dimension_numbers = #tpu.dot_dimension_numbers<[1], [0], [0], [1], [0, 0, 1, 1], [], []>} : vector<16x8xbf16>, vector<8x128xbf16>, vector<16x128xf32> -> vector<16x128xf32>
    %448 = vector.broadcast %433 : vector<1x128xf32> to vector<16x128xf32>
    %449 = arith.addf %447, %448 : vector<16x128xf32>
    %450 = math.tanh %449 : vector<16x128xf32>
    %451 = arith.truncf %450 : vector<16x128xf32> to vector<16x128xbf16>
    %cst_72 = arith.constant dense<0.000000e+00> : vector<16x8xf32>
    %452 = tpu.matmul %451, %1, %cst_72 {dimension_numbers = #tpu.dot_dimension_numbers<[1], [1], [0], [0], [0, 0, 1, 0], [], []>} : vector<16x128xbf16>, vector<8x128xbf16>, vector<16x8xf32> -> vector<16x8xf32>
    %453 = vector.broadcast %4 : vector<1x8xf32> to vector<16x8xf32>
    %454 = arith.addf %452, %453 : vector<16x8xf32>
    %455 = vector.broadcast %cst_11 : f32 to vector<16x8xf32>
    %456 = arith.mulf %455, %454 : vector<16x8xf32>
    %457 = arith.addf %427, %456 : vector<16x8xf32>
    %c15_i32 = arith.constant 15 : i32
    %458 = arith.sitofp %c15_i32 : i32 to f32
    %459 = arith.mulf %458, %cst_11 : f32
    %460 = vector.broadcast %459 : f32 to vector<1x128xf32>
    %461 = arith.mulf %460, %3 : vector<1x128xf32>
    %462 = arith.addf %2, %461 : vector<1x128xf32>
    %463 = arith.addf %462, %6 : vector<1x128xf32>
    %464 = arith.truncf %457 : vector<16x8xf32> to vector<16x8xbf16>
    %cst_73 = arith.constant dense<0.000000e+00> : vector<16x128xf32>
    %465 = tpu.matmul %464, %0, %cst_73 {dimension_numbers = #tpu.dot_dimension_numbers<[1], [0], [0], [1], [0, 0, 1, 1], [], []>} : vector<16x8xbf16>, vector<8x128xbf16>, vector<16x128xf32> -> vector<16x128xf32>
    %466 = vector.broadcast %462 : vector<1x128xf32> to vector<16x128xf32>
    %467 = arith.addf %465, %466 : vector<16x128xf32>
    %468 = math.tanh %467 : vector<16x128xf32>
    %469 = arith.truncf %468 : vector<16x128xf32> to vector<16x128xbf16>
    %cst_74 = arith.constant dense<0.000000e+00> : vector<16x8xf32>
    %470 = tpu.matmul %469, %1, %cst_74 {dimension_numbers = #tpu.dot_dimension_numbers<[1], [1], [0], [0], [0, 0, 1, 0], [], []>} : vector<16x128xbf16>, vector<8x128xbf16>, vector<16x8xf32> -> vector<16x8xf32>
    %471 = vector.broadcast %4 : vector<1x8xf32> to vector<16x8xf32>
    %472 = arith.addf %470, %471 : vector<16x8xf32>
    %473 = vector.broadcast %cst_12 : f32 to vector<16x8xf32>
    %474 = arith.mulf %473, %472 : vector<16x8xf32>
    %475 = arith.addf %457, %474 : vector<16x8xf32>
    %476 = arith.truncf %475 : vector<16x8xf32> to vector<16x8xbf16>
    %cst_75 = arith.constant dense<0.000000e+00> : vector<16x128xf32>
    %477 = tpu.matmul %476, %0, %cst_75 {dimension_numbers = #tpu.dot_dimension_numbers<[1], [0], [0], [1], [0, 0, 1, 1], [], []>} : vector<16x8xbf16>, vector<8x128xbf16>, vector<16x128xf32> -> vector<16x128xf32>
    %478 = vector.broadcast %463 : vector<1x128xf32> to vector<16x128xf32>
    %479 = arith.addf %477, %478 : vector<16x128xf32>
    %480 = math.tanh %479 : vector<16x128xf32>
    %481 = arith.truncf %480 : vector<16x128xf32> to vector<16x128xbf16>
    %cst_76 = arith.constant dense<0.000000e+00> : vector<16x8xf32>
    %482 = tpu.matmul %481, %1, %cst_76 {dimension_numbers = #tpu.dot_dimension_numbers<[1], [1], [0], [0], [0, 0, 1, 0], [], []>} : vector<16x128xbf16>, vector<8x128xbf16>, vector<16x8xf32> -> vector<16x8xf32>
    %483 = vector.broadcast %4 : vector<1x8xf32> to vector<16x8xf32>
    %484 = arith.addf %482, %483 : vector<16x8xf32>
    %485 = vector.broadcast %cst_11 : f32 to vector<16x8xf32>
    %486 = arith.mulf %485, %484 : vector<16x8xf32>
    %487 = arith.addf %457, %486 : vector<16x8xf32>
    %c16_i32 = arith.constant 16 : i32
    %488 = arith.sitofp %c16_i32 : i32 to f32
    %489 = arith.mulf %488, %cst_11 : f32
    %490 = vector.broadcast %489 : f32 to vector<1x128xf32>
    %491 = arith.mulf %490, %3 : vector<1x128xf32>
    %492 = arith.addf %2, %491 : vector<1x128xf32>
    %493 = arith.addf %492, %6 : vector<1x128xf32>
    %494 = arith.truncf %487 : vector<16x8xf32> to vector<16x8xbf16>
    %cst_77 = arith.constant dense<0.000000e+00> : vector<16x128xf32>
    %495 = tpu.matmul %494, %0, %cst_77 {dimension_numbers = #tpu.dot_dimension_numbers<[1], [0], [0], [1], [0, 0, 1, 1], [], []>} : vector<16x8xbf16>, vector<8x128xbf16>, vector<16x128xf32> -> vector<16x128xf32>
    %496 = vector.broadcast %492 : vector<1x128xf32> to vector<16x128xf32>
    %497 = arith.addf %495, %496 : vector<16x128xf32>
    %498 = math.tanh %497 : vector<16x128xf32>
    %499 = arith.truncf %498 : vector<16x128xf32> to vector<16x128xbf16>
    %cst_78 = arith.constant dense<0.000000e+00> : vector<16x8xf32>
    %500 = tpu.matmul %499, %1, %cst_78 {dimension_numbers = #tpu.dot_dimension_numbers<[1], [1], [0], [0], [0, 0, 1, 0], [], []>} : vector<16x128xbf16>, vector<8x128xbf16>, vector<16x8xf32> -> vector<16x8xf32>
    %501 = vector.broadcast %4 : vector<1x8xf32> to vector<16x8xf32>
    %502 = arith.addf %500, %501 : vector<16x8xf32>
    %503 = vector.broadcast %cst_12 : f32 to vector<16x8xf32>
    %504 = arith.mulf %503, %502 : vector<16x8xf32>
    %505 = arith.addf %487, %504 : vector<16x8xf32>
    %506 = arith.truncf %505 : vector<16x8xf32> to vector<16x8xbf16>
    %cst_79 = arith.constant dense<0.000000e+00> : vector<16x128xf32>
    %507 = tpu.matmul %506, %0, %cst_79 {dimension_numbers = #tpu.dot_dimension_numbers<[1], [0], [0], [1], [0, 0, 1, 1], [], []>} : vector<16x8xbf16>, vector<8x128xbf16>, vector<16x128xf32> -> vector<16x128xf32>
    %508 = vector.broadcast %493 : vector<1x128xf32> to vector<16x128xf32>
    %509 = arith.addf %507, %508 : vector<16x128xf32>
    %510 = math.tanh %509 : vector<16x128xf32>
    %511 = arith.truncf %510 : vector<16x128xf32> to vector<16x128xbf16>
    %cst_80 = arith.constant dense<0.000000e+00> : vector<16x8xf32>
    %512 = tpu.matmul %511, %1, %cst_80 {dimension_numbers = #tpu.dot_dimension_numbers<[1], [1], [0], [0], [0, 0, 1, 0], [], []>} : vector<16x128xbf16>, vector<8x128xbf16>, vector<16x8xf32> -> vector<16x8xf32>
    %513 = vector.broadcast %4 : vector<1x8xf32> to vector<16x8xf32>
    %514 = arith.addf %512, %513 : vector<16x8xf32>
    %515 = vector.broadcast %cst_11 : f32 to vector<16x8xf32>
    %516 = arith.mulf %515, %514 : vector<16x8xf32>
    %517 = arith.addf %487, %516 : vector<16x8xf32>
    %c17_i32 = arith.constant 17 : i32
    %518 = arith.sitofp %c17_i32 : i32 to f32
    %519 = arith.mulf %518, %cst_11 : f32
    %520 = vector.broadcast %519 : f32 to vector<1x128xf32>
    %521 = arith.mulf %520, %3 : vector<1x128xf32>
    %522 = arith.addf %2, %521 : vector<1x128xf32>
    %523 = arith.addf %522, %6 : vector<1x128xf32>
    %524 = arith.truncf %517 : vector<16x8xf32> to vector<16x8xbf16>
    %cst_81 = arith.constant dense<0.000000e+00> : vector<16x128xf32>
    %525 = tpu.matmul %524, %0, %cst_81 {dimension_numbers = #tpu.dot_dimension_numbers<[1], [0], [0], [1], [0, 0, 1, 1], [], []>} : vector<16x8xbf16>, vector<8x128xbf16>, vector<16x128xf32> -> vector<16x128xf32>
    %526 = vector.broadcast %522 : vector<1x128xf32> to vector<16x128xf32>
    %527 = arith.addf %525, %526 : vector<16x128xf32>
    %528 = math.tanh %527 : vector<16x128xf32>
    %529 = arith.truncf %528 : vector<16x128xf32> to vector<16x128xbf16>
    %cst_82 = arith.constant dense<0.000000e+00> : vector<16x8xf32>
    %530 = tpu.matmul %529, %1, %cst_82 {dimension_numbers = #tpu.dot_dimension_numbers<[1], [1], [0], [0], [0, 0, 1, 0], [], []>} : vector<16x128xbf16>, vector<8x128xbf16>, vector<16x8xf32> -> vector<16x8xf32>
    %531 = vector.broadcast %4 : vector<1x8xf32> to vector<16x8xf32>
    %532 = arith.addf %530, %531 : vector<16x8xf32>
    %533 = vector.broadcast %cst_12 : f32 to vector<16x8xf32>
    %534 = arith.mulf %533, %532 : vector<16x8xf32>
    %535 = arith.addf %517, %534 : vector<16x8xf32>
    %536 = arith.truncf %535 : vector<16x8xf32> to vector<16x8xbf16>
    %cst_83 = arith.constant dense<0.000000e+00> : vector<16x128xf32>
    %537 = tpu.matmul %536, %0, %cst_83 {dimension_numbers = #tpu.dot_dimension_numbers<[1], [0], [0], [1], [0, 0, 1, 1], [], []>} : vector<16x8xbf16>, vector<8x128xbf16>, vector<16x128xf32> -> vector<16x128xf32>
    %538 = vector.broadcast %523 : vector<1x128xf32> to vector<16x128xf32>
    %539 = arith.addf %537, %538 : vector<16x128xf32>
    %540 = math.tanh %539 : vector<16x128xf32>
    %541 = arith.truncf %540 : vector<16x128xf32> to vector<16x128xbf16>
    %cst_84 = arith.constant dense<0.000000e+00> : vector<16x8xf32>
    %542 = tpu.matmul %541, %1, %cst_84 {dimension_numbers = #tpu.dot_dimension_numbers<[1], [1], [0], [0], [0, 0, 1, 0], [], []>} : vector<16x128xbf16>, vector<8x128xbf16>, vector<16x8xf32> -> vector<16x8xf32>
    %543 = vector.broadcast %4 : vector<1x8xf32> to vector<16x8xf32>
    %544 = arith.addf %542, %543 : vector<16x8xf32>
    %545 = vector.broadcast %cst_11 : f32 to vector<16x8xf32>
    %546 = arith.mulf %545, %544 : vector<16x8xf32>
    %547 = arith.addf %517, %546 : vector<16x8xf32>
    %c18_i32 = arith.constant 18 : i32
    %548 = arith.sitofp %c18_i32 : i32 to f32
    %549 = arith.mulf %548, %cst_11 : f32
    %550 = vector.broadcast %549 : f32 to vector<1x128xf32>
    %551 = arith.mulf %550, %3 : vector<1x128xf32>
    %552 = arith.addf %2, %551 : vector<1x128xf32>
    %553 = arith.addf %552, %6 : vector<1x128xf32>
    %554 = arith.truncf %547 : vector<16x8xf32> to vector<16x8xbf16>
    %cst_85 = arith.constant dense<0.000000e+00> : vector<16x128xf32>
    %555 = tpu.matmul %554, %0, %cst_85 {dimension_numbers = #tpu.dot_dimension_numbers<[1], [0], [0], [1], [0, 0, 1, 1], [], []>} : vector<16x8xbf16>, vector<8x128xbf16>, vector<16x128xf32> -> vector<16x128xf32>
    %556 = vector.broadcast %552 : vector<1x128xf32> to vector<16x128xf32>
    %557 = arith.addf %555, %556 : vector<16x128xf32>
    %558 = math.tanh %557 : vector<16x128xf32>
    %559 = arith.truncf %558 : vector<16x128xf32> to vector<16x128xbf16>
    %cst_86 = arith.constant dense<0.000000e+00> : vector<16x8xf32>
    %560 = tpu.matmul %559, %1, %cst_86 {dimension_numbers = #tpu.dot_dimension_numbers<[1], [1], [0], [0], [0, 0, 1, 0], [], []>} : vector<16x128xbf16>, vector<8x128xbf16>, vector<16x8xf32> -> vector<16x8xf32>
    %561 = vector.broadcast %4 : vector<1x8xf32> to vector<16x8xf32>
    %562 = arith.addf %560, %561 : vector<16x8xf32>
    %563 = vector.broadcast %cst_12 : f32 to vector<16x8xf32>
    %564 = arith.mulf %563, %562 : vector<16x8xf32>
    %565 = arith.addf %547, %564 : vector<16x8xf32>
    %566 = arith.truncf %565 : vector<16x8xf32> to vector<16x8xbf16>
    %cst_87 = arith.constant dense<0.000000e+00> : vector<16x128xf32>
    %567 = tpu.matmul %566, %0, %cst_87 {dimension_numbers = #tpu.dot_dimension_numbers<[1], [0], [0], [1], [0, 0, 1, 1], [], []>} : vector<16x8xbf16>, vector<8x128xbf16>, vector<16x128xf32> -> vector<16x128xf32>
    %568 = vector.broadcast %553 : vector<1x128xf32> to vector<16x128xf32>
    %569 = arith.addf %567, %568 : vector<16x128xf32>
    %570 = math.tanh %569 : vector<16x128xf32>
    %571 = arith.truncf %570 : vector<16x128xf32> to vector<16x128xbf16>
    %cst_88 = arith.constant dense<0.000000e+00> : vector<16x8xf32>
    %572 = tpu.matmul %571, %1, %cst_88 {dimension_numbers = #tpu.dot_dimension_numbers<[1], [1], [0], [0], [0, 0, 1, 0], [], []>} : vector<16x128xbf16>, vector<8x128xbf16>, vector<16x8xf32> -> vector<16x8xf32>
    %573 = vector.broadcast %4 : vector<1x8xf32> to vector<16x8xf32>
    %574 = arith.addf %572, %573 : vector<16x8xf32>
    %575 = vector.broadcast %cst_11 : f32 to vector<16x8xf32>
    %576 = arith.mulf %575, %574 : vector<16x8xf32>
    %577 = arith.addf %547, %576 : vector<16x8xf32>
    %c19_i32 = arith.constant 19 : i32
    %578 = arith.sitofp %c19_i32 : i32 to f32
    %579 = arith.mulf %578, %cst_11 : f32
    %580 = vector.broadcast %579 : f32 to vector<1x128xf32>
    %581 = arith.mulf %580, %3 : vector<1x128xf32>
    %582 = arith.addf %2, %581 : vector<1x128xf32>
    %583 = arith.addf %582, %6 : vector<1x128xf32>
    %584 = arith.truncf %577 : vector<16x8xf32> to vector<16x8xbf16>
    %cst_89 = arith.constant dense<0.000000e+00> : vector<16x128xf32>
    %585 = tpu.matmul %584, %0, %cst_89 {dimension_numbers = #tpu.dot_dimension_numbers<[1], [0], [0], [1], [0, 0, 1, 1], [], []>} : vector<16x8xbf16>, vector<8x128xbf16>, vector<16x128xf32> -> vector<16x128xf32>
    %586 = vector.broadcast %582 : vector<1x128xf32> to vector<16x128xf32>
    %587 = arith.addf %585, %586 : vector<16x128xf32>
    %588 = math.tanh %587 : vector<16x128xf32>
    %589 = arith.truncf %588 : vector<16x128xf32> to vector<16x128xbf16>
    %cst_90 = arith.constant dense<0.000000e+00> : vector<16x8xf32>
    %590 = tpu.matmul %589, %1, %cst_90 {dimension_numbers = #tpu.dot_dimension_numbers<[1], [1], [0], [0], [0, 0, 1, 0], [], []>} : vector<16x128xbf16>, vector<8x128xbf16>, vector<16x8xf32> -> vector<16x8xf32>
    %591 = vector.broadcast %4 : vector<1x8xf32> to vector<16x8xf32>
    %592 = arith.addf %590, %591 : vector<16x8xf32>
    %593 = vector.broadcast %cst_12 : f32 to vector<16x8xf32>
    %594 = arith.mulf %593, %592 : vector<16x8xf32>
    %595 = arith.addf %577, %594 : vector<16x8xf32>
    %596 = arith.truncf %595 : vector<16x8xf32> to vector<16x8xbf16>
    %cst_91 = arith.constant dense<0.000000e+00> : vector<16x128xf32>
    %597 = tpu.matmul %596, %0, %cst_91 {dimension_numbers = #tpu.dot_dimension_numbers<[1], [0], [0], [1], [0, 0, 1, 1], [], []>} : vector<16x8xbf16>, vector<8x128xbf16>, vector<16x128xf32> -> vector<16x128xf32>
    %598 = vector.broadcast %583 : vector<1x128xf32> to vector<16x128xf32>
    %599 = arith.addf %597, %598 : vector<16x128xf32>
    %600 = math.tanh %599 : vector<16x128xf32>
    %601 = arith.truncf %600 : vector<16x128xf32> to vector<16x128xbf16>
    %cst_92 = arith.constant dense<0.000000e+00> : vector<16x8xf32>
    %602 = tpu.matmul %601, %1, %cst_92 {dimension_numbers = #tpu.dot_dimension_numbers<[1], [1], [0], [0], [0, 0, 1, 0], [], []>} : vector<16x128xbf16>, vector<8x128xbf16>, vector<16x8xf32> -> vector<16x8xf32>
    %603 = vector.broadcast %4 : vector<1x8xf32> to vector<16x8xf32>
    %604 = arith.addf %602, %603 : vector<16x8xf32>
    %605 = vector.broadcast %cst_11 : f32 to vector<16x8xf32>
    %606 = arith.mulf %605, %604 : vector<16x8xf32>
    %607 = arith.addf %577, %606 : vector<16x8xf32>
    %c20_i32 = arith.constant 20 : i32
    %c0_93 = arith.constant 0 : index
    %c0_94 = arith.constant 0 : index
    %608 = vector.load %arg6[%c0_93, %c0_94] : memref<16x8xf32, #tpu.memory_space<vmem>>, vector<16x8xf32>
    tpu.vector_store %arg6[%c0_93, %c0_94], %607 {strides = array<i32>} : memref<16x8xf32, #tpu.memory_space<vmem>>, vector<16x8xf32>,
    return
  }
}

</mosaic_0001>

<bundles_post_ra>
// kernel: flow_matching_forward.1
= control target key start
LH: loop header
LB: loop body
LE: loop exit
PB: predicated region body
PF: predicated region fallthrough
CT: control target
= control target key end

     0   :  { %vm46_vm0 = vcmask 1043456   ;;  %v4920_v0 = vmov 0.0   ;;  %vm4921_vm1 = vmmov 0   ;;  %vm42_vm2 = vcmask 64512   ;;  %s5771_s1 = inlined_call_operand.vmem [shape: bf16[8,128], index: 1, kind: input, shape index: {}]   ;;  %s5772_s0 = inlined_call_operand.vmem [shape: f32[16,8], index: 0, kind: input, shape index: {}]   ;;  %s5773_s4 = inlined_call_operand.vmem [shape: bf16[8,128], index: 4, kind: input, shape index: {}]   ;;  %s5774_s3 = inlined_call_operand.vmem [shape: f32[1,128], index: 3, kind: input, shape index: {}]   ;;  %s5775_s2 = inlined_call_operand.vmem [shape: f32[1,128], index: 2, kind: input, shape index: {}]   ;;  %s5776_s5 = inlined_call_operand.vmem [shape: f32[1,8], index: 5, kind: input, shape index: {}]   ;;  %s5777_s6 = inlined_call_operand.vmem [shape: f32[16,8], index: 6, kind: output, shape index: {}]  }
   0x1   :  { %4270 = vmatprep.subr.bf16.mxu0 %v4920_v0  ;;  %v24_v1 = vld [vmem:[%s5771_s1] sm:$0xf]  ;;  %4272 = vmatprep.mubr.msk.bf16.mxu0 %vm4921_vm1, %v4920_v0  ;;  %v4971_v3 = vld [vmem:[%s5772_s0 + $0x8] sm:$0xff]  ;;  %v37_v7 = vlaneseq }
   0x2   :  { %v4966_v2 = vld [vmem:[%s5772_s0] sm:$0xff]  ;;  %v4973_v4 = vsel %vm46_vm0, %v24_v1, 0  ;;  %4276 = vmatprep.subr.bf16.mxu1 %v4920_v0  ;;  %4278 = vmatprep.mubr.msk.bf16.mxu1 %vm4921_vm1, %v4920_v0 }
   0x3   :  { %v35_v5 = vpack.c.bf16 %v4971_v3, %v4966_v2  ;;  %4271 = vmatpush3.bf16.msra.mxu0 %v4973_v4  ;;  %v4990_v6 = vld [vmem:[%s5773_s4] sm:$0xf]  ;;  %v38_v10 = vshrl.u32 %v37_v7, 7 }
   0x4   :  { %4282 = vmatprep.subr.bf16.mxu0 %v4920_v0  ;;  %4277 = vmatpush3.bf16.xpose.msra.mxu1 %v4990_v6  ;;  %v4997_v8 = vld [vmem:[%s5774_s3] sm:$0x1] }
   0x5   :  { %4288 = vmatprep.subr.bf16.mxu1 %v4920_v0  ;;  %v32_v9 = vmul.f32 0.0, %v4997_v8  ;;  %v5003_v11 = vld [vmem:[%s5775_s2] sm:$0x1]  ;;  %v5006_v13 = vsub.s32 0, %v38_v10  ;;  %v5028_v36 = vmul.f32 0.025, %v4997_v8 }
   0x6   :  { %4273 = vmatmul.mubr.msk.bf16.vlgmr.msra.gmra.mrb[0].mxu0 %vm42_vm2, %v35_v5  ;;  %v5016_v24 = vld [vmem:[%s5776_s5] ss:$0 sm:$0xff]  ;;  %v244_v59 = vmul.f32 0.05, %v4997_v8 }
   0x7   :  { %4283 = vmatpush3.bf16.msra.mxu0 %v4973_v4  ;;  %4284 = vmatprep.mubr.msk.bf16.mxu0 %vm4921_vm1, %v4920_v0  ;;  %v33_v12 = vadd.f32 %v32_v9, %v5003_v11 }
   0x8   :  { %4294 = vmatprep.subr.bf16.mxu0 %v4920_v0  ;;  %v245_v60 = vadd.f32 %v244_v59, %v5003_v11 }
   0x9   :  { %v40_v14 = vrot.slane %v33_v12, %v5006_v13  ;;  %v34_v37 = vadd.f32 %v33_v12, %v5028_v36 }
   0xa   :  { %v252_v61 = vrot.slane %v245_v60, %v5006_v13 }
   0xb   :  { %v150_v38 = vrot.slane %v34_v37, %v5006_v13 }
  0xd9   :  { %v84_v15 = vpop.f32.mrb[0].mxu0 }
  0xda   :  { %v85_v16 = vadd.f32 %v84_v15, %v40_v14  ;;  %v4274_v17 = vpop.f32.mrb[1].mxu0 }
  0xdb   :  { %v87_v18 = vpop.f32.mrb[2].mxu0 }
  0xdc   :  { %v88_v19 = vadd.f32 %v87_v18, %v40_v14  ;;  %v4275_v20 = vpop.f32.mrb[3].mxu0  ;;  %4752 = vtanh.f32 %v85_v16 }
  0xde   :  { %4754 = vtanh.f32 %v88_v19 }
  0xe6   :  { %v4753_v21 = vpop.eup %4752 }
  0xe8   :  { %v4755_v22 = vpop.eup %4754 }
  0xe9   :  { %v93_v23 = vpack.c.bf16 %v4755_v22, %v4753_v21 }
  0xeb   :  { %4279 = vmatmul.mubr.bf16.vlgmr.msra.gmra.mrb[0].mxu1 %v93_v23 }
  0xec   :  { %4289 = vmatpush3.bf16.xpose.msra.mxu1 %v4990_v6  ;;  %4290 = vmatprep.mubr.msk.bf16.mxu1 %vm4921_vm1, %v4920_v0 }
  0xed   :  { %4300 = vmatprep.subr.bf16.mxu1 %v4920_v0 }
 0x1be   :  { %v134_v25 = vpop.f32.mrb[0].mxu1 }
 0x1bf   :  { %v135_v26 = vadd.f32 %v5016_v24, %v134_v25  ;;  %v4280_v27 = vpop.f32.mrb[1].mxu1  ;;  %v246_v25 = vadd.f32 %v245_v60, %v5028_v36 }
 0x1c0   :  { %v137_v28 = vpop.f32.mrb[2].mxu1 }
 0x1c1   :  { %v141_v29 = vmul.f32 0.025, %v135_v26  ;;  %v138_v30 = vadd.f32 %v5016_v24, %v137_v28  ;;  %v4281_v31 = vpop.f32.mrb[3].mxu1  ;;  %v351_v26 = vrot.slane %v246_v25, %v5006_v13 }
 0x1c3   :  { %v142_v32 = vmul.f32 0.025, %v138_v30  ;;  %v143_v33 = vadd.f32 %v141_v29, %v4966_v2 }
 0x1c5   :  { %v144_v34 = vadd.f32 %v142_v32, %v4971_v3 }
 0x1c7   :  { %v145_v35 = vpack.c.bf16 %v144_v34, %v143_v33 }
 0x1c9   :  { %4285 = vmatmul.mubr.msk.bf16.vlgmr.msra.gmra.mrb[4].mxu0 %vm42_vm2, %v145_v35 }
 0x1ca   :  { %4295 = vmatpush3.bf16.msra.mxu0 %v4973_v4  ;;  %4296 = vmatprep.mubr.msk.bf16.mxu0 %vm4921_vm1, %v4920_v0 }
 0x1cb   :  { %4306 = vmatprep.subr.bf16.mxu0 %v4920_v0 }
 0x29c   :  { %v189_v39 = vpop.f32.mrb[4].mxu0 }
 0x29d   :  { %v190_v40 = vadd.f32 %v189_v39, %v150_v38  ;;  %v4286_v41 = vpop.f32.mrb[5].mxu0 }
 0x29e   :  { %v192_v42 = vpop.f32.mrb[6].mxu0 }
 0x29f   :  { %v193_v43 = vadd.f32 %v192_v42, %v150_v38  ;;  %v4287_v44 = vpop.f32.mrb[7].mxu0  ;;  %4756 = vtanh.f32 %v190_v40 }
 0x2a1   :  { %4758 = vtanh.f32 %v193_v43 }
 0x2a9   :  { %v4757_v45 = vpop.eup %4756 }
 0x2ab   :  { %v4759_v46 = vpop.eup %4758 }
 0x2ac   :  { %v198_v47 = vpack.c.bf16 %v4759_v46, %v4757_v45 }
 0x2ae   :  { %4291 = vmatmul.mubr.bf16.vlgmr.msra.gmra.mrb[4].mxu1 %v198_v47 }
 0x2af   :  { %4301 = vmatpush3.bf16.xpose.msra.mxu1 %v4990_v6  ;;  %4302 = vmatprep.mubr.msk.bf16.mxu1 %vm4921_vm1, %v4920_v0 }
 0x2b0   :  { %4312 = vmatprep.subr.bf16.mxu1 %v4920_v0 }
 0x381   :  { %v233_v48 = vpop.f32.mrb[4].mxu1 }
 0x382   :  { %v234_v49 = vadd.f32 %v5016_v24, %v233_v48  ;;  %v4292_v50 = vpop.f32.mrb[5].mxu1  ;;  %v445_v48 = vmul.f32 0.1, %v4997_v8 }
 0x383   :  { %v236_v51 = vpop.f32.mrb[6].mxu1 }
 0x384   :  { %v240_v52 = vmul.f32 0.05, %v234_v49  ;;  %v237_v53 = vadd.f32 %v5016_v24, %v236_v51  ;;  %v4293_v54 = vpop.f32.mrb[7].mxu1  ;;  %v446_v49 = vadd.f32 %v445_v48, %v5003_v11 }
 0x386   :  { %v241_v55 = vmul.f32 0.05, %v237_v53  ;;  %v5039_v56 = vadd.f32 %v240_v52, %v4966_v2  ;;  %v453_v50 = vrot.slane %v446_v49, %v5006_v13 }
 0x388   :  { %v5042_v57 = vadd.f32 %v241_v55, %v4971_v3 }
 0x38a   :  { %v247_v58 = vpack.c.bf16 %v5042_v57, %v5039_v56 }
 0x38c   :  { %4297 = vmatmul.mubr.msk.bf16.vlgmr.msra.gmra.mrb[8].mxu0 %vm42_vm2, %v247_v58 }
 0x38d   :  { %4307 = vmatpush3.bf16.msra.mxu0 %v4973_v4  ;;  %4308 = vmatprep.mubr.msk.bf16.mxu0 %vm4921_vm1, %v4920_v0 }
 0x38e   :  { %4318 = vmatprep.subr.bf16.mxu0 %v4920_v0 }
 0x45f   :  { %v291_v62 = vpop.f32.mrb[8].mxu0 }
 0x460   :  { %v292_v63 = vadd.f32 %v291_v62, %v252_v61  ;;  %v4298_v1 = vpop.f32.mrb[9].mxu0 }
 0x461   :  { %v294_v2 = vpop.f32.mrb[10].mxu0 }
 0x462   :  { %v295_v3 = vadd.f32 %v294_v2, %v252_v61  ;;  %v4299_v5 = vpop.f32.mrb[11].mxu0  ;;  %4760 = vtanh.f32 %v292_v63 }
 0x464   :  { %4762 = vtanh.f32 %v295_v3 }
 0x46c   :  { %v4761_v7 = vpop.eup %4760 }
 0x46e   :  { %v4763_v9 = vpop.eup %4762 }
 0x46f   :  { %v300_v10 = vpack.c.bf16 %v4763_v9, %v4761_v7 }
 0x471   :  { %4303 = vmatmul.mubr.bf16.vlgmr.msra.gmra.mrb[8].mxu1 %v300_v10 }
 0x472   :  { %4313 = vmatpush3.bf16.xpose.msra.mxu1 %v4990_v6  ;;  %4314 = vmatprep.mubr.msk.bf16.mxu1 %vm4921_vm1, %v4920_v0 }
 0x473   :  { %4324 = vmatprep.subr.bf16.mxu1 %v4920_v0 }
 0x544   :  { %v335_v12 = vpop.f32.mrb[8].mxu1 }
 0x545   :  { %v336_v14 = vadd.f32 %v5016_v24, %v335_v12  ;;  %v4304_v15 = vpop.f32.mrb[9].mxu1  ;;  %v447_v12 = vadd.f32 %v446_v49, %v5028_v36 }
 0x546   :  { %v338_v16 = vpop.f32.mrb[10].mxu1 }
 0x547   :  { %v342_v17 = vmul.f32 0.025, %v336_v14  ;;  %v339_v18 = vadd.f32 %v5016_v24, %v338_v16  ;;  %v4305_v19 = vpop.f32.mrb[11].mxu1  ;;  %v552_v14 = vrot.slane %v447_v12, %v5006_v13 }
 0x549   :  { %v343_v20 = vmul.f32 0.025, %v339_v18  ;;  %v344_v21 = vadd.f32 %v342_v17, %v5039_v56 }
 0x54b   :  { %v345_v22 = vadd.f32 %v343_v20, %v5042_v57 }
 0x54d   :  { %v346_v23 = vpack.c.bf16 %v345_v22, %v344_v21 }
 0x54f   :  { %4309 = vmatmul.mubr.msk.bf16.vlgmr.msra.gmra.mrb[12].mxu0 %vm42_vm2, %v346_v23 }
 0x550   :  { %4319 = vmatpush3.bf16.msra.mxu0 %v4973_v4  ;;  %4320 = vmatprep.mubr.msk.bf16.mxu0 %vm4921_vm1, %v4920_v0 }
 0x551   :  { %4330 = vmatprep.subr.bf16.mxu0 %v4920_v0 }
 0x622   :  { %v390_v27 = vpop.f32.mrb[12].mxu0 }
 0x623   :  { %v391_v28 = vadd.f32 %v390_v27, %v351_v26  ;;  %v4310_v29 = vpop.f32.mrb[13].mxu0 }
 0x624   :  { %v393_v30 = vpop.f32.mrb[14].mxu0 }
 0x625   :  { %v394_v31 = vadd.f32 %v393_v30, %v351_v26  ;;  %v4311_v32 = vpop.f32.mrb[15].mxu0  ;;  %4764 = vtanh.f32 %v391_v28 }
 0x627   :  { %4766 = vtanh.f32 %v394_v31 }
 0x62f   :  { %v4765_v33 = vpop.eup %4764 }
 0x631   :  { %v4767_v34 = vpop.eup %4766 }
 0x632   :  { %v399_v35 = vpack.c.bf16 %v4767_v34, %v4765_v33 }
 0x634   :  { %4315 = vmatmul.mubr.bf16.vlgmr.msra.gmra.mrb[12].mxu1 %v399_v35 }
 0x635   :  { %4325 = vmatpush3.bf16.xpose.msra.mxu1 %v4990_v6  ;;  %4326 = vmatprep.mubr.msk.bf16.mxu1 %vm4921_vm1, %v4920_v0 }
 0x636   :  { %4336 = vmatprep.subr.bf16.mxu1 %v4920_v0 }
 0x707   :  { %v434_v37 = vpop.f32.mrb[12].mxu1 }
 0x708   :  { %v435_v38 = vadd.f32 %v5016_v24, %v434_v37  ;;  %v4316_v39 = vpop.f32.mrb[13].mxu1  ;;  %v646_v37 = vmul.f32 0.15, %v4997_v8 }
 0x709   :  { %v437_v40 = vpop.f32.mrb[14].mxu1 }
 0x70a   :  { %v441_v41 = vmul.f32 0.05, %v435_v38  ;;  %v438_v42 = vadd.f32 %v5016_v24, %v437_v40  ;;  %v4317_v43 = vpop.f32.mrb[15].mxu1  ;;  %v647_v38 = vadd.f32 %v646_v37, %v5003_v11 }
 0x70c   :  { %v442_v44 = vmul.f32 0.05, %v438_v42  ;;  %v5076_v45 = vadd.f32 %v441_v41, %v5039_v56  ;;  %v654_v39 = vrot.slane %v647_v38, %v5006_v13 }
 0x70e   :  { %v5079_v46 = vadd.f32 %v442_v44, %v5042_v57 }
 0x710   :  { %v448_v47 = vpack.c.bf16 %v5079_v46, %v5076_v45 }
 0x712   :  { %4321 = vmatmul.mubr.msk.bf16.vlgmr.msra.gmra.mrb[16].mxu0 %vm42_vm2, %v448_v47 }
 0x713   :  { %4331 = vmatpush3.bf16.msra.mxu0 %v4973_v4  ;;  %4332 = vmatprep.mubr.msk.bf16.mxu0 %vm4921_vm1, %v4920_v0 }
 0x714   :  { %4342 = vmatprep.subr.bf16.mxu0 %v4920_v0 }
 0x7e5   :  { %v492_v51 = vpop.f32.mrb[16].mxu0 }
 0x7e6   :  { %v493_v52 = vadd.f32 %v492_v51, %v453_v50  ;;  %v4322_v53 = vpop.f32.mrb[17].mxu0 }
 0x7e7   :  { %v495_v54 = vpop.f32.mrb[18].mxu0 }
 0x7e8   :  { %v496_v55 = vadd.f32 %v495_v54, %v453_v50  ;;  %v4323_v56 = vpop.f32.mrb[19].mxu0  ;;  %4768 = vtanh.f32 %v493_v52 }
 0x7ea   :  { %4770 = vtanh.f32 %v496_v55 }
 0x7f2   :  { %v4769_v57 = vpop.eup %4768 }
 0x7f4   :  { %v4771_v58 = vpop.eup %4770 }
 0x7f5   :  { %v501_v59 = vpack.c.bf16 %v4771_v58, %v4769_v57 }
 0x7f7   :  { %4327 = vmatmul.mubr.bf16.vlgmr.msra.gmra.mrb[16].mxu1 %v501_v59 }
 0x7f8   :  { %4337 = vmatpush3.bf16.xpose.msra.mxu1 %v4990_v6  ;;  %4338 = vmatprep.mubr.msk.bf16.mxu1 %vm4921_vm1, %v4920_v0 }
 0x7f9   :  { %4348 = vmatprep.subr.bf16.mxu1 %v4920_v0 }
 0x8ca   :  { %v536_v60 = vpop.f32.mrb[16].mxu1 }
 0x8cb   :  { %v537_v61 = vadd.f32 %v5016_v24, %v536_v60  ;;  %v4328_v62 = vpop.f32.mrb[17].mxu1  ;;  %v648_v60 = vadd.f32 %v647_v38, %v5028_v36 }
 0x8cc   :  { %v539_v63 = vpop.f32.mrb[18].mxu1 }
 0x8cd   :  { %v543_v1 = vmul.f32 0.025, %v537_v61  ;;  %v540_v2 = vadd.f32 %v5016_v24, %v539_v63  ;;  %v4329_v3 = vpop.f32.mrb[19].mxu1  ;;  %v753_v61 = vrot.slane %v648_v60, %v5006_v13 }
 0x8cf   :  { %v544_v5 = vmul.f32 0.025, %v540_v2  ;;  %v545_v7 = vadd.f32 %v543_v1, %v5076_v45 }
 0x8d1   :  { %v546_v9 = vadd.f32 %v544_v5, %v5079_v46 }
 0x8d3   :  { %v547_v10 = vpack.c.bf16 %v546_v9, %v545_v7 }
 0x8d5   :  { %4333 = vmatmul.mubr.msk.bf16.vlgmr.msra.gmra.mrb[20].mxu0 %vm42_vm2, %v547_v10 }
 0x8d6   :  { %4343 = vmatpush3.bf16.msra.mxu0 %v4973_v4  ;;  %4344 = vmatprep.mubr.msk.bf16.mxu0 %vm4921_vm1, %v4920_v0 }
 0x8d7   :  { %4354 = vmatprep.subr.bf16.mxu0 %v4920_v0 }
 0x9a8   :  { %v591_v15 = vpop.f32.mrb[20].mxu0 }
 0x9a9   :  { %v592_v16 = vadd.f32 %v591_v15, %v552_v14  ;;  %v4334_v17 = vpop.f32.mrb[21].mxu0 }
 0x9aa   :  { %v594_v18 = vpop.f32.mrb[22].mxu0 }
 0x9ab   :  { %v595_v19 = vadd.f32 %v594_v18, %v552_v14  ;;  %v4335_v20 = vpop.f32.mrb[23].mxu0  ;;  %4772 = vtanh.f32 %v592_v16 }
 0x9ad   :  { %4774 = vtanh.f32 %v595_v19 }
 0x9b5   :  { %v4773_v21 = vpop.eup %4772 }
 0x9b7   :  { %v4775_v22 = vpop.eup %4774 }
 0x9b8   :  { %v600_v23 = vpack.c.bf16 %v4775_v22, %v4773_v21 }
 0x9ba   :  { %4339 = vmatmul.mubr.bf16.vlgmr.msra.gmra.mrb[20].mxu1 %v600_v23 }
 0x9bb   :  { %4349 = vmatpush3.bf16.xpose.msra.mxu1 %v4990_v6  ;;  %4350 = vmatprep.mubr.msk.bf16.mxu1 %vm4921_vm1, %v4920_v0 }
 0x9bc   :  { %4360 = vmatprep.subr.bf16.mxu1 %v4920_v0 }
 0xa8d   :  { %v635_v25 = vpop.f32.mrb[20].mxu1 }
 0xa8e   :  { %v636_v26 = vadd.f32 %v5016_v24, %v635_v25  ;;  %v4340_v27 = vpop.f32.mrb[21].mxu1  ;;  %v847_v25 = vmul.f32 0.2, %v4997_v8 }
 0xa8f   :  { %v638_v28 = vpop.f32.mrb[22].mxu1 }
 0xa90   :  { %v642_v29 = vmul.f32 0.05, %v636_v26  ;;  %v639_v30 = vadd.f32 %v5016_v24, %v638_v28  ;;  %v4341_v31 = vpop.f32.mrb[23].mxu1  ;;  %v848_v26 = vadd.f32 %v847_v25, %v5003_v11 }
 0xa92   :  { %v643_v32 = vmul.f32 0.05, %v639_v30  ;;  %v5113_v33 = vadd.f32 %v642_v29, %v5076_v45  ;;  %v855_v27 = vrot.slane %v848_v26, %v5006_v13 }
 0xa94   :  { %v5116_v34 = vadd.f32 %v643_v32, %v5079_v46 }
 0xa96   :  { %v649_v35 = vpack.c.bf16 %v5116_v34, %v5113_v33 }
 0xa98   :  { %4345 = vmatmul.mubr.msk.bf16.vlgmr.msra.gmra.mrb[24].mxu0 %vm42_vm2, %v649_v35 }
 0xa99   :  { %4355 = vmatpush3.bf16.msra.mxu0 %v4973_v4  ;;  %4356 = vmatprep.mubr.msk.bf16.mxu0 %vm4921_vm1, %v4920_v0 }
 0xa9a   :  { %4366 = vmatprep.subr.bf16.mxu0 %v4920_v0 }
 0xb6b   :  { %v693_v40 = vpop.f32.mrb[24].mxu0 }
 0xb6c   :  { %v694_v41 = vadd.f32 %v693_v40, %v654_v39  ;;  %v4346_v42 = vpop.f32.mrb[25].mxu0 }
 0xb6d   :  { %v696_v43 = vpop.f32.mrb[26].mxu0 }
 0xb6e   :  { %v697_v44 = vadd.f32 %v696_v43, %v654_v39  ;;  %v4347_v45 = vpop.f32.mrb[27].mxu0  ;;  %4776 = vtanh.f32 %v694_v41 }
 0xb70   :  { %4778 = vtanh.f32 %v697_v44 }
 0xb78   :  { %v4777_v46 = vpop.eup %4776 }
 0xb7a   :  { %v4779_v47 = vpop.eup %4778 }
 0xb7b   :  { %v702_v48 = vpack.c.bf16 %v4779_v47, %v4777_v46 }
 0xb7d   :  { %4351 = vmatmul.mubr.bf16.vlgmr.msra.gmra.mrb[24].mxu1 %v702_v48 }
 0xb7e   :  { %4361 = vmatpush3.bf16.xpose.msra.mxu1 %v4990_v6  ;;  %4362 = vmatprep.mubr.msk.bf16.mxu1 %vm4921_vm1, %v4920_v0 }
 0xb7f   :  { %4372 = vmatprep.subr.bf16.mxu1 %v4920_v0 }
 0xc50   :  { %v737_v49 = vpop.f32.mrb[24].mxu1 }
 0xc51   :  { %v738_v50 = vadd.f32 %v5016_v24, %v737_v49  ;;  %v4352_v51 = vpop.f32.mrb[25].mxu1  ;;  %v849_v49 = vadd.f32 %v848_v26, %v5028_v36 }
 0xc52   :  { %v740_v52 = vpop.f32.mrb[26].mxu1 }
 0xc53   :  { %v744_v53 = vmul.f32 0.025, %v738_v50  ;;  %v741_v54 = vadd.f32 %v5016_v24, %v740_v52  ;;  %v4353_v55 = vpop.f32.mrb[27].mxu1  ;;  %v954_v50 = vrot.slane %v849_v49, %v5006_v13 }
 0xc55   :  { %v745_v56 = vmul.f32 0.025, %v741_v54  ;;  %v746_v57 = vadd.f32 %v744_v53, %v5113_v33 }
 0xc57   :  { %v747_v58 = vadd.f32 %v745_v56, %v5116_v34 }
 0xc59   :  { %v748_v59 = vpack.c.bf16 %v747_v58, %v746_v57 }
 0xc5b   :  { %4357 = vmatmul.mubr.msk.bf16.vlgmr.msra.gmra.mrb[28].mxu0 %vm42_vm2, %v748_v59 }
 0xc5c   :  { %4367 = vmatpush3.bf16.msra.mxu0 %v4973_v4  ;;  %4368 = vmatprep.mubr.msk.bf16.mxu0 %vm4921_vm1, %v4920_v0 }
 0xc5d   :  { %4378 = vmatprep.subr.bf16.mxu0 %v4920_v0 }
 0xd2e   :  { %v792_v62 = vpop.f32.mrb[28].mxu0 }
 0xd2f   :  { %v793_v63 = vadd.f32 %v792_v62, %v753_v61  ;;  %v4358_v1 = vpop.f32.mrb[29].mxu0 }
 0xd30   :  { %v795_v2 = vpop.f32.mrb[30].mxu0 }
 0xd31   :  { %v796_v3 = vadd.f32 %v795_v2, %v753_v61  ;;  %v4359_v5 = vpop.f32.mrb[31].mxu0  ;;  %4780 = vtanh.f32 %v793_v63 }
 0xd33   :  { %4782 = vtanh.f32 %v796_v3 }
 0xd3b   :  { %v4781_v7 = vpop.eup %4780 }
 0xd3d   :  { %v4783_v9 = vpop.eup %4782 }
 0xd3e   :  { %v801_v10 = vpack.c.bf16 %v4783_v9, %v4781_v7 }
 0xd40   :  { %4363 = vmatmul.mubr.bf16.vlgmr.msra.gmra.mrb[28].mxu1 %v801_v10 }
 0xd41   :  { %4373 = vmatpush3.bf16.xpose.msra.mxu1 %v4990_v6  ;;  %4374 = vmatprep.mubr.msk.bf16.mxu1 %vm4921_vm1, %v4920_v0 }
 0xd42   :  { %4384 = vmatprep.subr.bf16.mxu1 %v4920_v0 }
 0xe13   :  { %v836_v12 = vpop.f32.mrb[28].mxu1 }
 0xe14   :  { %v837_v14 = vadd.f32 %v5016_v24, %v836_v12  ;;  %v4364_v15 = vpop.f32.mrb[29].mxu1  ;;  %v1048_v12 = vmul.f32 0.25, %v4997_v8 }
 0xe15   :  { %v839_v16 = vpop.f32.mrb[30].mxu1 }
 0xe16   :  { %v843_v17 = vmul.f32 0.05, %v837_v14  ;;  %v840_v18 = vadd.f32 %v5016_v24, %v839_v16  ;;  %v4365_v19 = vpop.f32.mrb[31].mxu1  ;;  %v1049_v14 = vadd.f32 %v1048_v12, %v5003_v11 }
 0xe18   :  { %v844_v20 = vmul.f32 0.05, %v840_v18  ;;  %v5150_v21 = vadd.f32 %v843_v17, %v5113_v33  ;;  %v1056_v15 = vrot.slane %v1049_v14, %v5006_v13 }
 0xe1a   :  { %v5153_v22 = vadd.f32 %v844_v20, %v5116_v34 }
 0xe1c   :  { %v850_v23 = vpack.c.bf16 %v5153_v22, %v5150_v21 }
 0xe1e   :  { %4369 = vmatmul.mubr.msk.bf16.vlgmr.msra.gmra.mrb[32].mxu0 %vm42_vm2, %v850_v23 }
 0xe1f   :  { %4379 = vmatpush3.bf16.msra.mxu0 %v4973_v4  ;;  %4380 = vmatprep.mubr.msk.bf16.mxu0 %vm4921_vm1, %v4920_v0 }
 0xe20   :  { %4390 = vmatprep.subr.bf16.mxu0 %v4920_v0 }
 0xef1   :  { %v894_v28 = vpop.f32.mrb[32].mxu0 }
 0xef2   :  { %v895_v29 = vadd.f32 %v894_v28, %v855_v27  ;;  %v4370_v30 = vpop.f32.mrb[33].mxu0 }
 0xef3   :  { %v897_v31 = vpop.f32.mrb[34].mxu0 }
 0xef4   :  { %v898_v32 = vadd.f32 %v897_v31, %v855_v27  ;;  %v4371_v33 = vpop.f32.mrb[35].mxu0  ;;  %4784 = vtanh.f32 %v895_v29 }
 0xef6   :  { %4786 = vtanh.f32 %v898_v32 }
 0xefe   :  { %v4785_v34 = vpop.eup %4784 }
 0xf00   :  { %v4787_v35 = vpop.eup %4786 }
 0xf01   :  { %v903_v37 = vpack.c.bf16 %v4787_v35, %v4785_v34 }
 0xf03   :  { %4375 = vmatmul.mubr.bf16.vlgmr.msra.gmra.mrb[32].mxu1 %v903_v37 }
 0xf04   :  { %4385 = vmatpush3.bf16.xpose.msra.mxu1 %v4990_v6  ;;  %4386 = vmatprep.mubr.msk.bf16.mxu1 %vm4921_vm1, %v4920_v0 }
 0xf05   :  { %4396 = vmatprep.subr.bf16.mxu1 %v4920_v0 }
 0xfd6   :  { %v938_v38 = vpop.f32.mrb[32].mxu1 }
 0xfd7   :  { %v939_v39 = vadd.f32 %v5016_v24, %v938_v38  ;;  %v4376_v40 = vpop.f32.mrb[33].mxu1  ;;  %v1050_v38 = vadd.f32 %v1049_v14, %v5028_v36 }
 0xfd8   :  { %v941_v41 = vpop.f32.mrb[34].mxu1 }
 0xfd9   :  { %v945_v42 = vmul.f32 0.025, %v939_v39  ;;  %v942_v43 = vadd.f32 %v5016_v24, %v941_v41  ;;  %v4377_v44 = vpop.f32.mrb[35].mxu1  ;;  %v1155_v39 = vrot.slane %v1050_v38, %v5006_v13 }
 0xfdb   :  { %v946_v45 = vmul.f32 0.025, %v942_v43  ;;  %v947_v46 = vadd.f32 %v945_v42, %v5150_v21 }
 0xfdd   :  { %v948_v47 = vadd.f32 %v946_v45, %v5153_v22 }
 0xfdf   :  { %v949_v48 = vpack.c.bf16 %v948_v47, %v947_v46 }
 0xfe1   :  { %4381 = vmatmul.mubr.msk.bf16.vlgmr.msra.gmra.mrb[36].mxu0 %vm42_vm2, %v949_v48 }
 0xfe2   :  { %4391 = vmatpush3.bf16.msra.mxu0 %v4973_v4  ;;  %4392 = vmatprep.mubr.msk.bf16.mxu0 %vm4921_vm1, %v4920_v0 }
 0xfe3   :  { %4402 = vmatprep.subr.bf16.mxu0 %v4920_v0 }
0x10b4   :  { %v993_v51 = vpop.f32.mrb[36].mxu0 }
0x10b5   :  { %v994_v52 = vadd.f32 %v993_v51, %v954_v50  ;;  %v4382_v53 = vpop.f32.mrb[37].mxu0 }
0x10b6   :  { %v996_v54 = vpop.f32.mrb[38].mxu0 }
0x10b7   :  { %v997_v55 = vadd.f32 %v996_v54, %v954_v50  ;;  %v4383_v56 = vpop.f32.mrb[39].mxu0  ;;  %4788 = vtanh.f32 %v994_v52 }
0x10b9   :  { %4790 = vtanh.f32 %v997_v55 }
0x10c1   :  { %v4789_v57 = vpop.eup %4788 }
0x10c3   :  { %v4791_v58 = vpop.eup %4790 }
0x10c4   :  { %v1002_v59 = vpack.c.bf16 %v4791_v58, %v4789_v57 }
0x10c6   :  { %4387 = vmatmul.mubr.bf16.vlgmr.msra.gmra.mrb[36].mxu1 %v1002_v59 }
0x10c7   :  { %4397 = vmatpush3.bf16.xpose.msra.mxu1 %v4990_v6  ;;  %4398 = vmatprep.mubr.msk.bf16.mxu1 %vm4921_vm1, %v4920_v0 }
0x10c8   :  { %4408 = vmatprep.subr.bf16.mxu1 %v4920_v0 }
0x1199   :  { %v1037_v60 = vpop.f32.mrb[36].mxu1 }
0x119a   :  { %v1038_v61 = vadd.f32 %v5016_v24, %v1037_v60  ;;  %v4388_v62 = vpop.f32.mrb[37].mxu1  ;;  %v1249_v60 = vmul.f32 0.3, %v4997_v8 }
0x119b   :  { %v1040_v63 = vpop.f32.mrb[38].mxu1 }
0x119c   :  { %v1044_v1 = vmul.f32 0.05, %v1038_v61  ;;  %v1041_v2 = vadd.f32 %v5016_v24, %v1040_v63  ;;  %v4389_v3 = vpop.f32.mrb[39].mxu1  ;;  %v1250_v61 = vadd.f32 %v1249_v60, %v5003_v11 }
0x119e   :  { %v1045_v5 = vmul.f32 0.05, %v1041_v2  ;;  %v5187_v7 = vadd.f32 %v1044_v1, %v5150_v21  ;;  %v1257_v62 = vrot.slane %v1250_v61, %v5006_v13 }
0x11a0   :  { %v5190_v9 = vadd.f32 %v1045_v5, %v5153_v22 }
0x11a2   :  { %v1051_v10 = vpack.c.bf16 %v5190_v9, %v5187_v7 }
0x11a4   :  { %4393 = vmatmul.mubr.msk.bf16.vlgmr.msra.gmra.mrb[40].mxu0 %vm42_vm2, %v1051_v10 }
0x11a5   :  { %4403 = vmatpush3.bf16.msra.mxu0 %v4973_v4  ;;  %4404 = vmatprep.mubr.msk.bf16.mxu0 %vm4921_vm1, %v4920_v0 }
0x11a6   :  { %4414 = vmatprep.subr.bf16.mxu0 %v4920_v0 }
0x1277   :  { %v1095_v16 = vpop.f32.mrb[40].mxu0 }
0x1278   :  { %v1096_v17 = vadd.f32 %v1095_v16, %v1056_v15  ;;  %v4394_v18 = vpop.f32.mrb[41].mxu0 }
0x1279   :  { %v1098_v19 = vpop.f32.mrb[42].mxu0 }
0x127a   :  { %v1099_v20 = vadd.f32 %v1098_v19, %v1056_v15  ;;  %v4395_v21 = vpop.f32.mrb[43].mxu0  ;;  %4792 = vtanh.f32 %v1096_v17 }
0x127c   :  { %4794 = vtanh.f32 %v1099_v20 }
0x1284   :  { %v4793_v22 = vpop.eup %4792 }
0x1286   :  { %v4795_v23 = vpop.eup %4794 }
0x1287   :  { %v1104_v25 = vpack.c.bf16 %v4795_v23, %v4793_v22 }
0x1289   :  { %4399 = vmatmul.mubr.bf16.vlgmr.msra.gmra.mrb[40].mxu1 %v1104_v25 }
0x128a   :  { %4409 = vmatpush3.bf16.xpose.msra.mxu1 %v4990_v6  ;;  %4410 = vmatprep.mubr.msk.bf16.mxu1 %vm4921_vm1, %v4920_v0 }
0x128b   :  { %4420 = vmatprep.subr.bf16.mxu1 %v4920_v0 }
0x135c   :  { %v1139_v26 = vpop.f32.mrb[40].mxu1 }
0x135d   :  { %v1140_v27 = vadd.f32 %v5016_v24, %v1139_v26  ;;  %v4400_v28 = vpop.f32.mrb[41].mxu1  ;;  %v1251_v26 = vadd.f32 %v1250_v61, %v5028_v36 }
0x135e   :  { %v1142_v29 = vpop.f32.mrb[42].mxu1 }
0x135f   :  { %v1146_v30 = vmul.f32 0.025, %v1140_v27  ;;  %v1143_v31 = vadd.f32 %v5016_v24, %v1142_v29  ;;  %v4401_v32 = vpop.f32.mrb[43].mxu1  ;;  %v1356_v27 = vrot.slane %v1251_v26, %v5006_v13 }
0x1361   :  { %v1147_v33 = vmul.f32 0.025, %v1143_v31  ;;  %v1148_v34 = vadd.f32 %v1146_v30, %v5187_v7 }
0x1363   :  { %v1149_v35 = vadd.f32 %v1147_v33, %v5190_v9 }
0x1365   :  { %v1150_v37 = vpack.c.bf16 %v1149_v35, %v1148_v34 }
0x1367   :  { %4405 = vmatmul.mubr.msk.bf16.vlgmr.msra.gmra.mrb[44].mxu0 %vm42_vm2, %v1150_v37 }
0x1368   :  { %4415 = vmatpush3.bf16.msra.mxu0 %v4973_v4  ;;  %4416 = vmatprep.mubr.msk.bf16.mxu0 %vm4921_vm1, %v4920_v0 }
0x1369   :  { %4426 = vmatprep.subr.bf16.mxu0 %v4920_v0 }
0x143a   :  { %v1194_v40 = vpop.f32.mrb[44].mxu0 }
0x143b   :  { %v1195_v41 = vadd.f32 %v1194_v40, %v1155_v39  ;;  %v4406_v42 = vpop.f32.mrb[45].mxu0 }
0x143c   :  { %v1197_v43 = vpop.f32.mrb[46].mxu0 }
0x143d   :  { %v1198_v44 = vadd.f32 %v1197_v43, %v1155_v39  ;;  %v4407_v45 = vpop.f32.mrb[47].mxu0  ;;  %4796 = vtanh.f32 %v1195_v41 }
0x143f   :  { %4798 = vtanh.f32 %v1198_v44 }
0x1447   :  { %v4797_v46 = vpop.eup %4796 }
0x1449   :  { %v4799_v47 = vpop.eup %4798 }
0x144a   :  { %v1203_v48 = vpack.c.bf16 %v4799_v47, %v4797_v46 }
0x144c   :  { %4411 = vmatmul.mubr.bf16.vlgmr.msra.gmra.mrb[44].mxu1 %v1203_v48 }
0x144d   :  { %4421 = vmatpush3.bf16.xpose.msra.mxu1 %v4990_v6  ;;  %4422 = vmatprep.mubr.msk.bf16.mxu1 %vm4921_vm1, %v4920_v0 }
0x144e   :  { %4432 = vmatprep.subr.bf16.mxu1 %v4920_v0 }
0x151f   :  { %v1238_v49 = vpop.f32.mrb[44].mxu1 }
0x1520   :  { %v1239_v50 = vadd.f32 %v5016_v24, %v1238_v49  ;;  %v4412_v51 = vpop.f32.mrb[45].mxu1  ;;  %v1450_v49 = vmul.f32 0.35, %v4997_v8 }
0x1521   :  { %v1241_v52 = vpop.f32.mrb[46].mxu1 }
0x1522   :  { %v1245_v53 = vmul.f32 0.05, %v1239_v50  ;;  %v1242_v54 = vadd.f32 %v5016_v24, %v1241_v52  ;;  %v4413_v55 = vpop.f32.mrb[47].mxu1  ;;  %v1451_v50 = vadd.f32 %v1450_v49, %v5003_v11 }
0x1524   :  { %v1246_v56 = vmul.f32 0.05, %v1242_v54  ;;  %v5224_v57 = vadd.f32 %v1245_v53, %v5187_v7  ;;  %v1458_v51 = vrot.slane %v1451_v50, %v5006_v13 }
0x1526   :  { %v5227_v58 = vadd.f32 %v1246_v56, %v5190_v9 }
0x1528   :  { %v1252_v59 = vpack.c.bf16 %v5227_v58, %v5224_v57 }
0x152a   :  { %4417 = vmatmul.mubr.msk.bf16.vlgmr.msra.gmra.mrb[48].mxu0 %vm42_vm2, %v1252_v59 }
0x152b   :  { %4427 = vmatpush3.bf16.msra.mxu0 %v4973_v4  ;;  %4428 = vmatprep.mubr.msk.bf16.mxu0 %vm4921_vm1, %v4920_v0 }
0x152c   :  { %4438 = vmatprep.subr.bf16.mxu0 %v4920_v0 }
0x15fd   :  { %v1296_v63 = vpop.f32.mrb[48].mxu0 }
0x15fe   :  { %v1297_v1 = vadd.f32 %v1296_v63, %v1257_v62  ;;  %v4418_v2 = vpop.f32.mrb[49].mxu0 }
0x15ff   :  { %v1299_v3 = vpop.f32.mrb[50].mxu0 }
0x1600   :  { %v1300_v5 = vadd.f32 %v1299_v3, %v1257_v62  ;;  %v4419_v7 = vpop.f32.mrb[51].mxu0  ;;  %4800 = vtanh.f32 %v1297_v1 }
0x1602   :  { %4802 = vtanh.f32 %v1300_v5 }
0x160a   :  { %v4801_v9 = vpop.eup %4800 }
0x160c   :  { %v4803_v10 = vpop.eup %4802 }
0x160d   :  { %v1305_v12 = vpack.c.bf16 %v4803_v10, %v4801_v9  ;;  %v1452_v9 = vadd.f32 %v1451_v50, %v5028_v36  ;;  %v5335_v50 = vld [vmem:[%s5776_s5] ss:$0 sm:$0xff] }
0x160f   :  { %4423 = vmatmul.mubr.bf16.vlgmr.msra.gmra.mrb[48].mxu1 %v1305_v12  ;;  %v1557_v10 = vrot.slane %v1452_v9, %v5006_v13 }
0x1610   :  { %4433 = vmatpush3.bf16.xpose.msra.mxu1 %v4990_v6  ;;  %4434 = vmatprep.mubr.msk.bf16.mxu1 %vm4921_vm1, %v4920_v0 }
0x1611   :  { %4444 = vmatprep.subr.bf16.mxu1 %v4920_v0 }
0x16e2   :  { %v1340_v14 = vpop.f32.mrb[48].mxu1 }
0x16e3   :  { %v1341_v15 = vadd.f32 %v5016_v24, %v1340_v14  ;;  %v4424_v16 = vpop.f32.mrb[49].mxu1 }
0x16e4   :  { %v1343_v17 = vpop.f32.mrb[50].mxu1 }
0x16e5   :  { %v1347_v18 = vmul.f32 0.025, %v1341_v15  ;;  %v1344_v19 = vadd.f32 %v5016_v24, %v1343_v17  ;;  %v4425_v20 = vpop.f32.mrb[51].mxu1 }
0x16e7   :  { %v1348_v21 = vmul.f32 0.025, %v1344_v19  ;;  %v1349_v22 = vadd.f32 %v1347_v18, %v5224_v57 }
0x16e9   :  { %v1350_v23 = vadd.f32 %v1348_v21, %v5227_v58 }
0x16eb   :  { %v1351_v25 = vpack.c.bf16 %v1350_v23, %v1349_v22  ;;  %v5294_v22 = vld [vmem:[%s5773_s4] sm:$0xf] }
0x16ed   :  { %4429 = vmatmul.mubr.msk.bf16.vlgmr.msra.gmra.mrb[52].mxu0 %vm42_vm2, %v1351_v25 }
0x16ee   :  { %4439 = vmatpush3.bf16.msra.mxu0 %v4973_v4  ;;  %4440 = vmatprep.mubr.msk.bf16.mxu0 %vm4921_vm1, %v4920_v0 }
0x16ef   :  { %4450 = vmatprep.subr.bf16.mxu0 %v4920_v0 }
0x17c0   :  { %v1395_v28 = vpop.f32.mrb[52].mxu0 }
0x17c1   :  { %v1396_v29 = vadd.f32 %v1395_v28, %v1356_v27  ;;  %v4430_v30 = vpop.f32.mrb[53].mxu0 }
0x17c2   :  { %v1398_v31 = vpop.f32.mrb[54].mxu0 }
0x17c3   :  { %v1399_v32 = vadd.f32 %v1398_v31, %v1356_v27  ;;  %v4431_v33 = vpop.f32.mrb[55].mxu0  ;;  %4804 = vtanh.f32 %v1396_v29 }
0x17c5   :  { %4806 = vtanh.f32 %v1399_v32 }
0x17cd   :  { %v4805_v34 = vpop.eup %4804 }
0x17cf   :  { %v4807_v35 = vpop.eup %4806 }
0x17d0   :  { %v1404_v37 = vpack.c.bf16 %v4807_v35, %v4805_v34 }
0x17d2   :  { %4435 = vmatmul.mubr.bf16.vlgmr.msra.gmra.mrb[52].mxu1 %v1404_v37  ;;  %v5324_v37 = vld [vmem:[%s5775_s2] sm:$0x1] }
0x17d3   :  { %4445 = vmatpush3.bf16.xpose.msra.mxu1 %v4990_v6  ;;  %4446 = vmatprep.mubr.msk.bf16.mxu1 %vm4921_vm1, %v4920_v0 }
0x17d4   :  { %4456 = vmatprep.subr.bf16.mxu1 %v4920_v0 }
0x18a5   :  { %v1439_v38 = vpop.f32.mrb[52].mxu1 }
0x18a6   :  { %v1440_v39 = vadd.f32 %v5016_v24, %v1439_v38  ;;  %v4436_v40 = vpop.f32.mrb[53].mxu1 }
0x18a7   :  { %v1442_v41 = vpop.f32.mrb[54].mxu1 }
0x18a8   :  { %v1446_v42 = vmul.f32 0.05, %v1440_v39  ;;  %v1443_v43 = vadd.f32 %v5016_v24, %v1442_v41  ;;  %v4437_v44 = vpop.f32.mrb[55].mxu1 }
0x18aa   :  { %v1447_v45 = vmul.f32 0.05, %v1443_v43  ;;  %v5261_v46 = vadd.f32 %v1446_v42, %v5224_v57 }
0x18ac   :  { %v5264_v47 = vadd.f32 %v1447_v45, %v5227_v58 }
0x18ae   :  { %v1453_v48 = vpack.c.bf16 %v5264_v47, %v5261_v46 }
0x18b0   :  { %4441 = vmatmul.mubr.msk.bf16.vlgmr.msra.gmra.mrb[56].mxu0 %vm42_vm2, %v1453_v48 }
0x18b1   :  { %4451 = vmatpush3.bf16.msra.mxu0 %v4973_v4  ;;  %4452 = vmatprep.mubr.msk.bf16.mxu0 %vm4921_vm1, %v4920_v0 }
0x18b2   :  { %4462 = vmatprep.subr.bf16.mxu0 %v4920_v0 }
0x1983   :  { %v1497_v52 = vpop.f32.mrb[56].mxu0 }
0x1984   :  { %v1498_v53 = vadd.f32 %v1497_v52, %v1458_v51  ;;  %v4442_v54 = vpop.f32.mrb[57].mxu0 }
0x1985   :  { %v1500_v55 = vpop.f32.mrb[58].mxu0 }
0x1986   :  { %v1501_v56 = vadd.f32 %v1500_v55, %v1458_v51  ;;  %v4443_v57 = vpop.f32.mrb[59].mxu0  ;;  %4808 = vtanh.f32 %v1498_v53 }
0x1988   :  { %4810 = vtanh.f32 %v1501_v56 }
0x1990   :  { %v4809_v58 = vpop.eup %4808 }
0x1992   :  { %v4811_v59 = vpop.eup %4810 }
0x1993   :  { %v1506_v60 = vpack.c.bf16 %v4811_v59, %v4809_v58 }
0x1995   :  { %4447 = vmatmul.mubr.bf16.vlgmr.msra.gmra.mrb[56].mxu1 %v1506_v60 }
0x1996   :  { %4457 = vmatpush3.bf16.xpose.msra.mxu1 %v4990_v6  ;;  %4458 = vmatprep.mubr.msk.bf16.mxu1 %vm4921_vm1, %v4920_v0 }
0x1997   :  { %4468 = vmatprep.subr.bf16.mxu1 %v4920_v0 }
0x1a68   :  { %v1541_v8 = vpop.f32.mrb[56].mxu1 }
0x1a69   :  { %v1542_v11 = vadd.f32 %v5016_v24, %v1541_v8  ;;  %v4448_v61 = vpop.f32.mrb[57].mxu1 }
0x1a6a   :  { %v1544_v62 = vpop.f32.mrb[58].mxu1 }
0x1a6b   :  { %v1548_v63 = vmul.f32 0.025, %v1542_v11  ;;  %v1545_v1 = vadd.f32 %v5016_v24, %v1544_v62  ;;  %v4449_v2 = vpop.f32.mrb[59].mxu1 }
0x1a6d   :  { %v1549_v3 = vmul.f32 0.025, %v1545_v1  ;;  %v1550_v5 = vadd.f32 %v1548_v63, %v5261_v46 }
0x1a6f   :  { %v1551_v7 = vadd.f32 %v1549_v3, %v5264_v47 }
0x1a71   :  { %v1552_v6 = vpack.c.bf16 %v1551_v7, %v1550_v5 }
0x1a73   :  { %4453 = vmatmul.mubr.msk.bf16.vlgmr.msra.gmra.mrb[60].mxu0 %vm42_vm2, %v1552_v6 }
0x1a74   :  { %4463 = vmatpush3.bf16.msra.mxu0 %v4973_v4  ;;  %4464 = vmatprep.mubr.msk.bf16.mxu0 %vm4921_vm1, %v4920_v0 }
0x1a75   :  { %4474 = vmatprep.subr.bf16.mxu0 %v4920_v0 }
0x1b46   :  { %v1596_v12 = vpop.f32.mrb[60].mxu0 }
0x1b47   :  { %v1597_v14 = vadd.f32 %v1596_v12, %v1557_v10  ;;  %v4454_v15 = vpop.f32.mrb[61].mxu0 }
0x1b48   :  { %v1599_v16 = vpop.f32.mrb[62].mxu0 }
0x1b49   :  { %v1600_v17 = vadd.f32 %v1599_v16, %v1557_v10  ;;  %v4455_v18 = vpop.f32.mrb[63].mxu0  ;;  %4812 = vtanh.f32 %v1597_v14 }
0x1b4b   :  { %4814 = vtanh.f32 %v1600_v17 }
0x1b53   :  { %v4813_v19 = vpop.eup %4812 }
0x1b55   :  { %v4815_v20 = vpop.eup %4814 }
0x1b56   :  { %v1605_v21 = vpack.c.bf16 %v4815_v20, %v4813_v19 }
0x1b58   :  { %4459 = vmatmul.mubr.bf16.vlgmr.msra.gmra.mrb[60].mxu1 %v1605_v21 }
0x1b59   :  { %4469 = vmatpush3.bf16.xpose.msra.mxu1 %v5294_v22  ;;  %4470 = vmatprep.mubr.msk.bf16.mxu1 %vm4921_vm1, %v4920_v0 }
0x1b5a   :  { %4480 = vmatprep.subr.bf16.mxu1 %v4920_v0 }
0x1c2b   :  { %v1640_v23 = vpop.f32.mrb[60].mxu1 }
0x1c2c   :  { %v1641_v25 = vadd.f32 %v5016_v24, %v1640_v23  ;;  %v4460_v26 = vpop.f32.mrb[61].mxu1 }
0x1c2d   :  { %v1643_v27 = vpop.f32.mrb[62].mxu1 }
0x1c2e   :  { %v1647_v28 = vmul.f32 0.05, %v1641_v25  ;;  %v1644_v29 = vadd.f32 %v5016_v24, %v1643_v27  ;;  %v4461_v30 = vpop.f32.mrb[63].mxu1  ;;  %v5318_v24 = vld [vmem:[%s5774_s3] sm:$0x1] }
0x1c2f   :  { %v1651_v35 = vmul.f32 0.4, %v5318_v24  ;;  %v1852_v23 = vmul.f32 0.45000002, %v5318_v24 }
0x1c30   :  { %v1648_v31 = vmul.f32 0.05, %v1644_v29  ;;  %v5303_v32 = vadd.f32 %v1647_v28, %v5261_v46 }
0x1c31   :  { %v1652_v38 = vadd.f32 %v5324_v37, %v1651_v35  ;;  %v1853_v25 = vadd.f32 %v5324_v37, %v1852_v23 }
0x1c32   :  { %v5306_v33 = vadd.f32 %v1648_v31, %v5264_v47 }
0x1c33   :  { %v1659_v39 = vrot.slane %v1652_v38, %v5006_v13  ;;  %v1653_v8 = vadd.f32 %v1652_v38, %v5028_v36  ;;  %v1860_v26 = vrot.slane %v1853_v25, %v5006_v13 }
0x1c34   :  { %v1654_v34 = vpack.c.bf16 %v5306_v33, %v5303_v32 }
0x1c35   :  { %v1758_v11 = vrot.slane %v1653_v8, %v5006_v13 }
0x1c36   :  { %4465 = vmatmul.mubr.msk.bf16.vlgmr.msra.gmra.mrb[64].mxu0 %vm42_vm2, %v1654_v34 }
0x1c37   :  { %4475 = vmatpush3.bf16.msra.mxu0 %v4973_v4  ;;  %4476 = vmatprep.mubr.msk.bf16.mxu0 %vm4921_vm1, %v4920_v0 }
0x1c38   :  { %4486 = vmatprep.subr.bf16.mxu0 %v4920_v0 }
0x1d09   :  { %v1698_v40 = vpop.f32.mrb[64].mxu0 }
0x1d0a   :  { %v1699_v41 = vadd.f32 %v1698_v40, %v1659_v39  ;;  %v4466_v42 = vpop.f32.mrb[65].mxu0 }
0x1d0b   :  { %v1701_v43 = vpop.f32.mrb[66].mxu0 }
0x1d0c   :  { %v1702_v44 = vadd.f32 %v1701_v43, %v1659_v39  ;;  %v4467_v45 = vpop.f32.mrb[67].mxu0  ;;  %4816 = vtanh.f32 %v1699_v41 }
0x1d0e   :  { %4818 = vtanh.f32 %v1702_v44 }
0x1d16   :  { %v4817_v46 = vpop.eup %4816 }
0x1d18   :  { %v4819_v47 = vpop.eup %4818 }
0x1d19   :  { %v1707_v48 = vpack.c.bf16 %v4819_v47, %v4817_v46 }
0x1d1b   :  { %4471 = vmatmul.mubr.bf16.vlgmr.msra.gmra.mrb[64].mxu1 %v1707_v48 }
0x1d1c   :  { %4481 = vmatpush3.bf16.xpose.msra.mxu1 %v5294_v22  ;;  %4482 = vmatprep.mubr.msk.bf16.mxu1 %vm4921_vm1, %v4920_v0 }
0x1d1d   :  { %4492 = vmatprep.subr.bf16.mxu1 %v4920_v0 }
0x1dee   :  { %v1742_v49 = vpop.f32.mrb[64].mxu1 }
0x1def   :  { %v1743_v51 = vadd.f32 %v5335_v50, %v1742_v49  ;;  %v4472_v52 = vpop.f32.mrb[65].mxu1  ;;  %v1854_v49 = vadd.f32 %v1853_v25, %v5028_v36 }
0x1df0   :  { %v1745_v53 = vpop.f32.mrb[66].mxu1 }
0x1df1   :  { %v1749_v54 = vmul.f32 0.025, %v1743_v51  ;;  %v1746_v55 = vadd.f32 %v5335_v50, %v1745_v53  ;;  %v4473_v56 = vpop.f32.mrb[67].mxu1  ;;  %v1959_v51 = vrot.slane %v1854_v49, %v5006_v13 }
0x1df3   :  { %v1750_v57 = vmul.f32 0.025, %v1746_v55  ;;  %v1751_v58 = vadd.f32 %v1749_v54, %v5303_v32 }
0x1df5   :  { %v1752_v59 = vadd.f32 %v1750_v57, %v5306_v33 }
0x1df7   :  { %v1753_v60 = vpack.c.bf16 %v1752_v59, %v1751_v58 }
0x1df9   :  { %4477 = vmatmul.mubr.msk.bf16.vlgmr.msra.gmra.mrb[68].mxu0 %vm42_vm2, %v1753_v60 }
0x1dfa   :  { %4487 = vmatpush3.bf16.msra.mxu0 %v4973_v4  ;;  %4488 = vmatprep.mubr.msk.bf16.mxu0 %vm4921_vm1, %v4920_v0 }
0x1dfb   :  { %4498 = vmatprep.subr.bf16.mxu0 %v4920_v0 }
0x1ecc   :  { %v1797_v61 = vpop.f32.mrb[68].mxu0 }
0x1ecd   :  { %v1798_v62 = vadd.f32 %v1797_v61, %v1758_v11  ;;  %v4478_v63 = vpop.f32.mrb[69].mxu0 }
0x1ece   :  { %v1800_v1 = vpop.f32.mrb[70].mxu0 }
0x1ecf   :  { %v1801_v2 = vadd.f32 %v1800_v1, %v1758_v11  ;;  %v4479_v3 = vpop.f32.mrb[71].mxu0  ;;  %4820 = vtanh.f32 %v1798_v62 }
0x1ed1   :  { %4822 = vtanh.f32 %v1801_v2 }
0x1ed9   :  { %v4821_v5 = vpop.eup %4820 }
0x1edb   :  { %v4823_v7 = vpop.eup %4822 }
0x1edc   :  { %v1806_v6 = vpack.c.bf16 %v4823_v7, %v4821_v5 }
0x1ede   :  { %4483 = vmatmul.mubr.bf16.vlgmr.msra.gmra.mrb[68].mxu1 %v1806_v6 }
0x1edf   :  { %4493 = vmatpush3.bf16.xpose.msra.mxu1 %v5294_v22  ;;  %4494 = vmatprep.mubr.msk.bf16.mxu1 %vm4921_vm1, %v4920_v0 }
0x1ee0   :  { %4504 = vmatprep.subr.bf16.mxu1 %v4920_v0 }
0x1fb1   :  { %v1841_v9 = vpop.f32.mrb[68].mxu1 }
0x1fb2   :  { %v1842_v10 = vadd.f32 %v5335_v50, %v1841_v9  ;;  %v4484_v12 = vpop.f32.mrb[69].mxu1  ;;  %v2053_v9 = vmul.f32 0.5, %v5318_v24 }
0x1fb3   :  { %v1844_v14 = vpop.f32.mrb[70].mxu1 }
0x1fb4   :  { %v1848_v15 = vmul.f32 0.05, %v1842_v10  ;;  %v1845_v16 = vadd.f32 %v5335_v50, %v1844_v14  ;;  %v4485_v17 = vpop.f32.mrb[71].mxu1  ;;  %v2054_v10 = vadd.f32 %v5324_v37, %v2053_v9 }
0x1fb6   :  { %v1849_v18 = vmul.f32 0.05, %v1845_v16  ;;  %v5355_v19 = vadd.f32 %v1848_v15, %v5303_v32  ;;  %v2061_v12 = vrot.slane %v2054_v10, %v5006_v13 }
0x1fb8   :  { %v5358_v20 = vadd.f32 %v1849_v18, %v5306_v33 }
0x1fba   :  { %v1855_v21 = vpack.c.bf16 %v5358_v20, %v5355_v19 }
0x1fbc   :  { %4489 = vmatmul.mubr.msk.bf16.vlgmr.msra.gmra.mrb[72].mxu0 %vm42_vm2, %v1855_v21 }
0x1fbd   :  { %4499 = vmatpush3.bf16.msra.mxu0 %v4973_v4  ;;  %4500 = vmatprep.mubr.msk.bf16.mxu0 %vm4921_vm1, %v4920_v0 }
0x1fbe   :  { %4510 = vmatprep.subr.bf16.mxu0 %v4920_v0 }
0x208f   :  { %v1899_v27 = vpop.f32.mrb[72].mxu0 }
0x2090   :  { %v1900_v28 = vadd.f32 %v1899_v27, %v1860_v26  ;;  %v4490_v29 = vpop.f32.mrb[73].mxu0 }
0x2091   :  { %v1902_v30 = vpop.f32.mrb[74].mxu0 }
0x2092   :  { %v1903_v31 = vadd.f32 %v1902_v30, %v1860_v26  ;;  %v4491_v32 = vpop.f32.mrb[75].mxu0  ;;  %4824 = vtanh.f32 %v1900_v28 }
0x2094   :  { %4826 = vtanh.f32 %v1903_v31 }
0x209c   :  { %v4825_v33 = vpop.eup %4824 }
0x209e   :  { %v4827_v34 = vpop.eup %4826 }
0x209f   :  { %v1908_v35 = vpack.c.bf16 %v4827_v34, %v4825_v33 }
0x20a1   :  { %4495 = vmatmul.mubr.bf16.vlgmr.msra.gmra.mrb[72].mxu1 %v1908_v35 }
0x20a2   :  { %4505 = vmatpush3.bf16.xpose.msra.mxu1 %v5294_v22  ;;  %4506 = vmatprep.mubr.msk.bf16.mxu1 %vm4921_vm1, %v4920_v0 }
0x20a3   :  { %4516 = vmatprep.subr.bf16.mxu1 %v4920_v0 }
0x2174   :  { %v1943_v38 = vpop.f32.mrb[72].mxu1 }
0x2175   :  { %v1944_v39 = vadd.f32 %v5335_v50, %v1943_v38  ;;  %v4496_v40 = vpop.f32.mrb[73].mxu1  ;;  %v2055_v38 = vadd.f32 %v2054_v10, %v5028_v36 }
0x2176   :  { %v1946_v41 = vpop.f32.mrb[74].mxu1 }
0x2177   :  { %v1950_v42 = vmul.f32 0.025, %v1944_v39  ;;  %v1947_v43 = vadd.f32 %v5335_v50, %v1946_v41  ;;  %v4497_v44 = vpop.f32.mrb[75].mxu1  ;;  %v2160_v39 = vrot.slane %v2055_v38, %v5006_v13 }
0x2179   :  { %v1951_v45 = vmul.f32 0.025, %v1947_v43  ;;  %v1952_v46 = vadd.f32 %v1950_v42, %v5355_v19 }
0x217b   :  { %v1953_v47 = vadd.f32 %v1951_v45, %v5358_v20 }
0x217d   :  { %v1954_v48 = vpack.c.bf16 %v1953_v47, %v1952_v46 }
0x217f   :  { %4501 = vmatmul.mubr.msk.bf16.vlgmr.msra.gmra.mrb[76].mxu0 %vm42_vm2, %v1954_v48 }
0x2180   :  { %4511 = vmatpush3.bf16.msra.mxu0 %v4973_v4  ;;  %4512 = vmatprep.mubr.msk.bf16.mxu0 %vm4921_vm1, %v4920_v0 }
0x2181   :  { %4522 = vmatprep.subr.bf16.mxu0 %v4920_v0 }
0x2252   :  { %v1998_v52 = vpop.f32.mrb[76].mxu0 }
0x2253   :  { %v1999_v53 = vadd.f32 %v1998_v52, %v1959_v51  ;;  %v4502_v54 = vpop.f32.mrb[77].mxu0 }
0x2254   :  { %v2001_v55 = vpop.f32.mrb[78].mxu0 }
0x2255   :  { %v2002_v56 = vadd.f32 %v2001_v55, %v1959_v51  ;;  %v4503_v57 = vpop.f32.mrb[79].mxu0  ;;  %4828 = vtanh.f32 %v1999_v53 }
0x2257   :  { %4830 = vtanh.f32 %v2002_v56 }
0x225f   :  { %v4829_v58 = vpop.eup %4828 }
0x2261   :  { %v4831_v59 = vpop.eup %4830 }
0x2262   :  { %v2007_v60 = vpack.c.bf16 %v4831_v59, %v4829_v58 }
0x2264   :  { %4507 = vmatmul.mubr.bf16.vlgmr.msra.gmra.mrb[76].mxu1 %v2007_v60 }
0x2265   :  { %4517 = vmatpush3.bf16.xpose.msra.mxu1 %v5294_v22  ;;  %4518 = vmatprep.mubr.msk.bf16.mxu1 %vm4921_vm1, %v4920_v0 }
0x2266   :  { %4528 = vmatprep.subr.bf16.mxu1 %v4920_v0 }
0x2337   :  { %v2042_v8 = vpop.f32.mrb[76].mxu1 }
0x2338   :  { %v2043_v11 = vadd.f32 %v5335_v50, %v2042_v8  ;;  %v4508_v61 = vpop.f32.mrb[77].mxu1  ;;  %v2254_v8 = vmul.f32 0.55, %v5318_v24 }
0x2339   :  { %v2045_v62 = vpop.f32.mrb[78].mxu1 }
0x233a   :  { %v2049_v63 = vmul.f32 0.05, %v2043_v11  ;;  %v2046_v1 = vadd.f32 %v5335_v50, %v2045_v62  ;;  %v4509_v2 = vpop.f32.mrb[79].mxu1  ;;  %v2255_v11 = vadd.f32 %v5324_v37, %v2254_v8 }
0x233c   :  { %v2050_v3 = vmul.f32 0.05, %v2046_v1  ;;  %v5392_v5 = vadd.f32 %v2049_v63, %v5355_v19  ;;  %v2262_v61 = vrot.slane %v2255_v11, %v5006_v13 }
0x233e   :  { %v5395_v7 = vadd.f32 %v2050_v3, %v5358_v20 }
0x2340   :  { %v2056_v6 = vpack.c.bf16 %v5395_v7, %v5392_v5 }
0x2342   :  { %4513 = vmatmul.mubr.msk.bf16.vlgmr.msra.gmra.mrb[80].mxu0 %vm42_vm2, %v2056_v6 }
0x2343   :  { %4523 = vmatpush3.bf16.msra.mxu0 %v4973_v4  ;;  %4524 = vmatprep.mubr.msk.bf16.mxu0 %vm4921_vm1, %v4920_v0 }
0x2344   :  { %4534 = vmatprep.subr.bf16.mxu0 %v4920_v0 }
0x2415   :  { %v2100_v14 = vpop.f32.mrb[80].mxu0 }
0x2416   :  { %v2101_v15 = vadd.f32 %v2100_v14, %v2061_v12  ;;  %v4514_v16 = vpop.f32.mrb[81].mxu0 }
0x2417   :  { %v2103_v17 = vpop.f32.mrb[82].mxu0 }
0x2418   :  { %v2104_v18 = vadd.f32 %v2103_v17, %v2061_v12  ;;  %v4515_v19 = vpop.f32.mrb[83].mxu0  ;;  %4832 = vtanh.f32 %v2101_v15 }
0x241a   :  { %4834 = vtanh.f32 %v2104_v18 }
0x2422   :  { %v4833_v20 = vpop.eup %4832 }
0x2424   :  { %v4835_v21 = vpop.eup %4834 }
0x2425   :  { %v2109_v23 = vpack.c.bf16 %v4835_v21, %v4833_v20 }
0x2427   :  { %4519 = vmatmul.mubr.bf16.vlgmr.msra.gmra.mrb[80].mxu1 %v2109_v23 }
0x2428   :  { %4529 = vmatpush3.bf16.xpose.msra.mxu1 %v5294_v22  ;;  %4530 = vmatprep.mubr.msk.bf16.mxu1 %vm4921_vm1, %v4920_v0 }
0x2429   :  { %4540 = vmatprep.subr.bf16.mxu1 %v4920_v0 }
0x24fa   :  { %v2144_v25 = vpop.f32.mrb[80].mxu1 }
0x24fb   :  { %v2145_v26 = vadd.f32 %v5335_v50, %v2144_v25  ;;  %v4520_v27 = vpop.f32.mrb[81].mxu1  ;;  %v2256_v25 = vadd.f32 %v2255_v11, %v5028_v36 }
0x24fc   :  { %v2147_v28 = vpop.f32.mrb[82].mxu1 }
0x24fd   :  { %v2151_v29 = vmul.f32 0.025, %v2145_v26  ;;  %v2148_v30 = vadd.f32 %v5335_v50, %v2147_v28  ;;  %v4521_v31 = vpop.f32.mrb[83].mxu1  ;;  %v2361_v26 = vrot.slane %v2256_v25, %v5006_v13 }
0x24ff   :  { %v2152_v32 = vmul.f32 0.025, %v2148_v30  ;;  %v2153_v33 = vadd.f32 %v2151_v29, %v5392_v5 }
0x2501   :  { %v2154_v34 = vadd.f32 %v2152_v32, %v5395_v7 }
0x2503   :  { %v2155_v35 = vpack.c.bf16 %v2154_v34, %v2153_v33 }
0x2505   :  { %4525 = vmatmul.mubr.msk.bf16.vlgmr.msra.gmra.mrb[84].mxu0 %vm42_vm2, %v2155_v35 }
0x2506   :  { %4535 = vmatpush3.bf16.msra.mxu0 %v4973_v4  ;;  %4536 = vmatprep.mubr.msk.bf16.mxu0 %vm4921_vm1, %v4920_v0 }
0x2507   :  { %4546 = vmatprep.subr.bf16.mxu0 %v4920_v0 }
0x25d8   :  { %v2199_v40 = vpop.f32.mrb[84].mxu0 }
0x25d9   :  { %v2200_v41 = vadd.f32 %v2199_v40, %v2160_v39  ;;  %v4526_v42 = vpop.f32.mrb[85].mxu0 }
0x25da   :  { %v2202_v43 = vpop.f32.mrb[86].mxu0 }
0x25db   :  { %v2203_v44 = vadd.f32 %v2202_v43, %v2160_v39  ;;  %v4527_v45 = vpop.f32.mrb[87].mxu0  ;;  %4836 = vtanh.f32 %v2200_v41 }
0x25dd   :  { %4838 = vtanh.f32 %v2203_v44 }
0x25e5   :  { %v4837_v46 = vpop.eup %4836 }
0x25e7   :  { %v4839_v47 = vpop.eup %4838 }
0x25e8   :  { %v2208_v48 = vpack.c.bf16 %v4839_v47, %v4837_v46 }
0x25ea   :  { %4531 = vmatmul.mubr.bf16.vlgmr.msra.gmra.mrb[84].mxu1 %v2208_v48 }
0x25eb   :  { %4541 = vmatpush3.bf16.xpose.msra.mxu1 %v5294_v22  ;;  %4542 = vmatprep.mubr.msk.bf16.mxu1 %vm4921_vm1, %v4920_v0 }
0x25ec   :  { %4552 = vmatprep.subr.bf16.mxu1 %v4920_v0 }
0x26bd   :  { %v2243_v49 = vpop.f32.mrb[84].mxu1 }
0x26be   :  { %v2244_v51 = vadd.f32 %v5335_v50, %v2243_v49  ;;  %v4532_v52 = vpop.f32.mrb[85].mxu1  ;;  %v2455_v49 = vmul.f32 0.6, %v5318_v24 }
0x26bf   :  { %v2246_v53 = vpop.f32.mrb[86].mxu1 }
0x26c0   :  { %v2250_v54 = vmul.f32 0.05, %v2244_v51  ;;  %v2247_v55 = vadd.f32 %v5335_v50, %v2246_v53  ;;  %v4533_v56 = vpop.f32.mrb[87].mxu1  ;;  %v2456_v51 = vadd.f32 %v5324_v37, %v2455_v49 }
0x26c2   :  { %v2251_v57 = vmul.f32 0.05, %v2247_v55  ;;  %v5429_v58 = vadd.f32 %v2250_v54, %v5392_v5  ;;  %v2463_v52 = vrot.slane %v2456_v51, %v5006_v13 }
0x26c4   :  { %v5432_v59 = vadd.f32 %v2251_v57, %v5395_v7 }
0x26c6   :  { %v2257_v60 = vpack.c.bf16 %v5432_v59, %v5429_v58 }
0x26c8   :  { %4537 = vmatmul.mubr.msk.bf16.vlgmr.msra.gmra.mrb[88].mxu0 %vm42_vm2, %v2257_v60 }
0x26c9   :  { %4547 = vmatpush3.bf16.msra.mxu0 %v4973_v4  ;;  %4548 = vmatprep.mubr.msk.bf16.mxu0 %vm4921_vm1, %v4920_v0 }
0x26ca   :  { %4558 = vmatprep.subr.bf16.mxu0 %v4920_v0 }
0x279b   :  { %v2301_v62 = vpop.f32.mrb[88].mxu0 }
0x279c   :  { %v2302_v63 = vadd.f32 %v2301_v62, %v2262_v61  ;;  %v4538_v1 = vpop.f32.mrb[89].mxu0 }
0x279d   :  { %v2304_v2 = vpop.f32.mrb[90].mxu0 }
0x279e   :  { %v2305_v3 = vadd.f32 %v2304_v2, %v2262_v61  ;;  %v4539_v5 = vpop.f32.mrb[91].mxu0  ;;  %4840 = vtanh.f32 %v2302_v63 }
0x27a0   :  { %4842 = vtanh.f32 %v2305_v3 }
0x27a8   :  { %v4841_v7 = vpop.eup %4840 }
0x27aa   :  { %v4843_v6 = vpop.eup %4842 }
0x27ab   :  { %v2310_v9 = vpack.c.bf16 %v4843_v6, %v4841_v7 }
0x27ad   :  { %4543 = vmatmul.mubr.bf16.vlgmr.msra.gmra.mrb[88].mxu1 %v2310_v9 }
0x27ae   :  { %4553 = vmatpush3.bf16.xpose.msra.mxu1 %v5294_v22  ;;  %4554 = vmatprep.mubr.msk.bf16.mxu1 %vm4921_vm1, %v4920_v0 }
0x27af   :  { %4564 = vmatprep.subr.bf16.mxu1 %v4920_v0 }
0x2880   :  { %v2345_v10 = vpop.f32.mrb[88].mxu1 }
0x2881   :  { %v2346_v12 = vadd.f32 %v5335_v50, %v2345_v10  ;;  %v4544_v14 = vpop.f32.mrb[89].mxu1  ;;  %v2457_v10 = vadd.f32 %v2456_v51, %v5028_v36 }
0x2882   :  { %v2348_v15 = vpop.f32.mrb[90].mxu1 }
0x2883   :  { %v2352_v16 = vmul.f32 0.025, %v2346_v12  ;;  %v2349_v17 = vadd.f32 %v5335_v50, %v2348_v15  ;;  %v4545_v18 = vpop.f32.mrb[91].mxu1  ;;  %v2562_v12 = vrot.slane %v2457_v10, %v5006_v13 }
0x2885   :  { %v2353_v19 = vmul.f32 0.025, %v2349_v17  ;;  %v2354_v20 = vadd.f32 %v2352_v16, %v5429_v58 }
0x2887   :  { %v2355_v21 = vadd.f32 %v2353_v19, %v5432_v59 }
0x2889   :  { %v2356_v23 = vpack.c.bf16 %v2355_v21, %v2354_v20 }
0x288b   :  { %4549 = vmatmul.mubr.msk.bf16.vlgmr.msra.gmra.mrb[92].mxu0 %vm42_vm2, %v2356_v23 }
0x288c   :  { %4559 = vmatpush3.bf16.msra.mxu0 %v4973_v4  ;;  %4560 = vmatprep.mubr.msk.bf16.mxu0 %vm4921_vm1, %v4920_v0 }
0x288d   :  { %4570 = vmatprep.subr.bf16.mxu0 %v4920_v0 }
0x295e   :  { %v2400_v27 = vpop.f32.mrb[92].mxu0 }
0x295f   :  { %v2401_v28 = vadd.f32 %v2400_v27, %v2361_v26  ;;  %v4550_v29 = vpop.f32.mrb[93].mxu0 }
0x2960   :  { %v2403_v30 = vpop.f32.mrb[94].mxu0 }
0x2961   :  { %v2404_v31 = vadd.f32 %v2403_v30, %v2361_v26  ;;  %v4551_v32 = vpop.f32.mrb[95].mxu0  ;;  %4844 = vtanh.f32 %v2401_v28 }
0x2963   :  { %4846 = vtanh.f32 %v2404_v31 }
0x296b   :  { %v4845_v33 = vpop.eup %4844 }
0x296d   :  { %v4847_v34 = vpop.eup %4846 }
0x296e   :  { %v2409_v35 = vpack.c.bf16 %v4847_v34, %v4845_v33 }
0x2970   :  { %4555 = vmatmul.mubr.bf16.vlgmr.msra.gmra.mrb[92].mxu1 %v2409_v35 }
0x2971   :  { %4565 = vmatpush3.bf16.xpose.msra.mxu1 %v5294_v22  ;;  %4566 = vmatprep.mubr.msk.bf16.mxu1 %vm4921_vm1, %v4920_v0 }
0x2972   :  { %4576 = vmatprep.subr.bf16.mxu1 %v4920_v0 }
0x2a43   :  { %v2444_v38 = vpop.f32.mrb[92].mxu1 }
0x2a44   :  { %v2445_v39 = vadd.f32 %v5335_v50, %v2444_v38  ;;  %v4556_v40 = vpop.f32.mrb[93].mxu1  ;;  %v2656_v38 = vmul.f32 0.65000004, %v5318_v24 }
0x2a45   :  { %v2447_v41 = vpop.f32.mrb[94].mxu1 }
0x2a46   :  { %v2451_v42 = vmul.f32 0.05, %v2445_v39  ;;  %v2448_v43 = vadd.f32 %v5335_v50, %v2447_v41  ;;  %v4557_v44 = vpop.f32.mrb[95].mxu1  ;;  %v2657_v39 = vadd.f32 %v5324_v37, %v2656_v38 }
0x2a48   :  { %v2452_v45 = vmul.f32 0.05, %v2448_v43  ;;  %v5466_v46 = vadd.f32 %v2451_v42, %v5429_v58  ;;  %v2664_v40 = vrot.slane %v2657_v39, %v5006_v13 }
0x2a4a   :  { %v5469_v47 = vadd.f32 %v2452_v45, %v5432_v59 }
0x2a4c   :  { %v2458_v48 = vpack.c.bf16 %v5469_v47, %v5466_v46 }
0x2a4e   :  { %4561 = vmatmul.mubr.msk.bf16.vlgmr.msra.gmra.mrb[96].mxu0 %vm42_vm2, %v2458_v48 }
0x2a4f   :  { %4571 = vmatpush3.bf16.msra.mxu0 %v4973_v4  ;;  %4572 = vmatprep.mubr.msk.bf16.mxu0 %vm4921_vm1, %v4920_v0 }
0x2a50   :  { %4582 = vmatprep.subr.bf16.mxu0 %v4920_v0 }
0x2b21   :  { %v2502_v53 = vpop.f32.mrb[96].mxu0 }
0x2b22   :  { %v2503_v54 = vadd.f32 %v2502_v53, %v2463_v52  ;;  %v4562_v55 = vpop.f32.mrb[97].mxu0 }
0x2b23   :  { %v2505_v56 = vpop.f32.mrb[98].mxu0 }
0x2b24   :  { %v2506_v57 = vadd.f32 %v2505_v56, %v2463_v52  ;;  %v4563_v58 = vpop.f32.mrb[99].mxu0  ;;  %4848 = vtanh.f32 %v2503_v54 }
0x2b26   :  { %4850 = vtanh.f32 %v2506_v57 }
0x2b2e   :  { %v4849_v59 = vpop.eup %4848 }
0x2b30   :  { %v4851_v60 = vpop.eup %4850 }
0x2b31   :  { %v2511_v8 = vpack.c.bf16 %v4851_v60, %v4849_v59 }
0x2b33   :  { %4567 = vmatmul.mubr.bf16.vlgmr.msra.gmra.mrb[96].mxu1 %v2511_v8 }
0x2b34   :  { %4577 = vmatpush3.bf16.xpose.msra.mxu1 %v5294_v22  ;;  %4578 = vmatprep.mubr.msk.bf16.mxu1 %vm4921_vm1, %v4920_v0 }
0x2b35   :  { %4588 = vmatprep.subr.bf16.mxu1 %v4920_v0 }
0x2c06   :  { %v2546_v11 = vpop.f32.mrb[96].mxu1 }
0x2c07   :  { %v2547_v61 = vadd.f32 %v5335_v50, %v2546_v11  ;;  %v4568_v62 = vpop.f32.mrb[97].mxu1  ;;  %v2658_v11 = vadd.f32 %v2657_v39, %v5028_v36 }
0x2c08   :  { %v2549_v63 = vpop.f32.mrb[98].mxu1 }
0x2c09   :  { %v2553_v1 = vmul.f32 0.025, %v2547_v61  ;;  %v2550_v2 = vadd.f32 %v5335_v50, %v2549_v63  ;;  %v4569_v3 = vpop.f32.mrb[99].mxu1  ;;  %v2763_v61 = vrot.slane %v2658_v11, %v5006_v13 }
0x2c0b   :  { %v2554_v5 = vmul.f32 0.025, %v2550_v2  ;;  %v2555_v7 = vadd.f32 %v2553_v1, %v5466_v46 }
0x2c0d   :  { %v2556_v6 = vadd.f32 %v2554_v5, %v5469_v47 }
0x2c0f   :  { %v2557_v9 = vpack.c.bf16 %v2556_v6, %v2555_v7 }
0x2c11   :  { %4573 = vmatmul.mubr.msk.bf16.vlgmr.msra.gmra.mrb[100].mxu0 %vm42_vm2, %v2557_v9 }
0x2c12   :  { %4583 = vmatpush3.bf16.msra.mxu0 %v4973_v4  ;;  %4584 = vmatprep.mubr.msk.bf16.mxu0 %vm4921_vm1, %v4920_v0 }
0x2c13   :  { %4594 = vmatprep.subr.bf16.mxu0 %v4920_v0 }
0x2ce4   :  { %v2601_v14 = vpop.f32.mrb[100].mxu0 }
0x2ce5   :  { %v2602_v15 = vadd.f32 %v2601_v14, %v2562_v12  ;;  %v4574_v16 = vpop.f32.mrb[101].mxu0 }
0x2ce6   :  { %v2604_v17 = vpop.f32.mrb[102].mxu0 }
0x2ce7   :  { %v2605_v18 = vadd.f32 %v2604_v17, %v2562_v12  ;;  %v4575_v19 = vpop.f32.mrb[103].mxu0  ;;  %4852 = vtanh.f32 %v2602_v15 }
0x2ce9   :  { %4854 = vtanh.f32 %v2605_v18 }
0x2cf1   :  { %v4853_v20 = vpop.eup %4852 }
0x2cf3   :  { %v4855_v21 = vpop.eup %4854 }
0x2cf4   :  { %v2610_v23 = vpack.c.bf16 %v4855_v21, %v4853_v20 }
0x2cf6   :  { %4579 = vmatmul.mubr.bf16.vlgmr.msra.gmra.mrb[100].mxu1 %v2610_v23 }
0x2cf7   :  { %4589 = vmatpush3.bf16.xpose.msra.mxu1 %v5294_v22  ;;  %4590 = vmatprep.mubr.msk.bf16.mxu1 %vm4921_vm1, %v4920_v0 }
0x2cf8   :  { %4600 = vmatprep.subr.bf16.mxu1 %v4920_v0 }
0x2dc9   :  { %v2645_v25 = vpop.f32.mrb[100].mxu1 }
0x2dca   :  { %v2646_v26 = vadd.f32 %v5335_v50, %v2645_v25  ;;  %v4580_v27 = vpop.f32.mrb[101].mxu1  ;;  %v2857_v25 = vmul.f32 0.7, %v5318_v24 }
0x2dcb   :  { %v2648_v28 = vpop.f32.mrb[102].mxu1 }
0x2dcc   :  { %v2652_v29 = vmul.f32 0.05, %v2646_v26  ;;  %v2649_v30 = vadd.f32 %v5335_v50, %v2648_v28  ;;  %v4581_v31 = vpop.f32.mrb[103].mxu1  ;;  %v2858_v26 = vadd.f32 %v5324_v37, %v2857_v25 }
0x2dce   :  { %v2653_v32 = vmul.f32 0.05, %v2649_v30  ;;  %v5503_v33 = vadd.f32 %v2652_v29, %v5466_v46  ;;  %v2865_v27 = vrot.slane %v2858_v26, %v5006_v13 }
0x2dd0   :  { %v5506_v34 = vadd.f32 %v2653_v32, %v5469_v47 }
0x2dd2   :  { %v2659_v35 = vpack.c.bf16 %v5506_v34, %v5503_v33 }
0x2dd4   :  { %4585 = vmatmul.mubr.msk.bf16.vlgmr.msra.gmra.mrb[104].mxu0 %vm42_vm2, %v2659_v35 }
0x2dd5   :  { %4595 = vmatpush3.bf16.msra.mxu0 %v4973_v4  ;;  %4596 = vmatprep.mubr.msk.bf16.mxu0 %vm4921_vm1, %v4920_v0 }
0x2dd6   :  { %4606 = vmatprep.subr.bf16.mxu0 %v4920_v0 }
0x2ea7   :  { %v2703_v41 = vpop.f32.mrb[104].mxu0 }
0x2ea8   :  { %v2704_v42 = vadd.f32 %v2703_v41, %v2664_v40  ;;  %v4586_v43 = vpop.f32.mrb[105].mxu0 }
0x2ea9   :  { %v2706_v44 = vpop.f32.mrb[106].mxu0 }
0x2eaa   :  { %v2707_v45 = vadd.f32 %v2706_v44, %v2664_v40  ;;  %v4587_v46 = vpop.f32.mrb[107].mxu0  ;;  %4856 = vtanh.f32 %v2704_v42 }
0x2eac   :  { %4858 = vtanh.f32 %v2707_v45 }
0x2eb4   :  { %v4857_v47 = vpop.eup %4856 }
0x2eb6   :  { %v4859_v48 = vpop.eup %4858 }
0x2eb7   :  { %v2712_v49 = vpack.c.bf16 %v4859_v48, %v4857_v47 }
0x2eb9   :  { %4591 = vmatmul.mubr.bf16.vlgmr.msra.gmra.mrb[104].mxu1 %v2712_v49 }
0x2eba   :  { %4601 = vmatpush3.bf16.xpose.msra.mxu1 %v5294_v22  ;;  %4602 = vmatprep.mubr.msk.bf16.mxu1 %vm4921_vm1, %v4920_v0 }
0x2ebb   :  { %4612 = vmatprep.subr.bf16.mxu1 %v4920_v0 }
0x2f8c   :  { %v2747_v51 = vpop.f32.mrb[104].mxu1 }
0x2f8d   :  { %v2748_v52 = vadd.f32 %v5335_v50, %v2747_v51  ;;  %v4592_v53 = vpop.f32.mrb[105].mxu1  ;;  %v2859_v51 = vadd.f32 %v2858_v26, %v5028_v36 }
0x2f8e   :  { %v2750_v54 = vpop.f32.mrb[106].mxu1 }
0x2f8f   :  { %v2754_v55 = vmul.f32 0.025, %v2748_v52  ;;  %v2751_v56 = vadd.f32 %v5335_v50, %v2750_v54  ;;  %v4593_v57 = vpop.f32.mrb[107].mxu1  ;;  %v2964_v52 = vrot.slane %v2859_v51, %v5006_v13 }
0x2f91   :  { %v2755_v58 = vmul.f32 0.025, %v2751_v56  ;;  %v2756_v59 = vadd.f32 %v2754_v55, %v5503_v33 }
0x2f93   :  { %v2757_v60 = vadd.f32 %v2755_v58, %v5506_v34 }
0x2f95   :  { %v2758_v8 = vpack.c.bf16 %v2757_v60, %v2756_v59 }
0x2f97   :  { %4597 = vmatmul.mubr.msk.bf16.vlgmr.msra.gmra.mrb[108].mxu0 %vm42_vm2, %v2758_v8 }
0x2f98   :  { %4607 = vmatpush3.bf16.msra.mxu0 %v4973_v4  ;;  %4608 = vmatprep.mubr.msk.bf16.mxu0 %vm4921_vm1, %v4920_v0 }
0x2f99   :  { %4618 = vmatprep.subr.bf16.mxu0 %v4920_v0 }
0x306a   :  { %v2802_v62 = vpop.f32.mrb[108].mxu0 }
0x306b   :  { %v2803_v63 = vadd.f32 %v2802_v62, %v2763_v61  ;;  %v4598_v1 = vpop.f32.mrb[109].mxu0 }
0x306c   :  { %v2805_v2 = vpop.f32.mrb[110].mxu0 }
0x306d   :  { %v2806_v3 = vadd.f32 %v2805_v2, %v2763_v61  ;;  %v4599_v5 = vpop.f32.mrb[111].mxu0  ;;  %4860 = vtanh.f32 %v2803_v63 }
0x306f   :  { %4862 = vtanh.f32 %v2806_v3 }
0x3077   :  { %v4861_v7 = vpop.eup %4860 }
0x3079   :  { %v4863_v6 = vpop.eup %4862 }
0x307a   :  { %v2811_v9 = vpack.c.bf16 %v4863_v6, %v4861_v7 }
0x307c   :  { %4603 = vmatmul.mubr.bf16.vlgmr.msra.gmra.mrb[108].mxu1 %v2811_v9 }
0x307d   :  { %4613 = vmatpush3.bf16.xpose.msra.mxu1 %v5294_v22  ;;  %4614 = vmatprep.mubr.msk.bf16.mxu1 %vm4921_vm1, %v4920_v0 }
0x307e   :  { %4624 = vmatprep.subr.bf16.mxu1 %v4920_v0 }
0x314f   :  { %v2846_v10 = vpop.f32.mrb[108].mxu1 }
0x3150   :  { %v2847_v12 = vadd.f32 %v5335_v50, %v2846_v10  ;;  %v4604_v14 = vpop.f32.mrb[109].mxu1  ;;  %v3058_v10 = vmul.f32 0.75, %v5318_v24 }
0x3151   :  { %v2849_v15 = vpop.f32.mrb[110].mxu1 }
0x3152   :  { %v2853_v16 = vmul.f32 0.05, %v2847_v12  ;;  %v2850_v17 = vadd.f32 %v5335_v50, %v2849_v15  ;;  %v4605_v18 = vpop.f32.mrb[111].mxu1  ;;  %v3059_v12 = vadd.f32 %v5324_v37, %v3058_v10 }
0x3154   :  { %v2854_v19 = vmul.f32 0.05, %v2850_v17  ;;  %v5540_v20 = vadd.f32 %v2853_v16, %v5503_v33  ;;  %v3066_v14 = vrot.slane %v3059_v12, %v5006_v13 }
0x3156   :  { %v5543_v21 = vadd.f32 %v2854_v19, %v5506_v34 }
0x3158   :  { %v2860_v23 = vpack.c.bf16 %v5543_v21, %v5540_v20 }
0x315a   :  { %4609 = vmatmul.mubr.msk.bf16.vlgmr.msra.gmra.mrb[112].mxu0 %vm42_vm2, %v2860_v23 }
0x315b   :  { %4619 = vmatpush3.bf16.msra.mxu0 %v4973_v4  ;;  %4620 = vmatprep.mubr.msk.bf16.mxu0 %vm4921_vm1, %v4920_v0 }
0x315c   :  { %4630 = vmatprep.subr.bf16.mxu0 %v4920_v0 }
0x322d   :  { %v2904_v28 = vpop.f32.mrb[112].mxu0 }
0x322e   :  { %v2905_v29 = vadd.f32 %v2904_v28, %v2865_v27  ;;  %v4610_v30 = vpop.f32.mrb[113].mxu0 }
0x322f   :  { %v2907_v31 = vpop.f32.mrb[114].mxu0 }
0x3230   :  { %v2908_v32 = vadd.f32 %v2907_v31, %v2865_v27  ;;  %v4611_v33 = vpop.f32.mrb[115].mxu0  ;;  %4864 = vtanh.f32 %v2905_v29 }
0x3232   :  { %4866 = vtanh.f32 %v2908_v32 }
0x323a   :  { %v4865_v34 = vpop.eup %4864 }
0x323c   :  { %v4867_v35 = vpop.eup %4866 }
0x323d   :  { %v2913_v38 = vpack.c.bf16 %v4867_v35, %v4865_v34  ;;  %v3060_v34 = vadd.f32 %v3059_v12, %v5028_v36  ;;  %v5651_v12 = vld [vmem:[%s5776_s5] ss:$0 sm:$0xff] }
0x323f   :  { %4615 = vmatmul.mubr.bf16.vlgmr.msra.gmra.mrb[112].mxu1 %v2913_v38  ;;  %v3165_v35 = vrot.slane %v3060_v34, %v5006_v13 }
0x3240   :  { %4625 = vmatpush3.bf16.xpose.msra.mxu1 %v5294_v22  ;;  %4626 = vmatprep.mubr.msk.bf16.mxu1 %vm4921_vm1, %v4920_v0 }
0x3241   :  { %4636 = vmatprep.subr.bf16.mxu1 %v4920_v0 }
0x3312   :  { %v2948_v39 = vpop.f32.mrb[112].mxu1 }
0x3313   :  { %v2949_v40 = vadd.f32 %v5335_v50, %v2948_v39  ;;  %v4616_v41 = vpop.f32.mrb[113].mxu1 }
0x3314   :  { %v2951_v42 = vpop.f32.mrb[114].mxu1 }
0x3315   :  { %v2955_v43 = vmul.f32 0.025, %v2949_v40  ;;  %v2952_v44 = vadd.f32 %v5335_v50, %v2951_v42  ;;  %v4617_v45 = vpop.f32.mrb[115].mxu1 }
0x3317   :  { %v2956_v46 = vmul.f32 0.025, %v2952_v44  ;;  %v2957_v47 = vadd.f32 %v2955_v43, %v5540_v20 }
0x3319   :  { %v2958_v48 = vadd.f32 %v2956_v46, %v5543_v21 }
0x331b   :  { %v2959_v49 = vpack.c.bf16 %v2958_v48, %v2957_v47  ;;  %v5610_v47 = vld [vmem:[%s5773_s4] sm:$0xf] }
0x331d   :  { %4621 = vmatmul.mubr.msk.bf16.vlgmr.msra.gmra.mrb[116].mxu0 %vm42_vm2, %v2959_v49 }
0x331e   :  { %4631 = vmatpush3.bf16.msra.mxu0 %v4973_v4  ;;  %4632 = vmatprep.mubr.msk.bf16.mxu0 %vm4921_vm1, %v4920_v0 }
0x331f   :  { %4642 = vmatprep.subr.bf16.mxu0 %v4920_v0 }
0x33f0   :  { %v3003_v53 = vpop.f32.mrb[116].mxu0 }
0x33f1   :  { %v3004_v54 = vadd.f32 %v3003_v53, %v2964_v52  ;;  %v4622_v55 = vpop.f32.mrb[117].mxu0 }
0x33f2   :  { %v3006_v56 = vpop.f32.mrb[118].mxu0 }
0x33f3   :  { %v3007_v57 = vadd.f32 %v3006_v56, %v2964_v52  ;;  %v4623_v58 = vpop.f32.mrb[119].mxu0  ;;  %4868 = vtanh.f32 %v3004_v54 }
0x33f5   :  { %4870 = vtanh.f32 %v3007_v57 }
0x33fd   :  { %v4869_v59 = vpop.eup %4868 }
0x33ff   :  { %v4871_v60 = vpop.eup %4870 }
0x3400   :  { %v3012_v8 = vpack.c.bf16 %v4871_v60, %v4869_v59 }
0x3402   :  { %4627 = vmatmul.mubr.bf16.vlgmr.msra.gmra.mrb[116].mxu1 %v3012_v8  ;;  %v5640_v8 = vld [vmem:[%s5775_s2] sm:$0x1] }
0x3403   :  { %4637 = vmatpush3.bf16.xpose.msra.mxu1 %v5294_v22  ;;  %4638 = vmatprep.mubr.msk.bf16.mxu1 %vm4921_vm1, %v4920_v0 }
0x3404   :  { %4648 = vmatprep.subr.bf16.mxu1 %v4920_v0 }
0x34d5   :  { %v3047_v11 = vpop.f32.mrb[116].mxu1 }
0x34d6   :  { %v3048_v61 = vadd.f32 %v5335_v50, %v3047_v11  ;;  %v4628_v62 = vpop.f32.mrb[117].mxu1 }
0x34d7   :  { %v3050_v63 = vpop.f32.mrb[118].mxu1 }
0x34d8   :  { %v3054_v1 = vmul.f32 0.05, %v3048_v61  ;;  %v3051_v2 = vadd.f32 %v5335_v50, %v3050_v63  ;;  %v4629_v3 = vpop.f32.mrb[119].mxu1 }
0x34da   :  { %v3055_v5 = vmul.f32 0.05, %v3051_v2  ;;  %v5577_v7 = vadd.f32 %v3054_v1, %v5540_v20 }
0x34dc   :  { %v5580_v6 = vadd.f32 %v3055_v5, %v5543_v21 }
0x34de   :  { %v3061_v9 = vpack.c.bf16 %v5580_v6, %v5577_v7 }
0x34e0   :  { %4633 = vmatmul.mubr.msk.bf16.vlgmr.msra.gmra.mrb[120].mxu0 %vm42_vm2, %v3061_v9 }
0x34e1   :  { %4643 = vmatpush3.bf16.msra.mxu0 %v4973_v4  ;;  %4644 = vmatprep.mubr.msk.bf16.mxu0 %vm4921_vm1, %v4920_v0 }
0x34e2   :  { %4654 = vmatprep.subr.bf16.mxu0 %v4920_v0 }
0x35b3   :  { %v3105_v15 = vpop.f32.mrb[120].mxu0 }
0x35b4   :  { %v3106_v16 = vadd.f32 %v3105_v15, %v3066_v14  ;;  %v4634_v17 = vpop.f32.mrb[121].mxu0 }
0x35b5   :  { %v3108_v18 = vpop.f32.mrb[122].mxu0 }
0x35b6   :  { %v3109_v19 = vadd.f32 %v3108_v18, %v3066_v14  ;;  %v4635_v20 = vpop.f32.mrb[123].mxu0  ;;  %4872 = vtanh.f32 %v3106_v16 }
0x35b8   :  { %4874 = vtanh.f32 %v3109_v19 }
0x35c0   :  { %v4873_v21 = vpop.eup %4872 }
0x35c2   :  { %v4875_v23 = vpop.eup %4874 }
0x35c3   :  { %v3114_v25 = vpack.c.bf16 %v4875_v23, %v4873_v21 }
0x35c5   :  { %4639 = vmatmul.mubr.bf16.vlgmr.msra.gmra.mrb[120].mxu1 %v3114_v25 }
0x35c6   :  { %4649 = vmatpush3.bf16.xpose.msra.mxu1 %v5294_v22  ;;  %4650 = vmatprep.mubr.msk.bf16.mxu1 %vm4921_vm1, %v4920_v0 }
0x35c7   :  { %4660 = vmatprep.subr.bf16.mxu1 %v4920_v0 }
0x3698   :  { %v3149_v24 = vpop.f32.mrb[120].mxu1 }
0x3699   :  { %v3150_v37 = vadd.f32 %v5335_v50, %v3149_v24  ;;  %v4640_v26 = vpop.f32.mrb[121].mxu1 }
0x369a   :  { %v3152_v27 = vpop.f32.mrb[122].mxu1 }
0x369b   :  { %v3156_v28 = vmul.f32 0.025, %v3150_v37  ;;  %v3153_v29 = vadd.f32 %v5335_v50, %v3152_v27  ;;  %v4641_v30 = vpop.f32.mrb[123].mxu1 }
0x369d   :  { %v3157_v31 = vmul.f32 0.025, %v3153_v29  ;;  %v3158_v32 = vadd.f32 %v3156_v28, %v5577_v7 }
0x369f   :  { %v3159_v33 = vadd.f32 %v3157_v31, %v5580_v6 }
0x36a1   :  { %v3160_v22 = vpack.c.bf16 %v3159_v33, %v3158_v32 }
0x36a3   :  { %4645 = vmatmul.mubr.msk.bf16.vlgmr.msra.gmra.mrb[124].mxu0 %vm42_vm2, %v3160_v22 }
0x36a4   :  { %4655 = vmatpush3.bf16.msra.mxu0 %v4973_v4  ;;  %4656 = vmatprep.mubr.msk.bf16.mxu0 %vm4921_vm1, %v4920_v0 }
0x36a5   :  { %4666 = vmatprep.subr.bf16.mxu0 %v4920_v0 }
0x3776   :  { %v3204_v38 = vpop.f32.mrb[124].mxu0 }
0x3777   :  { %v3205_v39 = vadd.f32 %v3204_v38, %v3165_v35  ;;  %v4646_v40 = vpop.f32.mrb[125].mxu0 }
0x3778   :  { %v3207_v41 = vpop.f32.mrb[126].mxu0 }
0x3779   :  { %v3208_v42 = vadd.f32 %v3207_v41, %v3165_v35  ;;  %v4647_v43 = vpop.f32.mrb[127].mxu0  ;;  %4876 = vtanh.f32 %v3205_v39 }
0x377b   :  { %4878 = vtanh.f32 %v3208_v42 }
0x3783   :  { %v4877_v44 = vpop.eup %4876 }
0x3785   :  { %v4879_v45 = vpop.eup %4878 }
0x3786   :  { %v3213_v46 = vpack.c.bf16 %v4879_v45, %v4877_v44 }
0x3788   :  { %4651 = vmatmul.mubr.bf16.vlgmr.msra.gmra.mrb[124].mxu1 %v3213_v46 }
0x3789   :  { %4661 = vmatpush3.bf16.xpose.msra.mxu1 %v5610_v47  ;;  %4662 = vmatprep.mubr.msk.bf16.mxu1 %vm4921_vm1, %v4920_v0 }
0x378a   :  { %4672 = vmatprep.subr.bf16.mxu1 %v4920_v0 }
0x385b   :  { %v3248_v48 = vpop.f32.mrb[124].mxu1 }
0x385c   :  { %v3249_v49 = vadd.f32 %v5335_v50, %v3248_v48  ;;  %v4652_v51 = vpop.f32.mrb[125].mxu1 }
0x385d   :  { %v3251_v52 = vpop.f32.mrb[126].mxu1 }
0x385e   :  { %v3255_v53 = vmul.f32 0.05, %v3249_v49  ;;  %v3252_v54 = vadd.f32 %v5335_v50, %v3251_v52  ;;  %v4653_v55 = vpop.f32.mrb[127].mxu1  ;;  %v5634_v50 = vld [vmem:[%s5774_s3] sm:$0x1] }
0x385f   :  { %v3259_v60 = vmul.f32 0.8, %v5634_v50  ;;  %v3460_v48 = vmul.f32 0.85, %v5634_v50 }
0x3860   :  { %v3256_v56 = vmul.f32 0.05, %v3252_v54  ;;  %v5619_v57 = vadd.f32 %v3255_v53, %v5577_v7 }
0x3861   :  { %v3260_v11 = vadd.f32 %v5640_v8, %v3259_v60  ;;  %v3461_v49 = vadd.f32 %v5640_v8, %v3460_v48 }
0x3862   :  { %v5622_v58 = vadd.f32 %v3256_v56, %v5580_v6 }
0x3863   :  { %v3267_v61 = vrot.slane %v3260_v11, %v5006_v13  ;;  %v3261_v24 = vadd.f32 %v3260_v11, %v5028_v36  ;;  %v3468_v51 = vrot.slane %v3461_v49, %v5006_v13 }
0x3864   :  { %v3262_v59 = vpack.c.bf16 %v5622_v58, %v5619_v57 }
0x3865   :  { %v3366_v37 = vrot.slane %v3261_v24, %v5006_v13 }
0x3866   :  { %4657 = vmatmul.mubr.msk.bf16.vlgmr.msra.gmra.mrb[128].mxu0 %vm42_vm2, %v3262_v59 }
0x3867   :  { %4667 = vmatpush3.bf16.msra.mxu0 %v4973_v4  ;;  %4668 = vmatprep.mubr.msk.bf16.mxu0 %vm4921_vm1, %v4920_v0 }
0x3868   :  { %4678 = vmatprep.subr.bf16.mxu0 %v4920_v0 }
0x3939   :  { %v3306_v62 = vpop.f32.mrb[128].mxu0 }
0x393a   :  { %v3307_v63 = vadd.f32 %v3306_v62, %v3267_v61  ;;  %v4658_v1 = vpop.f32.mrb[129].mxu0 }
0x393b   :  { %v3309_v2 = vpop.f32.mrb[130].mxu0 }
0x393c   :  { %v3310_v3 = vadd.f32 %v3309_v2, %v3267_v61  ;;  %v4659_v5 = vpop.f32.mrb[131].mxu0  ;;  %4880 = vtanh.f32 %v3307_v63 }
0x393e   :  { %4882 = vtanh.f32 %v3310_v3 }
0x3946   :  { %v4881_v7 = vpop.eup %4880 }
0x3948   :  { %v4883_v6 = vpop.eup %4882 }
0x3949   :  { %v3315_v9 = vpack.c.bf16 %v4883_v6, %v4881_v7 }
0x394b   :  { %4663 = vmatmul.mubr.bf16.vlgmr.msra.gmra.mrb[128].mxu1 %v3315_v9 }
0x394c   :  { %4673 = vmatpush3.bf16.xpose.msra.mxu1 %v5610_v47  ;;  %4674 = vmatprep.mubr.msk.bf16.mxu1 %vm4921_vm1, %v4920_v0 }
0x394d   :  { %4684 = vmatprep.subr.bf16.mxu1 %v4920_v0 }
0x3a1e   :  { %v3350_v10 = vpop.f32.mrb[128].mxu1 }
0x3a1f   :  { %v3351_v14 = vadd.f32 %v5651_v12, %v3350_v10  ;;  %v4664_v15 = vpop.f32.mrb[129].mxu1  ;;  %v3462_v10 = vadd.f32 %v3461_v49, %v5028_v36 }
0x3a20   :  { %v3353_v16 = vpop.f32.mrb[130].mxu1 }
0x3a21   :  { %v3357_v17 = vmul.f32 0.025, %v3351_v14  ;;  %v3354_v18 = vadd.f32 %v5651_v12, %v3353_v16  ;;  %v4665_v19 = vpop.f32.mrb[131].mxu1  ;;  %v3567_v14 = vrot.slane %v3462_v10, %v5006_v13 }
0x3a23   :  { %v3358_v20 = vmul.f32 0.025, %v3354_v18  ;;  %v3359_v21 = vadd.f32 %v3357_v17, %v5619_v57 }
0x3a25   :  { %v3360_v23 = vadd.f32 %v3358_v20, %v5622_v58 }
0x3a27   :  { %v3361_v25 = vpack.c.bf16 %v3360_v23, %v3359_v21 }
0x3a29   :  { %4669 = vmatmul.mubr.msk.bf16.vlgmr.msra.gmra.mrb[132].mxu0 %vm42_vm2, %v3361_v25 }
0x3a2a   :  { %4679 = vmatpush3.bf16.msra.mxu0 %v4973_v4  ;;  %4680 = vmatprep.mubr.msk.bf16.mxu0 %vm4921_vm1, %v4920_v0 }
0x3a2b   :  { %4690 = vmatprep.subr.bf16.mxu0 %v4920_v0 }
0x3afc   :  { %v3405_v26 = vpop.f32.mrb[132].mxu0 }
0x3afd   :  { %v3406_v27 = vadd.f32 %v3405_v26, %v3366_v37  ;;  %v4670_v28 = vpop.f32.mrb[133].mxu0 }
0x3afe   :  { %v3408_v29 = vpop.f32.mrb[134].mxu0 }
0x3aff   :  { %v3409_v30 = vadd.f32 %v3408_v29, %v3366_v37  ;;  %v4671_v31 = vpop.f32.mrb[135].mxu0  ;;  %4884 = vtanh.f32 %v3406_v27 }
0x3b01   :  { %4886 = vtanh.f32 %v3409_v30 }
0x3b09   :  { %v4885_v32 = vpop.eup %4884 }
0x3b0b   :  { %v4887_v33 = vpop.eup %4886 }
0x3b0c   :  { %v3414_v22 = vpack.c.bf16 %v4887_v33, %v4885_v32 }
0x3b0e   :  { %4675 = vmatmul.mubr.bf16.vlgmr.msra.gmra.mrb[132].mxu1 %v3414_v22 }
0x3b0f   :  { %4685 = vmatpush3.bf16.xpose.msra.mxu1 %v5610_v47  ;;  %4686 = vmatprep.mubr.msk.bf16.mxu1 %vm4921_vm1, %v4920_v0 }
0x3b10   :  { %4696 = vmatprep.subr.bf16.mxu1 %v4920_v0 }
0x3be1   :  { %v3449_v34 = vpop.f32.mrb[132].mxu1 }
0x3be2   :  { %v3450_v35 = vadd.f32 %v5651_v12, %v3449_v34  ;;  %v4676_v38 = vpop.f32.mrb[133].mxu1  ;;  %v3661_v34 = vmul.f32 0.90000004, %v5634_v50 }
0x3be3   :  { %v3452_v39 = vpop.f32.mrb[134].mxu1 }
0x3be4   :  { %v3456_v40 = vmul.f32 0.05, %v3450_v35  ;;  %v3453_v41 = vadd.f32 %v5651_v12, %v3452_v39  ;;  %v4677_v42 = vpop.f32.mrb[135].mxu1  ;;  %v3662_v35 = vadd.f32 %v5640_v8, %v3661_v34 }
0x3be6   :  { %v3457_v43 = vmul.f32 0.05, %v3453_v41  ;;  %v5671_v44 = vadd.f32 %v3456_v40, %v5619_v57  ;;  %v3669_v38 = vrot.slane %v3662_v35, %v5006_v13 }
0x3be8   :  { %v5674_v45 = vadd.f32 %v3457_v43, %v5622_v58 }
0x3bea   :  { %v3463_v46 = vpack.c.bf16 %v5674_v45, %v5671_v44 }
0x3bec   :  { %4681 = vmatmul.mubr.msk.bf16.vlgmr.msra.gmra.mrb[136].mxu0 %vm42_vm2, %v3463_v46 }
0x3bed   :  { %4691 = vmatpush3.bf16.msra.mxu0 %v4973_v4  ;;  %4692 = vmatprep.mubr.msk.bf16.mxu0 %vm4921_vm1, %v4920_v0 }
0x3bee   :  { %4702 = vmatprep.subr.bf16.mxu0 %v4920_v0 }
0x3cbf   :  { %v3507_v52 = vpop.f32.mrb[136].mxu0 }
0x3cc0   :  { %v3508_v53 = vadd.f32 %v3507_v52, %v3468_v51  ;;  %v4682_v54 = vpop.f32.mrb[137].mxu0 }
0x3cc1   :  { %v3510_v55 = vpop.f32.mrb[138].mxu0 }
0x3cc2   :  { %v3511_v56 = vadd.f32 %v3510_v55, %v3468_v51  ;;  %v4683_v57 = vpop.f32.mrb[139].mxu0  ;;  %4888 = vtanh.f32 %v3508_v53 }
0x3cc4   :  { %4890 = vtanh.f32 %v3511_v56 }
0x3ccc   :  { %v4889_v58 = vpop.eup %4888 }
0x3cce   :  { %v4891_v59 = vpop.eup %4890 }
0x3ccf   :  { %v3516_v60 = vpack.c.bf16 %v4891_v59, %v4889_v58 }
0x3cd1   :  { %4687 = vmatmul.mubr.bf16.vlgmr.msra.gmra.mrb[136].mxu1 %v3516_v60 }
0x3cd2   :  { %4697 = vmatpush3.bf16.xpose.msra.mxu1 %v5610_v47  ;;  %4698 = vmatprep.mubr.msk.bf16.mxu1 %vm4921_vm1, %v4920_v0 }
0x3cd3   :  { %4708 = vmatprep.subr.bf16.mxu1 %v4920_v0 }
0x3da4   :  { %v3551_v11 = vpop.f32.mrb[136].mxu1 }
0x3da5   :  { %v3552_v61 = vadd.f32 %v5651_v12, %v3551_v11  ;;  %v4688_v62 = vpop.f32.mrb[137].mxu1  ;;  %v3663_v11 = vadd.f32 %v3662_v35, %v5028_v36 }
0x3da6   :  { %v3554_v63 = vpop.f32.mrb[138].mxu1 }
0x3da7   :  { %v3558_v1 = vmul.f32 0.025, %v3552_v61  ;;  %v3555_v2 = vadd.f32 %v5651_v12, %v3554_v63  ;;  %v4689_v3 = vpop.f32.mrb[139].mxu1  ;;  %v3768_v61 = vrot.slane %v3663_v11, %v5006_v13 }
0x3da9   :  { %v3559_v5 = vmul.f32 0.025, %v3555_v2  ;;  %v3560_v7 = vadd.f32 %v3558_v1, %v5671_v44 }
0x3dab   :  { %v3561_v6 = vadd.f32 %v3559_v5, %v5674_v45 }
0x3dad   :  { %v3562_v9 = vpack.c.bf16 %v3561_v6, %v3560_v7 }
0x3daf   :  { %4693 = vmatmul.mubr.msk.bf16.vlgmr.msra.gmra.mrb[140].mxu0 %vm42_vm2, %v3562_v9 }
0x3db0   :  { %4703 = vmatpush3.bf16.msra.mxu0 %v4973_v4  ;;  %4704 = vmatprep.mubr.msk.bf16.mxu0 %vm4921_vm1, %v4920_v0 }
0x3db1   :  { %4714 = vmatprep.subr.bf16.mxu0 %v4920_v0 }
0x3e82   :  { %v3606_v15 = vpop.f32.mrb[140].mxu0 }
0x3e83   :  { %v3607_v16 = vadd.f32 %v3606_v15, %v3567_v14  ;;  %v4694_v17 = vpop.f32.mrb[141].mxu0 }
0x3e84   :  { %v3609_v18 = vpop.f32.mrb[142].mxu0 }
0x3e85   :  { %v3610_v19 = vadd.f32 %v3609_v18, %v3567_v14  ;;  %v4695_v20 = vpop.f32.mrb[143].mxu0  ;;  %4892 = vtanh.f32 %v3607_v16 }
0x3e87   :  { %4894 = vtanh.f32 %v3610_v19 }
0x3e8f   :  { %v4893_v21 = vpop.eup %4892 }
0x3e91   :  { %v4895_v23 = vpop.eup %4894 }
0x3e92   :  { %v3615_v25 = vpack.c.bf16 %v4895_v23, %v4893_v21 }
0x3e94   :  { %4699 = vmatmul.mubr.bf16.vlgmr.msra.gmra.mrb[140].mxu1 %v3615_v25 }
0x3e95   :  { %4709 = vmatpush3.bf16.xpose.msra.mxu1 %v5610_v47  ;;  %4710 = vmatprep.mubr.msk.bf16.mxu1 %vm4921_vm1, %v4920_v0 }
0x3e96   :  { %4720 = vmatprep.subr.bf16.mxu1 %v4920_v0 }
0x3f67   :  { %v3650_v24 = vpop.f32.mrb[140].mxu1 }
0x3f68   :  { %v3651_v37 = vadd.f32 %v5651_v12, %v3650_v24  ;;  %v4700_v26 = vpop.f32.mrb[141].mxu1  ;;  %v3862_v24 = vmul.f32 0.95, %v5634_v50 }
0x3f69   :  { %v3653_v27 = vpop.f32.mrb[142].mxu1 }
0x3f6a   :  { %v3657_v28 = vmul.f32 0.05, %v3651_v37  ;;  %v3654_v29 = vadd.f32 %v5651_v12, %v3653_v27  ;;  %v4701_v30 = vpop.f32.mrb[143].mxu1  ;;  %v3863_v37 = vadd.f32 %v5640_v8, %v3862_v24 }
0x3f6c   :  { %v3658_v31 = vmul.f32 0.05, %v3654_v29  ;;  %v5708_v32 = vadd.f32 %v3657_v28, %v5671_v44  ;;  %v3870_v26 = vrot.slane %v3863_v37, %v5006_v13 }
0x3f6e   :  { %v5711_v33 = vadd.f32 %v3658_v31, %v5674_v45 }
0x3f70   :  { %v3664_v22 = vpack.c.bf16 %v5711_v33, %v5708_v32 }
0x3f72   :  { %4705 = vmatmul.mubr.msk.bf16.vlgmr.msra.gmra.mrb[144].mxu0 %vm42_vm2, %v3664_v22 }
0x3f73   :  { %4715 = vmatpush3.bf16.msra.mxu0 %v4973_v4  ;;  %4716 = vmatprep.mubr.msk.bf16.mxu0 %vm4921_vm1, %v4920_v0 }
0x3f74   :  { %4726 = vmatprep.subr.bf16.mxu0 %v4920_v0 }
0x4045   :  { %v3708_v39 = vpop.f32.mrb[144].mxu0 }
0x4046   :  { %v3709_v40 = vadd.f32 %v3708_v39, %v3669_v38  ;;  %v4706_v41 = vpop.f32.mrb[145].mxu0 }
0x4047   :  { %v3711_v42 = vpop.f32.mrb[146].mxu0 }
0x4048   :  { %v3712_v43 = vadd.f32 %v3711_v42, %v3669_v38  ;;  %v4707_v44 = vpop.f32.mrb[147].mxu0  ;;  %4896 = vtanh.f32 %v3709_v40 }
0x404a   :  { %4898 = vtanh.f32 %v3712_v43 }
0x4052   :  { %v4897_v45 = vpop.eup %4896 }
0x4054   :  { %v4899_v46 = vpop.eup %4898 }
0x4055   :  { %v3717_v48 = vpack.c.bf16 %v4899_v46, %v4897_v45 }
0x4057   :  { %4711 = vmatmul.mubr.bf16.vlgmr.msra.gmra.mrb[144].mxu1 %v3717_v48 }
0x4058   :  { %4721 = vmatpush3.bf16.xpose.msra.mxu1 %v5610_v47  ;;  %4722 = vmatprep.mubr.msk.bf16.mxu1 %vm4921_vm1, %v4920_v0 }
0x4059   :  { %4732 = vmatprep.subr.bf16.mxu1 %v4920_v0 }
0x412a   :  { %v3752_v49 = vpop.f32.mrb[144].mxu1 }
0x412b   :  { %v3753_v51 = vadd.f32 %v5651_v12, %v3752_v49  ;;  %v4712_v52 = vpop.f32.mrb[145].mxu1 }
0x412c   :  { %v3755_v53 = vpop.f32.mrb[146].mxu1 }
0x412d   :  { %v3759_v54 = vmul.f32 0.025, %v3753_v51  ;;  %v3756_v55 = vadd.f32 %v5651_v12, %v3755_v53  ;;  %v4713_v56 = vpop.f32.mrb[147].mxu1 }
0x412f   :  { %v3760_v57 = vmul.f32 0.025, %v3756_v55  ;;  %v3761_v58 = vadd.f32 %v3759_v54, %v5708_v32 }
0x4131   :  { %v3762_v59 = vadd.f32 %v3760_v57, %v5711_v33 }
0x4133   :  { %v3763_v60 = vpack.c.bf16 %v3762_v59, %v3761_v58 }
0x4135   :  { %4717 = vmatmul.mubr.msk.bf16.vlgmr.msra.gmra.mrb[148].mxu0 %vm42_vm2, %v3763_v60 }
0x4136   :  { %4727 = vmatpush3.bf16.msra.mxu0 %v4973_v4  ;;  %4728 = vmatprep.mubr.msk.bf16.mxu0 %vm4921_vm1, %v4920_v0 }
0x4137   :  { %4738 = vmatprep.subr.bf16.mxu0 %v4920_v0 }
0x4208   :  { %v3807_v62 = vpop.f32.mrb[148].mxu0 }
0x4209   :  { %v3808_v63 = vadd.f32 %v3807_v62, %v3768_v61  ;;  %v4718_v1 = vpop.f32.mrb[149].mxu0 }
0x420a   :  { %v3810_v2 = vpop.f32.mrb[150].mxu0 }
0x420b   :  { %v3811_v3 = vadd.f32 %v3810_v2, %v3768_v61  ;;  %v4719_v5 = vpop.f32.mrb[151].mxu0  ;;  %4900 = vtanh.f32 %v3808_v63 }
0x420d   :  { %4902 = vtanh.f32 %v3811_v3 }
0x4215   :  { %v4901_v7 = vpop.eup %4900 }
0x4217   :  { %v4903_v6 = vpop.eup %4902 }
0x4218   :  { %v3816_v9 = vpack.c.bf16 %v4903_v6, %v4901_v7 }
0x421a   :  { %4723 = vmatmul.mubr.bf16.vlgmr.msra.gmra.mrb[148].mxu1 %v3816_v9 }
0x421b   :  { %4733 = vmatpush3.bf16.xpose.msra.mxu1 %v5610_v47  ;;  %4734 = vmatprep.mubr.msk.bf16.mxu1 %vm4921_vm1, %v4920_v0 }
0x421c   :  { %4744 = vmatprep.subr.bf16.mxu1 %v4920_v0 }
0x42ed   :  { %v3851_v10 = vpop.f32.mrb[148].mxu1 }
0x42ee   :  { %v3852_v14 = vadd.f32 %v5651_v12, %v3851_v10  ;;  %v4724_v15 = vpop.f32.mrb[149].mxu1 }
0x42ef   :  { %v3854_v16 = vpop.f32.mrb[150].mxu1 }
0x42f0   :  { %v3858_v17 = vmul.f32 0.05, %v3852_v14  ;;  %v3855_v18 = vadd.f32 %v5651_v12, %v3854_v16  ;;  %v4725_v19 = vpop.f32.mrb[151].mxu1 }
0x42f2   :  { %v3859_v20 = vmul.f32 0.05, %v3855_v18  ;;  %v3860_v21 = vadd.f32 %v3858_v17, %v5708_v32 }
0x42f4   :  { %v3861_v23 = vadd.f32 %v3859_v20, %v5711_v33 }
0x42f6   :  { %v3865_v25 = vpack.c.bf16 %v3861_v23, %v3860_v21 }
0x42f8   :  { %4729 = vmatmul.mubr.msk.bf16.vlgmr.msra.gmra.mrb[152].mxu0 %vm42_vm2, %v3865_v25 }
0x42f9   :  { %4739 = vmatpush3.bf16.msra.mxu0 %v4973_v4  ;;  %4740 = vmatprep.mubr.msk.bf16.mxu0 %vm4921_vm1, %v4920_v0 }
0x43cb   :  { %v3909_v27 = vpop.f32.mrb[152].mxu0 }
0x43cc   :  { %v3910_v28 = vadd.f32 %v3909_v27, %v3870_v26  ;;  %v4730_v29 = vpop.f32.mrb[153].mxu0 }
0x43cd   :  { %v3912_v30 = vpop.f32.mrb[154].mxu0 }
0x43ce   :  { %v3913_v31 = vadd.f32 %v3912_v30, %v3870_v26  ;;  %v4731_v32 = vpop.f32.mrb[155].mxu0  ;;  %4904 = vtanh.f32 %v3910_v28 }
0x43d0   :  { %4906 = vtanh.f32 %v3913_v31 }
0x43d8   :  { %v4905_v33 = vpop.eup %4904 }
0x43da   :  { %v4907_v22 = vpop.eup %4906 }
0x43db   :  { %v3918_v4 = vpack.c.bf16 %v4907_v22, %v4905_v33 }
0x43dd   :  { %4735 = vmatmul.mubr.bf16.vlgmr.msra.gmra.mrb[152].mxu1 %v3918_v4 }
0x43de   :  { %4745 = vmatpush3.bf16.xpose.msra.mxu1 %v5610_v47  ;;  %4746 = vmatprep.mubr.msk.bf16.mxu1 %vm4921_vm1, %v4920_v0  ;;  %v3864_v47 = vadd.f32 %v3863_v37, %v5028_v36 }
0x43e0   :  { %v3969_v45 = vrot.slane %v3864_v47, %v5006_v13 }
0x44b0   :  { %v3953_v50 = vpop.f32.mrb[152].mxu1 }
0x44b1   :  { %v3954_v8 = vadd.f32 %v5651_v12, %v3953_v50  ;;  %v4736_v34 = vpop.f32.mrb[153].mxu1 }
0x44b2   :  { %v3956_v35 = vpop.f32.mrb[154].mxu1 }
0x44b3   :  { %v3960_v38 = vmul.f32 0.025, %v3954_v8  ;;  %v3957_v39 = vadd.f32 %v5651_v12, %v3956_v35  ;;  %v4737_v40 = vpop.f32.mrb[155].mxu1 }
0x44b5   :  { %v3961_v41 = vmul.f32 0.025, %v3957_v39  ;;  %v3962_v42 = vadd.f32 %v3960_v38, %v3860_v21 }
0x44b7   :  { %v3963_v43 = vadd.f32 %v3961_v41, %v3861_v23 }
0x44b9   :  { %v3964_v44 = vpack.c.bf16 %v3963_v43, %v3962_v42 }
0x44bb   :  { %4741 = vmatmul.mubr.msk.bf16.vlgmr.msra.gmra.mrb[156].mxu0 %vm42_vm2, %v3964_v44 }
0x458e   :  { %v4008_v0 = vpop.f32.mrb[156].mxu0 }
0x458f   :  { %v4009_v46 = vadd.f32 %v4008_v0, %v3969_v45  ;;  %v4742_v48 = vpop.f32.mrb[157].mxu0 }
0x4590   :  { %v4011_v49 = vpop.f32.mrb[158].mxu0 }
0x4591   :  { %v4012_v51 = vadd.f32 %v4011_v49, %v3969_v45  ;;  %v4743_v52 = vpop.f32.mrb[159].mxu0  ;;  %4908 = vtanh.f32 %v4009_v46 }
0x4593   :  { %4910 = vtanh.f32 %v4012_v51 }
0x459b   :  { %v4909_v53 = vpop.eup %4908 }
0x459d   :  { %v4911_v54 = vpop.eup %4910 }
0x459e   :  { %v4017_v55 = vpack.c.bf16 %v4911_v54, %v4909_v53 }
0x45a0   :  { %4747 = vmatmul.mubr.bf16.vlgmr.msra.gmra.mrb[156].mxu1 %v4017_v55 }
0x4673   :  { %v4052_v56 = vpop.f32.mrb[156].mxu1 }
0x4674   :  { %v4053_v57 = vadd.f32 %v5651_v12, %v4052_v56  ;;  %v4748_v58 = vpop.f32.mrb[157].mxu1 }
0x4675   :  { %v4055_v59 = vpop.f32.mrb[158].mxu1 }
0x4676   :  { %v4059_v36 = vmul.f32 0.05, %v4053_v57  ;;  %v4056_v13 = vadd.f32 %v5651_v12, %v4055_v59  ;;  %v4749_v60 = vpop.f32.mrb[159].mxu1 }
0x4678   :  { %v4061_v11 = vadd.f32 %v4059_v36, %v3860_v21  ;;  %v4060_v61 = vmul.f32 0.05, %v4056_v13 }
0x467a   :  { %4063 = vst.msk [vmem:[%s5777_s6] sm:$0xff] %vm42_vm2, %v4061_v11  ;;  %v4062_v62 = vadd.f32 %v4060_v61, %v3861_v23 }
0x467c   :  { %4064 = vst.msk [vmem:[%s5777_s6 + $0x8] sm:$0xff] %vm42_vm2, %v4062_v62 }

</bundles_post_ra>
